<compile_context>
chip_gen: v7x
topology: tpu7x:2x2x1
jax: 0.10.0
libtpu: 0.0.40
codegen_flags: <defaults>
</compile_context>

<pallas_src>
import math

import jax
import jax.numpy as jnp
from jax.experimental import pallas as pl
from jax.experimental.pallas import tpu as pltpu


_LN_EPS = 1e-5
_VMEM_LIMIT = 32 * 1024 * 1024


# ----------------------------------------------------------------------------
# Spec helpers (all grids here are 1-D)
# ----------------------------------------------------------------------------
def _row_tile(m, target=512):
    """Largest row tile <= target that is a multiple of 8 and divides m."""
    if m <= target:
        return m
    t = (target // 8) * 8
    while t >= 8:
        if m % t == 0:
            return t
        t -= 8
    return m


def _row_spec(tm, c):
    return pl.BlockSpec((tm, c), lambda i: (i, 0))


def _rep_spec(shape):
    zeros = (0,) * len(shape)
    return pl.BlockSpec(shape, lambda i, _z=zeros: _z)


# ----------------------------------------------------------------------------
# Stage A: fc1 + ReLU -> ln_1 -> in_proj (split into x / z halves)
# ----------------------------------------------------------------------------
def _embed_kernel(x_ref, w1_ref, b1_ref, g1_ref, bb1_ref, winx_ref, winz_ref,
                  h1_ref, xs_ref, z_ref):
    # fc1 + ReLU (pos_drop is identity at eval)
    h = jnp.dot(x_ref[...], w1_ref[...], preferred_element_type=jnp.float32) + b1_ref[...]
    h = jnp.maximum(h, 0.0)
    h1_ref[...] = h
    # ln_1
    mu = jnp.mean(h, axis=-1, keepdims=True)
    var = jnp.mean((h - mu) ** 2, axis=-1, keepdims=True)
    xn = (h - mu) * jax.lax.rsqrt(var + _LN_EPS) * g1_ref[...] + bb1_ref[...]
    # in_proj (no bias), x / z halves via pre-split weights (no in-kernel lane slices)
    xs_ref[...] = jnp.dot(xn, winx_ref[...], preferred_element_type=jnp.float32)
    z_ref[...] = jnp.dot(xn, winz_ref[...], preferred_element_type=jnp.float32)


# ----------------------------------------------------------------------------
# Stage B: fused SS2D core — depthwise conv1d(k=3,p=1)+SiLU, x_proj/dt_proj,
#          softplus, and the sequential selective scan over L.
# All (view, channel) data is lane-dense: last axis = V * d_inner.
# ----------------------------------------------------------------------------
def _ss2d_core_kernel(xs_ref, cw_ref, cb_ref, wdt_ref, dtb_ref, wb_ref, wc_ref,
                      at_ref, dsk_ref, y_ref, xpad_s, u_s, dl_s, b_s, c_s):
    L, VD = xs_ref.shape
    N = at_ref.shape[0]

    # ---- depthwise conv1d over L (zero padding = 1) + SiLU -------------------
    x = xs_ref[...]                                   # (L, VD)
    zero_row = jnp.zeros((1, VD), jnp.float32)
    xpad_s[0:1, :] = zero_row
    xpad_s[L + 1:L + 2, :] = zero_row
    xpad_s[1:L + 1, :] = x
    w = cw_ref[...]                                   # (3, VD), tiled per view
    u = (xpad_s[0:L, :] * w[0:1, :]
         + xpad_s[1:L + 1, :] * w[1:2, :]
         + xpad_s[2:L + 2, :] * w[2:3, :]) + cb_ref[...]
    u = u * jax.nn.sigmoid(u)                         # SiLU
    u_s[...] = u

    # ---- projections (block-diagonal over views, dt_proj pre-folded) --------
    delta = jnp.dot(u, wdt_ref[...], preferred_element_type=jnp.float32) + dtb_ref[...]
    # softplus with threshold 20 (F.softplus semantics)
    dl_s[...] = jnp.where(delta > 20.0, delta, jnp.log1p(jnp.exp(delta)))
    for n in range(N):                                # N small & static -> unrolled
        b_s[n, :, :] = jnp.dot(u, wb_ref[n, :, :], preferred_element_type=jnp.float32)
        c_s[n, :, :] = jnp.dot(u, wc_ref[n, :, :], preferred_element_type=jnp.float32)

    a_t = at_ref[...]                                 # (N, 1, VD) = -exp(A_log)^T
    d_skip = dsk_ref[...]                             # (1, VD)

    # ---- selective scan: h_l = exp(dt*A) h_{l-1} + dt*B_l*u_l ; y = <C_l,h> + D*u
    def step(l, h):                                   # h: (N, 1, VD)
        u_l = u_s[pl.ds(l, 1), :]                     # (1, VD)
        dl_l = dl_s[pl.ds(l, 1), :]                   # (1, VD)
        b_l = b_s[:, pl.ds(l, 1), :]                  # (N, 1, VD)
        c_l = c_s[:, pl.ds(l, 1), :]                  # (N, 1, VD)
        da = jnp.exp(dl_l[None, :, :] * a_t)
        h = da * h + (dl_l * u_l)[None, :, :] * b_l
        y_l = jnp.sum(h * c_l, axis=0) + d_skip * u_l
        y_ref[pl.ds(l, 1), :] = y_l
        return h

    h0 = jnp.zeros((N, 1, VD), jnp.float32)
    jax.lax.fori_loop(0, L, step, h0, unroll=True)
    # TODO(synk): for long L, chunk conv/proj/scan over L-blocks so VMEM scratch
    # (which scales with L) stays bounded while the recurrence carries h across chunks.


# ----------------------------------------------------------------------------
# Stage C: out_norm -> * SiLU(z) -> out_proj -> residual add -> final LayerNorm
# ----------------------------------------------------------------------------
def _gate_out_kernel(y_ref, z_ref, h1_ref, go_ref, bo_ref, wout_ref, gf_ref, bf_ref,
                     x3_ref):
    y = y_ref[...]
    mu = jnp.mean(y, axis=-1, keepdims=True)
    var = jnp.mean((y - mu) ** 2, axis=-1, keepdims=True)
    yn = (y - mu) * jax.lax.rsqrt(var + _LN_EPS) * go_ref[...] + bo_ref[...]
    z = z_ref[...]
    yg = yn * (z * jax.nn.sigmoid(z))
    out = jnp.dot(yg, wout_ref[...], preferred_element_type=jnp.float32)
    x2 = h1_ref[...] + out                            # residual (DropPath = identity)
    mu2 = jnp.mean(x2, axis=-1, keepdims=True)
    var2 = jnp.mean((x2 - mu2) ** 2, axis=-1, keepdims=True)
    x3_ref[...] = (x2 - mu2) * jax.lax.rsqrt(var2 + _LN_EPS) * gf_ref[...] + bf_ref[...]


# ----------------------------------------------------------------------------
# Pools / projector / head
# ----------------------------------------------------------------------------
def _pool_kernel(x_ref, agent_ref, slide_ref):
    x = x_ref[...]                     # (B, L, V, D)
    p = jnp.max(x, axis=1)             # max over L -> (B, V, D)
    agent_ref[...] = p
    slide_ref[...] = jnp.max(p, axis=1)


def _projector_kernel(x_ref, w1_ref, w2_ref, o_ref):
    a = jnp.maximum(
        jnp.dot(x_ref[...], w1_ref[...], preferred_element_type=jnp.float32), 0.0)
    o_ref[...] = jnp.dot(a, w2_ref[...], preferred_element_type=jnp.float32)


def _head_kernel(x_ref, w_ref, b_ref, logits_ref, prob_ref):
    logits = jnp.dot(x_ref[...], w_ref[...], preferred_element_type=jnp.float32) + b_ref[...]
    logits_ref[...] = logits
    m = jnp.max(logits, axis=-1, keepdims=True)
    e = jnp.exp(logits - m)
    s = jnp.sum(e, axis=-1, keepdims=True)
    prob_ref[...] = e * pl.reciprocal(s, approx=True)


# ----------------------------------------------------------------------------
# Parameter init (deterministic, synthetic)
# ----------------------------------------------------------------------------
def init_params(key, d_in, d_model, d_state, n_views, n_classes):
    d_inner = 2 * d_model
    dt_rank = math.ceil(d_model / 16)
    ks = jax.random.split(key, 16)

    def trunc(k, shape, std=0.02):
        return std * jax.random.truncated_normal(k, -2.0, 2.0, shape, jnp.float32)

    p = {}
    p["fc1_w"] = trunc(ks[0], (d_in, d_model))
    p["fc1_b"] = jnp.zeros((d_model,), jnp.float32)
    p["ln1_g"] = jnp.ones((d_model,), jnp.float32)
    p["ln1_b"] = jnp.zeros((d_model,), jnp.float32)
    p["in_proj_w"] = trunc(ks[1], (d_model, 2 * d_inner))
    cf = 1.0 / math.sqrt(3.0)
    p["conv_w"] = jax.random.uniform(ks[2], (3, d_inner), jnp.float32, -cf, cf)
    p["conv_b"] = jax.random.uniform(ks[3], (d_inner,), jnp.float32, -cf, cf)
    xs = 1.0 / math.sqrt(d_inner)
    p["x_proj_wt"] = jax.random.uniform(
        ks[4], (n_views, d_inner, dt_rank + 2 * d_state), jnp.float32, -xs, xs)
    ds_ = dt_rank ** -0.5
    p["dt_proj_wt"] = jax.random.uniform(
        ks[5], (n_views, dt_rank, d_inner), jnp.float32, -ds_, ds_)
    dt = jnp.exp(jax.random.uniform(ks[6], (n_views, d_inner), jnp.float32)
                 * (math.log(0.1) - math.log(0.001)) + math.log(0.001))
    dt = jnp.maximum(dt, 1e-4)
    p["dt_bias"] = dt + jnp.log(-jnp.expm1(-dt))
    a = jnp.arange(1, d_state + 1, dtype=jnp.float32)
    p["A_logs"] = jnp.log(jnp.broadcast_to(a, (n_views, d_inner, d_state)))  # (V, Dh, N)
    p["Ds"] = jnp.ones((n_views, d_inner), jnp.float32)
    p["out_norm_g"] = jnp.ones((d_inner,), jnp.float32)
    p["out_norm_b"] = jnp.zeros((d_inner,), jnp.float32)
    p["out_proj_w"] = trunc(ks[7], (d_inner, d_model))
    p["norm_g"] = jnp.ones((d_model,), jnp.float32)
    p["norm_b"] = jnp.zeros((d_model,), jnp.float32)
    p["proj1_w"] = trunc(ks[8], (d_model, d_model))
    p["proj2_w"] = trunc(ks[9], (d_model, 64))
    p["head_w"] = trunc(ks[10], (d_model, n_classes))
    p["head_b"] = jnp.zeros((n_classes,), jnp.float32)
    return p


# ----------------------------------------------------------------------------
# Full forward pass
# ----------------------------------------------------------------------------
def tree_mamba_forward(x, p, *, n_views, d_state):
    B, L, V, d_in = x.shape
    assert V == n_views
    d_model = p["fc1_w"].shape[1]
    d_inner = 2 * d_model
    dt_rank = p["dt_proj_wt"].shape[1]
    N = d_state
    VD = V * d_inner
    M = B * L * V
    n_classes = p["head_w"].shape[1]

    tm = _row_tile(M)
    n_tiles = M // tm

    # ---------------- stage A: fc1+ReLU -> ln_1 -> in_proj -------------------
    h1, xs, z = pl.pallas_call(
        _embed_kernel,
        grid=(n_tiles,),
        in_specs=[
            _row_spec(tm, d_in),
            _rep_spec((d_in, d_model)),
            _rep_spec((1, d_model)),
            _rep_spec((1, d_model)),
            _rep_spec((1, d_model)),
            _rep_spec((d_model, d_inner)),
            _rep_spec((d_model, d_inner)),
        ],
        out_specs=[_row_spec(tm, d_model), _row_spec(tm, d_inner), _row_spec(tm, d_inner)],
        out_shape=[
            jax.ShapeDtypeStruct((M, d_model), jnp.float32),
            jax.ShapeDtypeStruct((M, d_inner), jnp.float32),
            jax.ShapeDtypeStruct((M, d_inner), jnp.float32),
        ],
        compiler_params=pltpu.CompilerParams(
            dimension_semantics=("parallel",), vmem_limit_bytes=_VMEM_LIMIT),
    )(x.reshape(M, d_in), p["fc1_w"], p["fc1_b"].reshape(1, -1),
      p["ln1_g"].reshape(1, -1), p["ln1_b"].reshape(1, -1),
      p["in_proj_w"][:, :d_inner], p["in_proj_w"][:, d_inner:])

    # -------- SS2D weight precompute (lane-dense, view-block-diagonal) -------
    conv_w_vd = jnp.tile(p["conv_w"], (1, V))                       # (3, VD)
    conv_b_vd = jnp.tile(p["conv_b"], (V,)).reshape(1, VD)          # (1, VD)
    eye_v = jnp.eye(V, dtype=jnp.float32)
    ones_dh = jnp.ones((d_inner,), jnp.float32)
    # dt projection folded: W_dt[v] = x_proj_wt[v][:, :R] @ dt_proj_wt[v]
    w_dt = jnp.einsum("vdr,vre->vde", p["x_proj_wt"][:, :, :dt_rank], p["dt_proj_wt"])
    w_dt_bd = jnp.einsum("vde,vw->vdwe", w_dt, eye_v).reshape(VD, VD)
    wx_b = p["x_proj_wt"][:, :, dt_rank:dt_rank + N]                # (V, Dh, N)
    wx_c = p["x_proj_wt"][:, :, dt_rank + N:dt_rank + 2 * N]
    # B/C projections pre-broadcast over d_inner so the kernel output is (N, L, VD)
    w_b_exp = jnp.einsum("vcn,vw,e->nvcwe", wx_b, eye_v, ones_dh).reshape(N, VD, VD)
    w_c_exp = jnp.einsum("vcn,vw,e->nvcwe", wx_c, eye_v, ones_dh).reshape(N, VD, VD)
    # TODO(synk): these expanded B/C weights scale as N*VD^2; for large d_inner switch to
    # compact (V*N)-wide projections + an in-kernel per-view broadcast.
    a_t = jnp.transpose((-jnp.exp(p["A_logs"])).reshape(VD, N)).reshape(N, 1, VD)
    dt_bias_vd = p["dt_bias"].reshape(1, VD)
    d_vd = p["Ds"].reshape(1, VD)

    # ------------- stage B: fused conv + projections + selective scan --------
    xs_bld = xs.reshape(B, L, VD)        # (v, c) folded onto lanes: index v*d_inner + c
    y_scan = pl.pallas_call(
        _ss2d_core_kernel,
        grid=(B,),
        in_specs=[
            pl.BlockSpec((None, L, VD), lambda b: (b, 0, 0)),
            _rep_spec((3, VD)),
            _rep_spec((1, VD)),
            _rep_spec((VD, VD)),
            _rep_spec((1, VD)),
            _rep_spec((N, VD, VD)),
            _rep_spec((N, VD, VD)),
            _rep_spec((N, 1, VD)),
            _rep_spec((1, VD)),
        ],
        out_specs=pl.BlockSpec((None, L, VD), lambda b: (b, 0, 0)),
        out_shape=jax.ShapeDtypeStruct((B, L, VD), jnp.float32),
        scratch_shapes=[
            pltpu.VMEM((L + 2, VD), jnp.float32),   # padded conv input
            pltpu.VMEM((L, VD), jnp.float32),       # u = SiLU(conv(x))
            pltpu.VMEM((L, VD), jnp.float32),       # delta (post softplus)
            pltpu.VMEM((N, L, VD), jnp.float32),    # B (pre-broadcast over channels)
            pltpu.VMEM((N, L, VD), jnp.float32),    # C (pre-broadcast over channels)
        ],
        compiler_params=pltpu.CompilerParams(
            dimension_semantics=("parallel",), vmem_limit_bytes=_VMEM_LIMIT),
    )(xs_bld, conv_w_vd, conv_b_vd, w_dt_bd, dt_bias_vd, w_b_exp, w_c_exp, a_t, d_vd)

    # PyTorch `.view(B, L, V, -1)` on the (B, V*d_inner, L)-contiguous scan output is a
    # flat memory reinterpretation; reproduced exactly by this transpose + flat reshape.
    y_pt = jnp.transpose(y_scan, (0, 2, 1)).reshape(M, d_inner)

    # ---- stage C: out_norm -> SiLU(z) gate -> out_proj -> residual -> norm ---
    x3 = pl.pallas_call(
        _gate_out_kernel,
        grid=(n_tiles,),
        in_specs=[
            _row_spec(tm, d_inner),
            _row_spec(tm, d_inner),
            _row_spec(tm, d_model),
            _rep_spec((1, d_inner)),
            _rep_spec((1, d_inner)),
            _rep_spec((d_inner, d_model)),
            _rep_spec((1, d_model)),
            _rep_spec((1, d_model)),
        ],
        out_specs=_row_spec(tm, d_model),
        out_shape=jax.ShapeDtypeStruct((M, d_model), jnp.float32),
        compiler_params=pltpu.CompilerParams(
            dimension_semantics=("parallel",), vmem_limit_bytes=_VMEM_LIMIT),
    )(y_pt, z, h1, p["out_norm_g"].reshape(1, -1), p["out_norm_b"].reshape(1, -1),
      p["out_proj_w"], p["norm_g"].reshape(1, -1), p["norm_b"].reshape(1, -1))

    # ---------------- pools: max over L (agents), then max over V (slide) ----
    agent_pool, slide_features = pl.pallas_call(
        _pool_kernel,
        out_shape=[
            jax.ShapeDtypeStruct((B, V, d_model), jnp.float32),
            jax.ShapeDtypeStruct((B, d_model), jnp.float32),
        ],
    )(x3.reshape(B, L, V, d_model))

    # ---------------- projector (Linear -> ReLU -> Linear, no bias) ----------
    proj_dim = p["proj2_w"].shape[1]
    agents = pl.pallas_call(
        _projector_kernel,
        out_shape=jax.ShapeDtypeStruct((B * V, proj_dim), jnp.float32),
    )(agent_pool.reshape(B * V, d_model), p["proj1_w"], p["proj2_w"])
    agent_features = agents.reshape(B, V, proj_dim)

    # ---------------- head + softmax -----------------------------------------
    logits, y_prob = pl.pallas_call(
        _head_kernel,
        out_shape=[
            jax.ShapeDtypeStruct((B, n_classes), jnp.float32),
            jax.ShapeDtypeStruct((B, n_classes), jnp.float32),
        ],
    )(slide_features, p["head_w"], p["head_b"].reshape(1, -1))

    return {"features": slide_features, "logits": logits,
            "agents": agent_features, "y_prob": y_prob}


if __name__ == "__main__":
    B, L, V = 2, 8, 4
    d_in, d_model, d_state, n_classes = 48, 32, 4, 4

    key = jax.random.PRNGKey(0)
    kx, kp = jax.random.split(key)
    x = jax.random.normal(kx, (B, L, V, d_in), jnp.float32)
    params = init_params(kp, d_in, d_model, d_state, V, n_classes)

    fwd = jax.jit(tree_mamba_forward, static_argnames=("n_views", "d_state"))
    outputs = fwd(x, params, n_views=V, d_state=d_state)
    jax.block_until_ready(outputs)

    assert outputs["features"].shape == (B, d_model)
    assert outputs["logits"].shape == (B, n_classes)
    assert outputs["y_prob"].shape == (B, n_classes)
    assert outputs["agents"].shape == (B, V, 64)
    assert bool(jnp.all(jnp.isfinite(outputs["y_prob"])))
    assert bool(jnp.all(jnp.isfinite(outputs["agents"])))
    print("KERNEL_OK")
</pallas_src>

<mosaic_0001>
module attributes {stable_mosaic.version = 11 : i64} {
  func.func @_embed_kernel(%arg0: i32, %arg1: memref<64x48xf32, #tpu.memory_space<vmem>>, %arg2: memref<48x32xf32, #tpu.memory_space<vmem>>, %arg3: memref<1x32xf32, #tpu.memory_space<vmem>>, %arg4: memref<1x32xf32, #tpu.memory_space<vmem>>, %arg5: memref<1x32xf32, #tpu.memory_space<vmem>>, %arg6: memref<32x64xf32, #tpu.memory_space<vmem>>, %arg7: memref<32x64xf32, #tpu.memory_space<vmem>>, %arg8: memref<64x32xf32, #tpu.memory_space<vmem>>, %arg9: memref<64x64xf32, #tpu.memory_space<vmem>>, %arg10: memref<64x64xf32, #tpu.memory_space<vmem>>) attributes {dimension_semantics = [#tpu.dimension_semantics<parallel>], iteration_bounds = array<i64: 1>, scalar_prefetch = 0 : i64, scratch_operands = 0 : i64, tpu.core_type = #tpu.core_type<tc>, window_params = [{transform_indices = @transform_0, window_bounds = array<i64: 64, 48>}, {pipeline_mode = #tpu.pipeline_mode<synchronous>, transform_indices = @transform_1, window_bounds = array<i64: 48, 32>}, {pipeline_mode = #tpu.pipeline_mode<synchronous>, transform_indices = @transform_2, window_bounds = array<i64: 1, 32>}, {pipeline_mode = #tpu.pipeline_mode<synchronous>, transform_indices = @transform_3, window_bounds = array<i64: 1, 32>}, {pipeline_mode = #tpu.pipeline_mode<synchronous>, transform_indices = @transform_4, window_bounds = array<i64: 1, 32>}, {pipeline_mode = #tpu.pipeline_mode<synchronous>, transform_indices = @transform_5, window_bounds = array<i64: 32, 64>}, {pipeline_mode = #tpu.pipeline_mode<synchronous>, transform_indices = @transform_6, window_bounds = array<i64: 32, 64>}, {transform_indices = @transform_7, window_bounds = array<i64: 64, 32>}, {transform_indices = @transform_8, window_bounds = array<i64: 64, 64>}, {transform_indices = @transform_9, window_bounds = array<i64: 64, 64>}]} {
    %c0 = arith.constant 0 : index
    %c0_0 = arith.constant 0 : index
    %0 = vector.load %arg1[%c0, %c0_0] : memref<64x48xf32, #tpu.memory_space<vmem>>, vector<64x48xf32>
    %c0_1 = arith.constant 0 : index
    %c0_2 = arith.constant 0 : index
    %1 = vector.load %arg2[%c0_1, %c0_2] : memref<48x32xf32, #tpu.memory_space<vmem>>, vector<48x32xf32>
    %cst = arith.constant dense<0.000000e+00> : vector<64x32xf32>
    %2 = tpu.matmul %0, %1, %cst {dimension_numbers = #tpu.dot_dimension_numbers<[1], [0], [0], [1], [0, 0, 1, 1], [], []>} : vector<64x48xf32>, vector<48x32xf32>, vector<64x32xf32> -> vector<64x32xf32>
    %c0_3 = arith.constant 0 : index
    %c0_4 = arith.constant 0 : index
    %3 = vector.load %arg3[%c0_3, %c0_4] : memref<1x32xf32, #tpu.memory_space<vmem>>, vector<1x32xf32>
    %4 = vector.broadcast %3 : vector<1x32xf32> to vector<64x32xf32>
    %5 = arith.addf %2, %4 : vector<64x32xf32>
    %cst_5 = arith.constant 0.000000e+00 : f32
    %6 = vector.broadcast %cst_5 : f32 to vector<64x32xf32>
    %7 = arith.maximumf %5, %6 : vector<64x32xf32>
    %c0_6 = arith.constant 0 : index
    %c0_7 = arith.constant 0 : index
    %8 = vector.load %arg8[%c0_6, %c0_7] : memref<64x32xf32, #tpu.memory_space<vmem>>, vector<64x32xf32>
    tpu.vector_store %arg8[%c0_6, %c0_7], %7 {strides = array<i32>} : memref<64x32xf32, #tpu.memory_space<vmem>>, vector<64x32xf32>,
    %cst_8 = arith.constant dense<0.000000e+00> : vector<64xf32>
    %9 = vector.multi_reduction <add>, %7, %cst_8 [1] : vector<64x32xf32> to vector<64xf32>
    %10 = vector.shape_cast %9 : vector<64xf32> to vector<64x1xf32>
    %cst_9 = arith.constant 3.200000e+01 : f32
    %11 = vector.broadcast %cst_9 : f32 to vector<64x1xf32>
    %12 = arith.divf %10, %11 : vector<64x1xf32>
    %13 = vector.broadcast %12 : vector<64x1xf32> to vector<64x32xf32>
    %14 = arith.subf %7, %13 : vector<64x32xf32>
    %15 = arith.mulf %14, %14 : vector<64x32xf32>
    %cst_10 = arith.constant dense<0.000000e+00> : vector<64xf32>
    %16 = vector.multi_reduction <add>, %15, %cst_10 [1] : vector<64x32xf32> to vector<64xf32>
    %17 = vector.shape_cast %16 : vector<64xf32> to vector<64x1xf32>
    %cst_11 = arith.constant 3.200000e+01 : f32
    %18 = vector.broadcast %cst_11 : f32 to vector<64x1xf32>
    %19 = arith.divf %17, %18 : vector<64x1xf32>
    %20 = vector.broadcast %12 : vector<64x1xf32> to vector<64x32xf32>
    %21 = arith.subf %7, %20 : vector<64x32xf32>
    %cst_12 = arith.constant 9.99999974E-6 : f32
    %22 = vector.broadcast %cst_12 : f32 to vector<64x1xf32>
    %23 = arith.addf %19, %22 : vector<64x1xf32>
    %24 = math.rsqrt %23 : vector<64x1xf32>
    %25 = vector.broadcast %24 : vector<64x1xf32> to vector<64x32xf32>
    %26 = arith.mulf %21, %25 : vector<64x32xf32>
    %c0_13 = arith.constant 0 : index
    %c0_14 = arith.constant 0 : index
    %27 = vector.load %arg4[%c0_13, %c0_14] : memref<1x32xf32, #tpu.memory_space<vmem>>, vector<1x32xf32>
    %28 = vector.broadcast %27 : vector<1x32xf32> to vector<64x32xf32>
    %29 = arith.mulf %26, %28 : vector<64x32xf32>
    %c0_15 = arith.constant 0 : index
    %c0_16 = arith.constant 0 : index
    %30 = vector.load %arg5[%c0_15, %c0_16] : memref<1x32xf32, #tpu.memory_space<vmem>>, vector<1x32xf32>
    %31 = vector.broadcast %30 : vector<1x32xf32> to vector<64x32xf32>
    %32 = arith.addf %29, %31 : vector<64x32xf32>
    %c0_17 = arith.constant 0 : index
    %c0_18 = arith.constant 0 : index
    %33 = vector.load %arg6[%c0_17, %c0_18] : memref<32x64xf32, #tpu.memory_space<vmem>>, vector<32x64xf32>
    %cst_19 = arith.constant dense<0.000000e+00> : vector<64x64xf32>
    %34 = tpu.matmul %32, %33, %cst_19 {dimension_numbers = #tpu.dot_dimension_numbers<[1], [0], [0], [1], [0, 0, 1, 1], [], []>} : vector<64x32xf32>, vector<32x64xf32>, vector<64x64xf32> -> vector<64x64xf32>
    %c0_20 = arith.constant 0 : index
    %c0_21 = arith.constant 0 : index
    %35 = vector.load %arg9[%c0_20, %c0_21] : memref<64x64xf32, #tpu.memory_space<vmem>>, vector<64x64xf32>
    tpu.vector_store %arg9[%c0_20, %c0_21], %34 {strides = array<i32>} : memref<64x64xf32, #tpu.memory_space<vmem>>, vector<64x64xf32>,
    %c0_22 = arith.constant 0 : index
    %c0_23 = arith.constant 0 : index
    %36 = vector.load %arg7[%c0_22, %c0_23] : memref<32x64xf32, #tpu.memory_space<vmem>>, vector<32x64xf32>
    %cst_24 = arith.constant dense<0.000000e+00> : vector<64x64xf32>
    %37 = tpu.matmul %32, %36, %cst_24 {dimension_numbers = #tpu.dot_dimension_numbers<[1], [0], [0], [1], [0, 0, 1, 1], [], []>} : vector<64x32xf32>, vector<32x64xf32>, vector<64x64xf32> -> vector<64x64xf32>
    %c0_25 = arith.constant 0 : index
    %c0_26 = arith.constant 0 : index
    %38 = vector.load %arg10[%c0_25, %c0_26] : memref<64x64xf32, #tpu.memory_space<vmem>>, vector<64x64xf32>
    tpu.vector_store %arg10[%c0_25, %c0_26], %37 {strides = array<i32>} : memref<64x64xf32, #tpu.memory_space<vmem>>, vector<64x64xf32>,
    return
  }
  func.func @transform_0(%arg0: i32) -> (i32, i32) {
    %c0_i32 = arith.constant 0 : i32
    %c0_i32_0 = arith.constant 0 : i32
    return %arg0, %c0_i32 : i32, i32
  }
  func.func @transform_1(%arg0: i32) -> (i32, i32) {
    %c0_i32 = arith.constant 0 : i32
    %c0_i32_0 = arith.constant 0 : i32
    %c0_i32_1 = arith.constant 0 : i32
    return %c0_i32, %c0_i32_0 : i32, i32
  }
  func.func @transform_2(%arg0: i32) -> (i32, i32) {
    %c0_i32 = arith.constant 0 : i32
    %c0_i32_0 = arith.constant 0 : i32
    %c0_i32_1 = arith.constant 0 : i32
    return %c0_i32, %c0_i32_0 : i32, i32
  }
  func.func @transform_3(%arg0: i32) -> (i32, i32) {
    %c0_i32 = arith.constant 0 : i32
    %c0_i32_0 = arith.constant 0 : i32
    %c0_i32_1 = arith.constant 0 : i32
    return %c0_i32, %c0_i32_0 : i32, i32
  }
  func.func @transform_4(%arg0: i32) -> (i32, i32) {
    %c0_i32 = arith.constant 0 : i32
    %c0_i32_0 = arith.constant 0 : i32
    %c0_i32_1 = arith.constant 0 : i32
    return %c0_i32, %c0_i32_0 : i32, i32
  }
  func.func @transform_5(%arg0: i32) -> (i32, i32) {
    %c0_i32 = arith.constant 0 : i32
    %c0_i32_0 = arith.constant 0 : i32
    %c0_i32_1 = arith.constant 0 : i32
    return %c0_i32, %c0_i32_0 : i32, i32
  }
  func.func @transform_6(%arg0: i32) -> (i32, i32) {
    %c0_i32 = arith.constant 0 : i32
    %c0_i32_0 = arith.constant 0 : i32
    %c0_i32_1 = arith.constant 0 : i32
    return %c0_i32, %c0_i32_0 : i32, i32
  }
  func.func @transform_7(%arg0: i32) -> (i32, i32) {
    %c0_i32 = arith.constant 0 : i32
    %c0_i32_0 = arith.constant 0 : i32
    return %arg0, %c0_i32 : i32, i32
  }
  func.func @transform_8(%arg0: i32) -> (i32, i32) {
    %c0_i32 = arith.constant 0 : i32
    %c0_i32_0 = arith.constant 0 : i32
    return %arg0, %c0_i32 : i32, i32
  }
  func.func @transform_9(%arg0: i32) -> (i32, i32) {
    %c0_i32 = arith.constant 0 : i32
    %c0_i32_0 = arith.constant 0 : i32
    return %arg0, %c0_i32 : i32, i32
  }
}

module attributes {stable_mosaic.version = 11 : i64} {
  func.func @_ss2d_core_kernel(%arg0: i32, %arg1: memref<1x8x256xf32, #tpu.memory_space<vmem>>, %arg2: memref<3x256xf32, #tpu.memory_space<vmem>>, %arg3: memref<1x256xf32, #tpu.memory_space<vmem>>, %arg4: memref<256x256xf32, #tpu.memory_space<vmem>>, %arg5: memref<1x256xf32, #tpu.memory_space<vmem>>, %arg6: memref<4x256x256xf32, #tpu.memory_space<vmem>>, %arg7: memref<4x256x256xf32, #tpu.memory_space<vmem>>, %arg8: memref<4x1x256xf32, #tpu.memory_space<vmem>>, %arg9: memref<1x256xf32, #tpu.memory_space<vmem>>, %arg10: memref<1x8x256xf32, #tpu.memory_space<vmem>>, %arg11: memref<10x256xf32, #tpu.memory_space<vmem>>, %arg12: memref<8x256xf32, #tpu.memory_space<vmem>>, %arg13: memref<8x256xf32, #tpu.memory_space<vmem>>, %arg14: memref<4x8x256xf32, #tpu.memory_space<vmem>>, %arg15: memref<4x8x256xf32, #tpu.memory_space<vmem>>) attributes {dimension_semantics = [#tpu.dimension_semantics<parallel>], iteration_bounds = array<i64: 2>, scalar_prefetch = 0 : i64, scratch_operands = 5 : i64, tpu.core_type = #tpu.core_type<tc>, window_params = [{transform_indices = @transform_0, window_bounds = array<i64: 1, 8, 256>}, {pipeline_mode = #tpu.pipeline_mode<synchronous>, transform_indices = @transform_1, window_bounds = array<i64: 3, 256>}, {pipeline_mode = #tpu.pipeline_mode<synchronous>, transform_indices = @transform_2, window_bounds = array<i64: 1, 256>}, {pipeline_mode = #tpu.pipeline_mode<synchronous>, transform_indices = @transform_3, window_bounds = array<i64: 256, 256>}, {pipeline_mode = #tpu.pipeline_mode<synchronous>, transform_indices = @transform_4, window_bounds = array<i64: 1, 256>}, {pipeline_mode = #tpu.pipeline_mode<synchronous>, transform_indices = @transform_5, window_bounds = array<i64: 4, 256, 256>}, {pipeline_mode = #tpu.pipeline_mode<synchronous>, transform_indices = @transform_6, window_bounds = array<i64: 4, 256, 256>}, {pipeline_mode = #tpu.pipeline_mode<synchronous>, transform_indices = @transform_7, window_bounds = array<i64: 4, 1, 256>}, {pipeline_mode = #tpu.pipeline_mode<synchronous>, transform_indices = @transform_8, window_bounds = array<i64: 1, 256>}, {transform_indices = @transform_9, window_bounds = array<i64: 1, 8, 256>}]} {
    %c0 = arith.constant 0 : index
    %c0_0 = arith.constant 0 : index
    %c0_1 = arith.constant 0 : index
    %0 = vector.load %arg1[%c0, %c0_0, %c0_1] : memref<1x8x256xf32, #tpu.memory_space<vmem>>, vector<1x8x256xf32>
    %1 = vector.shape_cast %0 : vector<1x8x256xf32> to vector<8x256xf32>
    %cst = arith.constant 0.000000e+00 : f32
    %2 = vector.broadcast %cst : f32 to vector<1x256xf32>
    %c0_2 = arith.constant 0 : index
    %c0_3 = arith.constant 0 : index
    %3 = vector.load %arg11[%c0_2, %c0_3] : memref<10x256xf32, #tpu.memory_space<vmem>>, vector<1x256xf32>
    tpu.vector_store %arg11[%c0_2, %c0_3], %2 {strides = array<i32>} : memref<10x256xf32, #tpu.memory_space<vmem>>, vector<1x256xf32>,
    %c9 = arith.constant 9 : index
    %c0_4 = arith.constant 0 : index
    %4 = vector.load %arg11[%c9, %c0_4] : memref<10x256xf32, #tpu.memory_space<vmem>>, vector<1x256xf32>
    tpu.vector_store %arg11[%c9, %c0_4], %2 {strides = array<i32>} : memref<10x256xf32, #tpu.memory_space<vmem>>, vector<1x256xf32>,
    %c1 = arith.constant 1 : index
    %c0_5 = arith.constant 0 : index
    %5 = vector.load %arg11[%c1, %c0_5] : memref<10x256xf32, #tpu.memory_space<vmem>>, vector<8x256xf32>
    tpu.vector_store %arg11[%c1, %c0_5], %1 {strides = array<i32>} : memref<10x256xf32, #tpu.memory_space<vmem>>, vector<8x256xf32>,
    %c0_6 = arith.constant 0 : index
    %c0_7 = arith.constant 0 : index
    %6 = vector.load %arg2[%c0_6, %c0_7] : memref<3x256xf32, #tpu.memory_space<vmem>>, vector<3x256xf32>
    %c0_8 = arith.constant 0 : index
    %c0_9 = arith.constant 0 : index
    %7 = vector.load %arg11[%c0_8, %c0_9] : memref<10x256xf32, #tpu.memory_space<vmem>>, vector<8x256xf32>
    %8 = vector.extract_strided_slice %6 {offsets = [0, 0], sizes = [1, 256], strides = [1, 1]} : vector<3x256xf32> to vector<1x256xf32>
    %9 = vector.broadcast %8 : vector<1x256xf32> to vector<8x256xf32>
    %10 = arith.mulf %7, %9 : vector<8x256xf32>
    %c1_10 = arith.constant 1 : index
    %c0_11 = arith.constant 0 : index
    %11 = vector.load %arg11[%c1_10, %c0_11] : memref<10x256xf32, #tpu.memory_space<vmem>>, vector<8x256xf32>
    %12 = vector.extract_strided_slice %6 {offsets = [1, 0], sizes = [1, 256], strides = [1, 1]} : vector<3x256xf32> to vector<1x256xf32>
    %13 = vector.broadcast %12 : vector<1x256xf32> to vector<8x256xf32>
    %14 = arith.mulf %11, %13 : vector<8x256xf32>
    %15 = arith.addf %10, %14 : vector<8x256xf32>
    %c2 = arith.constant 2 : index
    %c0_12 = arith.constant 0 : index
    %16 = vector.load %arg11[%c2, %c0_12] : memref<10x256xf32, #tpu.memory_space<vmem>>, vector<8x256xf32>
    %17 = vector.extract_strided_slice %6 {offsets = [2, 0], sizes = [1, 256], strides = [1, 1]} : vector<3x256xf32> to vector<1x256xf32>
    %18 = vector.broadcast %17 : vector<1x256xf32> to vector<8x256xf32>
    %19 = arith.mulf %16, %18 : vector<8x256xf32>
    %20 = arith.addf %15, %19 : vector<8x256xf32>
    %c0_13 = arith.constant 0 : index
    %c0_14 = arith.constant 0 : index
    %21 = vector.load %arg3[%c0_13, %c0_14] : memref<1x256xf32, #tpu.memory_space<vmem>>, vector<1x256xf32>
    %22 = vector.broadcast %21 : vector<1x256xf32> to vector<8x256xf32>
    %23 = arith.addf %20, %22 : vector<8x256xf32>
    %24 = arith.negf %23 : vector<8x256xf32>
    %25 = math.exp %24 : vector<8x256xf32>
    %cst_15 = arith.constant 1.000000e+00 : f32
    %26 = vector.broadcast %cst_15 : f32 to vector<8x256xf32>
    %27 = arith.addf %26, %25 : vector<8x256xf32>
    %28 = arith.divf %26, %27 : vector<8x256xf32>
    %29 = arith.mulf %23, %28 : vector<8x256xf32>
    %c0_16 = arith.constant 0 : index
    %c0_17 = arith.constant 0 : index
    %30 = vector.load %arg12[%c0_16, %c0_17] : memref<8x256xf32, #tpu.memory_space<vmem>>, vector<8x256xf32>
    tpu.vector_store %arg12[%c0_16, %c0_17], %29 {strides = array<i32>} : memref<8x256xf32, #tpu.memory_space<vmem>>, vector<8x256xf32>,
    %c0_18 = arith.constant 0 : index
    %c0_19 = arith.constant 0 : index
    %31 = vector.load %arg4[%c0_18, %c0_19] : memref<256x256xf32, #tpu.memory_space<vmem>>, vector<256x256xf32>
    %cst_20 = arith.constant dense<0.000000e+00> : vector<8x256xf32>
    %32 = tpu.matmul %29, %31, %cst_20 {dimension_numbers = #tpu.dot_dimension_numbers<[1], [0], [0], [1], [0, 0, 1, 1], [], []>} : vector<8x256xf32>, vector<256x256xf32>, vector<8x256xf32> -> vector<8x256xf32>
    %c0_21 = arith.constant 0 : index
    %c0_22 = arith.constant 0 : index
    %33 = vector.load %arg5[%c0_21, %c0_22] : memref<1x256xf32, #tpu.memory_space<vmem>>, vector<1x256xf32>
    %34 = vector.broadcast %33 : vector<1x256xf32> to vector<8x256xf32>
    %35 = arith.addf %32, %34 : vector<8x256xf32>
    %cst_23 = arith.constant 2.000000e+01 : f32
    %36 = vector.broadcast %cst_23 : f32 to vector<8x256xf32>
    %37 = arith.cmpf ogt, %35, %36 : vector<8x256xf32>
    %38 = math.exp %35 : vector<8x256xf32>
    %39 = math.log1p %38 : vector<8x256xf32>
    %40 = arith.select %37, %35, %39 : vector<8x256xi1>, vector<8x256xf32>
    %c0_24 = arith.constant 0 : index
    %c0_25 = arith.constant 0 : index
    %41 = vector.load %arg13[%c0_24, %c0_25] : memref<8x256xf32, #tpu.memory_space<vmem>>, vector<8x256xf32>
    tpu.vector_store %arg13[%c0_24, %c0_25], %40 {strides = array<i32>} : memref<8x256xf32, #tpu.memory_space<vmem>>, vector<8x256xf32>,
    %c0_26 = arith.constant 0 : index
    %c0_27 = arith.constant 0 : index
    %c0_28 = arith.constant 0 : index
    %42 = vector.load %arg6[%c0_26, %c0_27, %c0_28] : memref<4x256x256xf32, #tpu.memory_space<vmem>>, vector<1x256x256xf32>
    %43 = vector.shape_cast %42 : vector<1x256x256xf32> to vector<256x256xf32>
    %cst_29 = arith.constant dense<0.000000e+00> : vector<8x256xf32>
    %44 = tpu.matmul %29, %43, %cst_29 {dimension_numbers = #tpu.dot_dimension_numbers<[1], [0], [0], [1], [0, 0, 1, 1], [], []>} : vector<8x256xf32>, vector<256x256xf32>, vector<8x256xf32> -> vector<8x256xf32>
    %c0_30 = arith.constant 0 : index
    %c0_31 = arith.constant 0 : index
    %c0_32 = arith.constant 0 : index
    %45 = vector.load %arg14[%c0_30, %c0_31, %c0_32] : memref<4x8x256xf32, #tpu.memory_space<vmem>>, vector<1x8x256xf32>
    %46 = vector.shape_cast %45 : vector<1x8x256xf32> to vector<8x256xf32>
    %47 = vector.shape_cast %44 : vector<8x256xf32> to vector<1x8x256xf32>
    tpu.vector_store %arg14[%c0_30, %c0_31, %c0_32], %47 {strides = array<i32>} : memref<4x8x256xf32, #tpu.memory_space<vmem>>, vector<1x8x256xf32>,
    %c0_33 = arith.constant 0 : index
    %c0_34 = arith.constant 0 : index
    %c0_35 = arith.constant 0 : index
    %48 = vector.load %arg7[%c0_33, %c0_34, %c0_35] : memref<4x256x256xf32, #tpu.memory_space<vmem>>, vector<1x256x256xf32>
    %49 = vector.shape_cast %48 : vector<1x256x256xf32> to vector<256x256xf32>
    %cst_36 = arith.constant dense<0.000000e+00> : vector<8x256xf32>
    %50 = tpu.matmul %29, %49, %cst_36 {dimension_numbers = #tpu.dot_dimension_numbers<[1], [0], [0], [1], [0, 0, 1, 1], [], []>} : vector<8x256xf32>, vector<256x256xf32>, vector<8x256xf32> -> vector<8x256xf32>
    %c0_37 = arith.constant 0 : index
    %c0_38 = arith.constant 0 : index
    %c0_39 = arith.constant 0 : index
    %51 = vector.load %arg15[%c0_37, %c0_38, %c0_39] : memref<4x8x256xf32, #tpu.memory_space<vmem>>, vector<1x8x256xf32>
    %52 = vector.shape_cast %51 : vector<1x8x256xf32> to vector<8x256xf32>
    %53 = vector.shape_cast %50 : vector<8x256xf32> to vector<1x8x256xf32>
    tpu.vector_store %arg15[%c0_37, %c0_38, %c0_39], %53 {strides = array<i32>} : memref<4x8x256xf32, #tpu.memory_space<vmem>>, vector<1x8x256xf32>,
    %c1_40 = arith.constant 1 : index
    %c0_41 = arith.constant 0 : index
    %c0_42 = arith.constant 0 : index
    %54 = vector.load %arg6[%c1_40, %c0_41, %c0_42] : memref<4x256x256xf32, #tpu.memory_space<vmem>>, vector<1x256x256xf32>
    %55 = vector.shape_cast %54 : vector<1x256x256xf32> to vector<256x256xf32>
    %cst_43 = arith.constant dense<0.000000e+00> : vector<8x256xf32>
    %56 = tpu.matmul %29, %55, %cst_43 {dimension_numbers = #tpu.dot_dimension_numbers<[1], [0], [0], [1], [0, 0, 1, 1], [], []>} : vector<8x256xf32>, vector<256x256xf32>, vector<8x256xf32> -> vector<8x256xf32>
    %c1_44 = arith.constant 1 : index
    %c0_45 = arith.constant 0 : index
    %c0_46 = arith.constant 0 : index
    %57 = vector.load %arg14[%c1_44, %c0_45, %c0_46] : memref<4x8x256xf32, #tpu.memory_space<vmem>>, vector<1x8x256xf32>
    %58 = vector.shape_cast %57 : vector<1x8x256xf32> to vector<8x256xf32>
    %59 = vector.shape_cast %56 : vector<8x256xf32> to vector<1x8x256xf32>
    tpu.vector_store %arg14[%c1_44, %c0_45, %c0_46], %59 {strides = array<i32>} : memref<4x8x256xf32, #tpu.memory_space<vmem>>, vector<1x8x256xf32>,
    %c1_47 = arith.constant 1 : index
    %c0_48 = arith.constant 0 : index
    %c0_49 = arith.constant 0 : index
    %60 = vector.load %arg7[%c1_47, %c0_48, %c0_49] : memref<4x256x256xf32, #tpu.memory_space<vmem>>, vector<1x256x256xf32>
    %61 = vector.shape_cast %60 : vector<1x256x256xf32> to vector<256x256xf32>
    %cst_50 = arith.constant dense<0.000000e+00> : vector<8x256xf32>
    %62 = tpu.matmul %29, %61, %cst_50 {dimension_numbers = #tpu.dot_dimension_numbers<[1], [0], [0], [1], [0, 0, 1, 1], [], []>} : vector<8x256xf32>, vector<256x256xf32>, vector<8x256xf32> -> vector<8x256xf32>
    %c1_51 = arith.constant 1 : index
    %c0_52 = arith.constant 0 : index
    %c0_53 = arith.constant 0 : index
    %63 = vector.load %arg15[%c1_51, %c0_52, %c0_53] : memref<4x8x256xf32, #tpu.memory_space<vmem>>, vector<1x8x256xf32>
    %64 = vector.shape_cast %63 : vector<1x8x256xf32> to vector<8x256xf32>
    %65 = vector.shape_cast %62 : vector<8x256xf32> to vector<1x8x256xf32>
    tpu.vector_store %arg15[%c1_51, %c0_52, %c0_53], %65 {strides = array<i32>} : memref<4x8x256xf32, #tpu.memory_space<vmem>>, vector<1x8x256xf32>,
    %c2_54 = arith.constant 2 : index
    %c0_55 = arith.constant 0 : index
    %c0_56 = arith.constant 0 : index
    %66 = vector.load %arg6[%c2_54, %c0_55, %c0_56] : memref<4x256x256xf32, #tpu.memory_space<vmem>>, vector<1x256x256xf32>
    %67 = vector.shape_cast %66 : vector<1x256x256xf32> to vector<256x256xf32>
    %cst_57 = arith.constant dense<0.000000e+00> : vector<8x256xf32>
    %68 = tpu.matmul %29, %67, %cst_57 {dimension_numbers = #tpu.dot_dimension_numbers<[1], [0], [0], [1], [0, 0, 1, 1], [], []>} : vector<8x256xf32>, vector<256x256xf32>, vector<8x256xf32> -> vector<8x256xf32>
    %c2_58 = arith.constant 2 : index
    %c0_59 = arith.constant 0 : index
    %c0_60 = arith.constant 0 : index
    %69 = vector.load %arg14[%c2_58, %c0_59, %c0_60] : memref<4x8x256xf32, #tpu.memory_space<vmem>>, vector<1x8x256xf32>
    %70 = vector.shape_cast %69 : vector<1x8x256xf32> to vector<8x256xf32>
    %71 = vector.shape_cast %68 : vector<8x256xf32> to vector<1x8x256xf32>
    tpu.vector_store %arg14[%c2_58, %c0_59, %c0_60], %71 {strides = array<i32>} : memref<4x8x256xf32, #tpu.memory_space<vmem>>, vector<1x8x256xf32>,
    %c2_61 = arith.constant 2 : index
    %c0_62 = arith.constant 0 : index
    %c0_63 = arith.constant 0 : index
    %72 = vector.load %arg7[%c2_61, %c0_62, %c0_63] : memref<4x256x256xf32, #tpu.memory_space<vmem>>, vector<1x256x256xf32>
    %73 = vector.shape_cast %72 : vector<1x256x256xf32> to vector<256x256xf32>
    %cst_64 = arith.constant dense<0.000000e+00> : vector<8x256xf32>
    %74 = tpu.matmul %29, %73, %cst_64 {dimension_numbers = #tpu.dot_dimension_numbers<[1], [0], [0], [1], [0, 0, 1, 1], [], []>} : vector<8x256xf32>, vector<256x256xf32>, vector<8x256xf32> -> vector<8x256xf32>
    %c2_65 = arith.constant 2 : index
    %c0_66 = arith.constant 0 : index
    %c0_67 = arith.constant 0 : index
    %75 = vector.load %arg15[%c2_65, %c0_66, %c0_67] : memref<4x8x256xf32, #tpu.memory_space<vmem>>, vector<1x8x256xf32>
    %76 = vector.shape_cast %75 : vector<1x8x256xf32> to vector<8x256xf32>
    %77 = vector.shape_cast %74 : vector<8x256xf32> to vector<1x8x256xf32>
    tpu.vector_store %arg15[%c2_65, %c0_66, %c0_67], %77 {strides = array<i32>} : memref<4x8x256xf32, #tpu.memory_space<vmem>>, vector<1x8x256xf32>,
    %c3 = arith.constant 3 : index
    %c0_68 = arith.constant 0 : index
    %c0_69 = arith.constant 0 : index
    %78 = vector.load %arg6[%c3, %c0_68, %c0_69] : memref<4x256x256xf32, #tpu.memory_space<vmem>>, vector<1x256x256xf32>
    %79 = vector.shape_cast %78 : vector<1x256x256xf32> to vector<256x256xf32>
    %cst_70 = arith.constant dense<0.000000e+00> : vector<8x256xf32>
    %80 = tpu.matmul %29, %79, %cst_70 {dimension_numbers = #tpu.dot_dimension_numbers<[1], [0], [0], [1], [0, 0, 1, 1], [], []>} : vector<8x256xf32>, vector<256x256xf32>, vector<8x256xf32> -> vector<8x256xf32>
    %c3_71 = arith.constant 3 : index
    %c0_72 = arith.constant 0 : index
    %c0_73 = arith.constant 0 : index
    %81 = vector.load %arg14[%c3_71, %c0_72, %c0_73] : memref<4x8x256xf32, #tpu.memory_space<vmem>>, vector<1x8x256xf32>
    %82 = vector.shape_cast %81 : vector<1x8x256xf32> to vector<8x256xf32>
    %83 = vector.shape_cast %80 : vector<8x256xf32> to vector<1x8x256xf32>
    tpu.vector_store %arg14[%c3_71, %c0_72, %c0_73], %83 {strides = array<i32>} : memref<4x8x256xf32, #tpu.memory_space<vmem>>, vector<1x8x256xf32>,
    %c3_74 = arith.constant 3 : index
    %c0_75 = arith.constant 0 : index
    %c0_76 = arith.constant 0 : index
    %84 = vector.load %arg7[%c3_74, %c0_75, %c0_76] : memref<4x256x256xf32, #tpu.memory_space<vmem>>, vector<1x256x256xf32>
    %85 = vector.shape_cast %84 : vector<1x256x256xf32> to vector<256x256xf32>
    %cst_77 = arith.constant dense<0.000000e+00> : vector<8x256xf32>
    %86 = tpu.matmul %29, %85, %cst_77 {dimension_numbers = #tpu.dot_dimension_numbers<[1], [0], [0], [1], [0, 0, 1, 1], [], []>} : vector<8x256xf32>, vector<256x256xf32>, vector<8x256xf32> -> vector<8x256xf32>
    %c3_78 = arith.constant 3 : index
    %c0_79 = arith.constant 0 : index
    %c0_80 = arith.constant 0 : index
    %87 = vector.load %arg15[%c3_78, %c0_79, %c0_80] : memref<4x8x256xf32, #tpu.memory_space<vmem>>, vector<1x8x256xf32>
    %88 = vector.shape_cast %87 : vector<1x8x256xf32> to vector<8x256xf32>
    %89 = vector.shape_cast %86 : vector<8x256xf32> to vector<1x8x256xf32>
    tpu.vector_store %arg15[%c3_78, %c0_79, %c0_80], %89 {strides = array<i32>} : memref<4x8x256xf32, #tpu.memory_space<vmem>>, vector<1x8x256xf32>,
    %c0_81 = arith.constant 0 : index
    %c0_82 = arith.constant 0 : index
    %c0_83 = arith.constant 0 : index
    %90 = vector.load %arg8[%c0_81, %c0_82, %c0_83] : memref<4x1x256xf32, #tpu.memory_space<vmem>>, vector<4x1x256xf32>
    %c0_84 = arith.constant 0 : index
    %c0_85 = arith.constant 0 : index
    %91 = vector.load %arg9[%c0_84, %c0_85] : memref<1x256xf32, #tpu.memory_space<vmem>>, vector<1x256xf32>
    %cst_86 = arith.constant 0.000000e+00 : f32
    %92 = vector.broadcast %cst_86 : f32 to vector<4x1x256xf32>
    %c0_i32 = arith.constant 0 : i32
    %93 = arith.index_cast %c0_i32 : i32 to index
    %c0_87 = arith.constant 0 : index
    %94 = vector.load %arg12[%93, %c0_87] : memref<8x256xf32, #tpu.memory_space<vmem>>, vector<1x256xf32>
    %95 = arith.index_cast %c0_i32 : i32 to index
    %c0_88 = arith.constant 0 : index
    %96 = vector.load %arg13[%95, %c0_88] : memref<8x256xf32, #tpu.memory_space<vmem>>, vector<1x256xf32>
    %c0_89 = arith.constant 0 : index
    %97 = arith.index_cast %c0_i32 : i32 to index
    %c0_90 = arith.constant 0 : index
    %98 = vector.load %arg14[%c0_89, %97, %c0_90] : memref<4x8x256xf32, #tpu.memory_space<vmem>>, vector<4x1x256xf32>
    %c0_91 = arith.constant 0 : index
    %99 = arith.index_cast %c0_i32 : i32 to index
    %c0_92 = arith.constant 0 : index
    %100 = vector.load %arg15[%c0_91, %99, %c0_92] : memref<4x8x256xf32, #tpu.memory_space<vmem>>, vector<4x1x256xf32>
    %101 = vector.shape_cast %96 : vector<1x256xf32> to vector<1x1x256xf32>
    %102 = vector.broadcast %101 : vector<1x1x256xf32> to vector<4x1x256xf32>
    %103 = arith.mulf %102, %90 : vector<4x1x256xf32>
    %104 = math.exp %103 : vector<4x1x256xf32>
    %105 = arith.mulf %104, %92 : vector<4x1x256xf32>
    %106 = arith.mulf %96, %94 : vector<1x256xf32>
    %107 = vector.shape_cast %106 : vector<1x256xf32> to vector<1x1x256xf32>
    %108 = vector.broadcast %107 : vector<1x1x256xf32> to vector<4x1x256xf32>
    %109 = arith.mulf %108, %98 : vector<4x1x256xf32>
    %110 = arith.addf %105, %109 : vector<4x1x256xf32>
    %111 = arith.mulf %110, %100 : vector<4x1x256xf32>
    %cst_93 = arith.constant dense<0.000000e+00> : vector<1x256xf32>
    %112 = vector.multi_reduction <add>, %111, %cst_93 [0] : vector<4x1x256xf32> to vector<1x256xf32>
    %113 = arith.mulf %91, %94 : vector<1x256xf32>
    %114 = arith.addf %112, %113 : vector<1x256xf32>
    %c0_94 = arith.constant 0 : index
    %115 = arith.index_cast %c0_i32 : i32 to index
    %c0_95 = arith.constant 0 : index
    %116 = vector.load %arg10[%c0_94, %115, %c0_95] : memref<1x8x256xf32, #tpu.memory_space<vmem>>, vector<1x1x256xf32>
    %117 = vector.shape_cast %116 : vector<1x1x256xf32> to vector<1x256xf32>
    %118 = vector.shape_cast %114 : vector<1x256xf32> to vector<1x1x256xf32>
    tpu.vector_store %arg10[%c0_94, %115, %c0_95], %118 {strides = array<i32>} : memref<1x8x256xf32, #tpu.memory_space<vmem>>, vector<1x1x256xf32>,
    %c1_i32 = arith.constant 1 : i32
    %119 = arith.index_cast %c1_i32 : i32 to index
    %c0_96 = arith.constant 0 : index
    %120 = vector.load %arg12[%119, %c0_96] : memref<8x256xf32, #tpu.memory_space<vmem>>, vector<1x256xf32>
    %121 = arith.index_cast %c1_i32 : i32 to index
    %c0_97 = arith.constant 0 : index
    %122 = vector.load %arg13[%121, %c0_97] : memref<8x256xf32, #tpu.memory_space<vmem>>, vector<1x256xf32>
    %c0_98 = arith.constant 0 : index
    %123 = arith.index_cast %c1_i32 : i32 to index
    %c0_99 = arith.constant 0 : index
    %124 = vector.load %arg14[%c0_98, %123, %c0_99] : memref<4x8x256xf32, #tpu.memory_space<vmem>>, vector<4x1x256xf32>
    %c0_100 = arith.constant 0 : index
    %125 = arith.index_cast %c1_i32 : i32 to index
    %c0_101 = arith.constant 0 : index
    %126 = vector.load %arg15[%c0_100, %125, %c0_101] : memref<4x8x256xf32, #tpu.memory_space<vmem>>, vector<4x1x256xf32>
    %127 = vector.shape_cast %122 : vector<1x256xf32> to vector<1x1x256xf32>
    %128 = vector.broadcast %127 : vector<1x1x256xf32> to vector<4x1x256xf32>
    %129 = arith.mulf %128, %90 : vector<4x1x256xf32>
    %130 = math.exp %129 : vector<4x1x256xf32>
    %131 = arith.mulf %130, %110 : vector<4x1x256xf32>
    %132 = arith.mulf %122, %120 : vector<1x256xf32>
    %133 = vector.shape_cast %132 : vector<1x256xf32> to vector<1x1x256xf32>
    %134 = vector.broadcast %133 : vector<1x1x256xf32> to vector<4x1x256xf32>
    %135 = arith.mulf %134, %124 : vector<4x1x256xf32>
    %136 = arith.addf %131, %135 : vector<4x1x256xf32>
    %137 = arith.mulf %136, %126 : vector<4x1x256xf32>
    %cst_102 = arith.constant dense<0.000000e+00> : vector<1x256xf32>
    %138 = vector.multi_reduction <add>, %137, %cst_102 [0] : vector<4x1x256xf32> to vector<1x256xf32>
    %139 = arith.mulf %91, %120 : vector<1x256xf32>
    %140 = arith.addf %138, %139 : vector<1x256xf32>
    %c0_103 = arith.constant 0 : index
    %141 = arith.index_cast %c1_i32 : i32 to index
    %c0_104 = arith.constant 0 : index
    %142 = vector.load %arg10[%c0_103, %141, %c0_104] : memref<1x8x256xf32, #tpu.memory_space<vmem>>, vector<1x1x256xf32>
    %143 = vector.shape_cast %142 : vector<1x1x256xf32> to vector<1x256xf32>
    %144 = vector.shape_cast %140 : vector<1x256xf32> to vector<1x1x256xf32>
    tpu.vector_store %arg10[%c0_103, %141, %c0_104], %144 {strides = array<i32>} : memref<1x8x256xf32, #tpu.memory_space<vmem>>, vector<1x1x256xf32>,
    %c2_i32 = arith.constant 2 : i32
    %145 = arith.index_cast %c2_i32 : i32 to index
    %c0_105 = arith.constant 0 : index
    %146 = vector.load %arg12[%145, %c0_105] : memref<8x256xf32, #tpu.memory_space<vmem>>, vector<1x256xf32>
    %147 = arith.index_cast %c2_i32 : i32 to index
    %c0_106 = arith.constant 0 : index
    %148 = vector.load %arg13[%147, %c0_106] : memref<8x256xf32, #tpu.memory_space<vmem>>, vector<1x256xf32>
    %c0_107 = arith.constant 0 : index
    %149 = arith.index_cast %c2_i32 : i32 to index
    %c0_108 = arith.constant 0 : index
    %150 = vector.load %arg14[%c0_107, %149, %c0_108] : memref<4x8x256xf32, #tpu.memory_space<vmem>>, vector<4x1x256xf32>
    %c0_109 = arith.constant 0 : index
    %151 = arith.index_cast %c2_i32 : i32 to index
    %c0_110 = arith.constant 0 : index
    %152 = vector.load %arg15[%c0_109, %151, %c0_110] : memref<4x8x256xf32, #tpu.memory_space<vmem>>, vector<4x1x256xf32>
    %153 = vector.shape_cast %148 : vector<1x256xf32> to vector<1x1x256xf32>
    %154 = vector.broadcast %153 : vector<1x1x256xf32> to vector<4x1x256xf32>
    %155 = arith.mulf %154, %90 : vector<4x1x256xf32>
    %156 = math.exp %155 : vector<4x1x256xf32>
    %157 = arith.mulf %156, %136 : vector<4x1x256xf32>
    %158 = arith.mulf %148, %146 : vector<1x256xf32>
    %159 = vector.shape_cast %158 : vector<1x256xf32> to vector<1x1x256xf32>
    %160 = vector.broadcast %159 : vector<1x1x256xf32> to vector<4x1x256xf32>
    %161 = arith.mulf %160, %150 : vector<4x1x256xf32>
    %162 = arith.addf %157, %161 : vector<4x1x256xf32>
    %163 = arith.mulf %162, %152 : vector<4x1x256xf32>
    %cst_111 = arith.constant dense<0.000000e+00> : vector<1x256xf32>
    %164 = vector.multi_reduction <add>, %163, %cst_111 [0] : vector<4x1x256xf32> to vector<1x256xf32>
    %165 = arith.mulf %91, %146 : vector<1x256xf32>
    %166 = arith.addf %164, %165 : vector<1x256xf32>
    %c0_112 = arith.constant 0 : index
    %167 = arith.index_cast %c2_i32 : i32 to index
    %c0_113 = arith.constant 0 : index
    %168 = vector.load %arg10[%c0_112, %167, %c0_113] : memref<1x8x256xf32, #tpu.memory_space<vmem>>, vector<1x1x256xf32>
    %169 = vector.shape_cast %168 : vector<1x1x256xf32> to vector<1x256xf32>
    %170 = vector.shape_cast %166 : vector<1x256xf32> to vector<1x1x256xf32>
    tpu.vector_store %arg10[%c0_112, %167, %c0_113], %170 {strides = array<i32>} : memref<1x8x256xf32, #tpu.memory_space<vmem>>, vector<1x1x256xf32>,
    %c3_i32 = arith.constant 3 : i32
    %171 = arith.index_cast %c3_i32 : i32 to index
    %c0_114 = arith.constant 0 : index
    %172 = vector.load %arg12[%171, %c0_114] : memref<8x256xf32, #tpu.memory_space<vmem>>, vector<1x256xf32>
    %173 = arith.index_cast %c3_i32 : i32 to index
    %c0_115 = arith.constant 0 : index
    %174 = vector.load %arg13[%173, %c0_115] : memref<8x256xf32, #tpu.memory_space<vmem>>, vector<1x256xf32>
    %c0_116 = arith.constant 0 : index
    %175 = arith.index_cast %c3_i32 : i32 to index
    %c0_117 = arith.constant 0 : index
    %176 = vector.load %arg14[%c0_116, %175, %c0_117] : memref<4x8x256xf32, #tpu.memory_space<vmem>>, vector<4x1x256xf32>
    %c0_118 = arith.constant 0 : index
    %177 = arith.index_cast %c3_i32 : i32 to index
    %c0_119 = arith.constant 0 : index
    %178 = vector.load %arg15[%c0_118, %177, %c0_119] : memref<4x8x256xf32, #tpu.memory_space<vmem>>, vector<4x1x256xf32>
    %179 = vector.shape_cast %174 : vector<1x256xf32> to vector<1x1x256xf32>
    %180 = vector.broadcast %179 : vector<1x1x256xf32> to vector<4x1x256xf32>
    %181 = arith.mulf %180, %90 : vector<4x1x256xf32>
    %182 = math.exp %181 : vector<4x1x256xf32>
    %183 = arith.mulf %182, %162 : vector<4x1x256xf32>
    %184 = arith.mulf %174, %172 : vector<1x256xf32>
    %185 = vector.shape_cast %184 : vector<1x256xf32> to vector<1x1x256xf32>
    %186 = vector.broadcast %185 : vector<1x1x256xf32> to vector<4x1x256xf32>
    %187 = arith.mulf %186, %176 : vector<4x1x256xf32>
    %188 = arith.addf %183, %187 : vector<4x1x256xf32>
    %189 = arith.mulf %188, %178 : vector<4x1x256xf32>
    %cst_120 = arith.constant dense<0.000000e+00> : vector<1x256xf32>
    %190 = vector.multi_reduction <add>, %189, %cst_120 [0] : vector<4x1x256xf32> to vector<1x256xf32>
    %191 = arith.mulf %91, %172 : vector<1x256xf32>
    %192 = arith.addf %190, %191 : vector<1x256xf32>
    %c0_121 = arith.constant 0 : index
    %193 = arith.index_cast %c3_i32 : i32 to index
    %c0_122 = arith.constant 0 : index
    %194 = vector.load %arg10[%c0_121, %193, %c0_122] : memref<1x8x256xf32, #tpu.memory_space<vmem>>, vector<1x1x256xf32>
    %195 = vector.shape_cast %194 : vector<1x1x256xf32> to vector<1x256xf32>
    %196 = vector.shape_cast %192 : vector<1x256xf32> to vector<1x1x256xf32>
    tpu.vector_store %arg10[%c0_121, %193, %c0_122], %196 {strides = array<i32>} : memref<1x8x256xf32, #tpu.memory_space<vmem>>, vector<1x1x256xf32>,
    %c4_i32 = arith.constant 4 : i32
    %197 = arith.index_cast %c4_i32 : i32 to index
    %c0_123 = arith.constant 0 : index
    %198 = vector.load %arg12[%197, %c0_123] : memref<8x256xf32, #tpu.memory_space<vmem>>, vector<1x256xf32>
    %199 = arith.index_cast %c4_i32 : i32 to index
    %c0_124 = arith.constant 0 : index
    %200 = vector.load %arg13[%199, %c0_124] : memref<8x256xf32, #tpu.memory_space<vmem>>, vector<1x256xf32>
    %c0_125 = arith.constant 0 : index
    %201 = arith.index_cast %c4_i32 : i32 to index
    %c0_126 = arith.constant 0 : index
    %202 = vector.load %arg14[%c0_125, %201, %c0_126] : memref<4x8x256xf32, #tpu.memory_space<vmem>>, vector<4x1x256xf32>
    %c0_127 = arith.constant 0 : index
    %203 = arith.index_cast %c4_i32 : i32 to index
    %c0_128 = arith.constant 0 : index
    %204 = vector.load %arg15[%c0_127, %203, %c0_128] : memref<4x8x256xf32, #tpu.memory_space<vmem>>, vector<4x1x256xf32>
    %205 = vector.shape_cast %200 : vector<1x256xf32> to vector<1x1x256xf32>
    %206 = vector.broadcast %205 : vector<1x1x256xf32> to vector<4x1x256xf32>
    %207 = arith.mulf %206, %90 : vector<4x1x256xf32>
    %208 = math.exp %207 : vector<4x1x256xf32>
    %209 = arith.mulf %208, %188 : vector<4x1x256xf32>
    %210 = arith.mulf %200, %198 : vector<1x256xf32>
    %211 = vector.shape_cast %210 : vector<1x256xf32> to vector<1x1x256xf32>
    %212 = vector.broadcast %211 : vector<1x1x256xf32> to vector<4x1x256xf32>
    %213 = arith.mulf %212, %202 : vector<4x1x256xf32>
    %214 = arith.addf %209, %213 : vector<4x1x256xf32>
    %215 = arith.mulf %214, %204 : vector<4x1x256xf32>
    %cst_129 = arith.constant dense<0.000000e+00> : vector<1x256xf32>
    %216 = vector.multi_reduction <add>, %215, %cst_129 [0] : vector<4x1x256xf32> to vector<1x256xf32>
    %217 = arith.mulf %91, %198 : vector<1x256xf32>
    %218 = arith.addf %216, %217 : vector<1x256xf32>
    %c0_130 = arith.constant 0 : index
    %219 = arith.index_cast %c4_i32 : i32 to index
    %c0_131 = arith.constant 0 : index
    %220 = vector.load %arg10[%c0_130, %219, %c0_131] : memref<1x8x256xf32, #tpu.memory_space<vmem>>, vector<1x1x256xf32>
    %221 = vector.shape_cast %220 : vector<1x1x256xf32> to vector<1x256xf32>
    %222 = vector.shape_cast %218 : vector<1x256xf32> to vector<1x1x256xf32>
    tpu.vector_store %arg10[%c0_130, %219, %c0_131], %222 {strides = array<i32>} : memref<1x8x256xf32, #tpu.memory_space<vmem>>, vector<1x1x256xf32>,
    %c5_i32 = arith.constant 5 : i32
    %223 = arith.index_cast %c5_i32 : i32 to index
    %c0_132 = arith.constant 0 : index
    %224 = vector.load %arg12[%223, %c0_132] : memref<8x256xf32, #tpu.memory_space<vmem>>, vector<1x256xf32>
    %225 = arith.index_cast %c5_i32 : i32 to index
    %c0_133 = arith.constant 0 : index
    %226 = vector.load %arg13[%225, %c0_133] : memref<8x256xf32, #tpu.memory_space<vmem>>, vector<1x256xf32>
    %c0_134 = arith.constant 0 : index
    %227 = arith.index_cast %c5_i32 : i32 to index
    %c0_135 = arith.constant 0 : index
    %228 = vector.load %arg14[%c0_134, %227, %c0_135] : memref<4x8x256xf32, #tpu.memory_space<vmem>>, vector<4x1x256xf32>
    %c0_136 = arith.constant 0 : index
    %229 = arith.index_cast %c5_i32 : i32 to index
    %c0_137 = arith.constant 0 : index
    %230 = vector.load %arg15[%c0_136, %229, %c0_137] : memref<4x8x256xf32, #tpu.memory_space<vmem>>, vector<4x1x256xf32>
    %231 = vector.shape_cast %226 : vector<1x256xf32> to vector<1x1x256xf32>
    %232 = vector.broadcast %231 : vector<1x1x256xf32> to vector<4x1x256xf32>
    %233 = arith.mulf %232, %90 : vector<4x1x256xf32>
    %234 = math.exp %233 : vector<4x1x256xf32>
    %235 = arith.mulf %234, %214 : vector<4x1x256xf32>
    %236 = arith.mulf %226, %224 : vector<1x256xf32>
    %237 = vector.shape_cast %236 : vector<1x256xf32> to vector<1x1x256xf32>
    %238 = vector.broadcast %237 : vector<1x1x256xf32> to vector<4x1x256xf32>
    %239 = arith.mulf %238, %228 : vector<4x1x256xf32>
    %240 = arith.addf %235, %239 : vector<4x1x256xf32>
    %241 = arith.mulf %240, %230 : vector<4x1x256xf32>
    %cst_138 = arith.constant dense<0.000000e+00> : vector<1x256xf32>
    %242 = vector.multi_reduction <add>, %241, %cst_138 [0] : vector<4x1x256xf32> to vector<1x256xf32>
    %243 = arith.mulf %91, %224 : vector<1x256xf32>
    %244 = arith.addf %242, %243 : vector<1x256xf32>
    %c0_139 = arith.constant 0 : index
    %245 = arith.index_cast %c5_i32 : i32 to index
    %c0_140 = arith.constant 0 : index
    %246 = vector.load %arg10[%c0_139, %245, %c0_140] : memref<1x8x256xf32, #tpu.memory_space<vmem>>, vector<1x1x256xf32>
    %247 = vector.shape_cast %246 : vector<1x1x256xf32> to vector<1x256xf32>
    %248 = vector.shape_cast %244 : vector<1x256xf32> to vector<1x1x256xf32>
    tpu.vector_store %arg10[%c0_139, %245, %c0_140], %248 {strides = array<i32>} : memref<1x8x256xf32, #tpu.memory_space<vmem>>, vector<1x1x256xf32>,
    %c6_i32 = arith.constant 6 : i32
    %249 = arith.index_cast %c6_i32 : i32 to index
    %c0_141 = arith.constant 0 : index
    %250 = vector.load %arg12[%249, %c0_141] : memref<8x256xf32, #tpu.memory_space<vmem>>, vector<1x256xf32>
    %251 = arith.index_cast %c6_i32 : i32 to index
    %c0_142 = arith.constant 0 : index
    %252 = vector.load %arg13[%251, %c0_142] : memref<8x256xf32, #tpu.memory_space<vmem>>, vector<1x256xf32>
    %c0_143 = arith.constant 0 : index
    %253 = arith.index_cast %c6_i32 : i32 to index
    %c0_144 = arith.constant 0 : index
    %254 = vector.load %arg14[%c0_143, %253, %c0_144] : memref<4x8x256xf32, #tpu.memory_space<vmem>>, vector<4x1x256xf32>
    %c0_145 = arith.constant 0 : index
    %255 = arith.index_cast %c6_i32 : i32 to index
    %c0_146 = arith.constant 0 : index
    %256 = vector.load %arg15[%c0_145, %255, %c0_146] : memref<4x8x256xf32, #tpu.memory_space<vmem>>, vector<4x1x256xf32>
    %257 = vector.shape_cast %252 : vector<1x256xf32> to vector<1x1x256xf32>
    %258 = vector.broadcast %257 : vector<1x1x256xf32> to vector<4x1x256xf32>
    %259 = arith.mulf %258, %90 : vector<4x1x256xf32>
    %260 = math.exp %259 : vector<4x1x256xf32>
    %261 = arith.mulf %260, %240 : vector<4x1x256xf32>
    %262 = arith.mulf %252, %250 : vector<1x256xf32>
    %263 = vector.shape_cast %262 : vector<1x256xf32> to vector<1x1x256xf32>
    %264 = vector.broadcast %263 : vector<1x1x256xf32> to vector<4x1x256xf32>
    %265 = arith.mulf %264, %254 : vector<4x1x256xf32>
    %266 = arith.addf %261, %265 : vector<4x1x256xf32>
    %267 = arith.mulf %266, %256 : vector<4x1x256xf32>
    %cst_147 = arith.constant dense<0.000000e+00> : vector<1x256xf32>
    %268 = vector.multi_reduction <add>, %267, %cst_147 [0] : vector<4x1x256xf32> to vector<1x256xf32>
    %269 = arith.mulf %91, %250 : vector<1x256xf32>
    %270 = arith.addf %268, %269 : vector<1x256xf32>
    %c0_148 = arith.constant 0 : index
    %271 = arith.index_cast %c6_i32 : i32 to index
    %c0_149 = arith.constant 0 : index
    %272 = vector.load %arg10[%c0_148, %271, %c0_149] : memref<1x8x256xf32, #tpu.memory_space<vmem>>, vector<1x1x256xf32>
    %273 = vector.shape_cast %272 : vector<1x1x256xf32> to vector<1x256xf32>
    %274 = vector.shape_cast %270 : vector<1x256xf32> to vector<1x1x256xf32>
    tpu.vector_store %arg10[%c0_148, %271, %c0_149], %274 {strides = array<i32>} : memref<1x8x256xf32, #tpu.memory_space<vmem>>, vector<1x1x256xf32>,
    %c7_i32 = arith.constant 7 : i32
    %275 = arith.index_cast %c7_i32 : i32 to index
    %c0_150 = arith.constant 0 : index
    %276 = vector.load %arg12[%275, %c0_150] : memref<8x256xf32, #tpu.memory_space<vmem>>, vector<1x256xf32>
    %277 = arith.index_cast %c7_i32 : i32 to index
    %c0_151 = arith.constant 0 : index
    %278 = vector.load %arg13[%277, %c0_151] : memref<8x256xf32, #tpu.memory_space<vmem>>, vector<1x256xf32>
    %c0_152 = arith.constant 0 : index
    %279 = arith.index_cast %c7_i32 : i32 to index
    %c0_153 = arith.constant 0 : index
    %280 = vector.load %arg14[%c0_152, %279, %c0_153] : memref<4x8x256xf32, #tpu.memory_space<vmem>>, vector<4x1x256xf32>
    %c0_154 = arith.constant 0 : index
    %281 = arith.index_cast %c7_i32 : i32 to index
    %c0_155 = arith.constant 0 : index
    %282 = vector.load %arg15[%c0_154, %281, %c0_155] : memref<4x8x256xf32, #tpu.memory_space<vmem>>, vector<4x1x256xf32>
    %283 = vector.shape_cast %278 : vector<1x256xf32> to vector<1x1x256xf32>
    %284 = vector.broadcast %283 : vector<1x1x256xf32> to vector<4x1x256xf32>
    %285 = arith.mulf %284, %90 : vector<4x1x256xf32>
    %286 = math.exp %285 : vector<4x1x256xf32>
    %287 = arith.mulf %286, %266 : vector<4x1x256xf32>
    %288 = arith.mulf %278, %276 : vector<1x256xf32>
    %289 = vector.shape_cast %288 : vector<1x256xf32> to vector<1x1x256xf32>
    %290 = vector.broadcast %289 : vector<1x1x256xf32> to vector<4x1x256xf32>
    %291 = arith.mulf %290, %280 : vector<4x1x256xf32>
    %292 = arith.addf %287, %291 : vector<4x1x256xf32>
    %293 = arith.mulf %292, %282 : vector<4x1x256xf32>
    %cst_156 = arith.constant dense<0.000000e+00> : vector<1x256xf32>
    %294 = vector.multi_reduction <add>, %293, %cst_156 [0] : vector<4x1x256xf32> to vector<1x256xf32>
    %295 = arith.mulf %91, %276 : vector<1x256xf32>
    %296 = arith.addf %294, %295 : vector<1x256xf32>
    %c0_157 = arith.constant 0 : index
    %297 = arith.index_cast %c7_i32 : i32 to index
    %c0_158 = arith.constant 0 : index
    %298 = vector.load %arg10[%c0_157, %297, %c0_158] : memref<1x8x256xf32, #tpu.memory_space<vmem>>, vector<1x1x256xf32>
    %299 = vector.shape_cast %298 : vector<1x1x256xf32> to vector<1x256xf32>
    %300 = vector.shape_cast %296 : vector<1x256xf32> to vector<1x1x256xf32>
    tpu.vector_store %arg10[%c0_157, %297, %c0_158], %300 {strides = array<i32>} : memref<1x8x256xf32, #tpu.memory_space<vmem>>, vector<1x1x256xf32>,
    %c8_i32 = arith.constant 8 : i32
    return
  }
  func.func @transform_0(%arg0: i32) -> (i32, i32, i32) {
    %c0_i32 = arith.constant 0 : i32
    %c0_i32_0 = arith.constant 0 : i32
    %c0_i32_1 = arith.constant 0 : i32
    return %arg0, %c0_i32, %c0_i32_0 : i32, i32, i32
  }
  func.func @transform_1(%arg0: i32) -> (i32, i32) {
    %c0_i32 = arith.constant 0 : i32
    %c0_i32_0 = arith.constant 0 : i32
    %c0_i32_1 = arith.constant 0 : i32
    return %c0_i32, %c0_i32_0 : i32, i32
  }
  func.func @transform_2(%arg0: i32) -> (i32, i32) {
    %c0_i32 = arith.constant 0 : i32
    %c0_i32_0 = arith.constant 0 : i32
    %c0_i32_1 = arith.constant 0 : i32
    return %c0_i32, %c0_i32_0 : i32, i32
  }
  func.func @transform_3(%arg0: i32) -> (i32, i32) {
    %c0_i32 = arith.constant 0 : i32
    %c0_i32_0 = arith.constant 0 : i32
    %c0_i32_1 = arith.constant 0 : i32
    return %c0_i32, %c0_i32_0 : i32, i32
  }
  func.func @transform_4(%arg0: i32) -> (i32, i32) {
    %c0_i32 = arith.constant 0 : i32
    %c0_i32_0 = arith.constant 0 : i32
    %c0_i32_1 = arith.constant 0 : i32
    return %c0_i32, %c0_i32_0 : i32, i32
  }
  func.func @transform_5(%arg0: i32) -> (i32, i32, i32) {
    %c0_i32 = arith.constant 0 : i32
    %c0_i32_0 = arith.constant 0 : i32
    %c0_i32_1 = arith.constant 0 : i32
    %c0_i32_2 = arith.constant 0 : i32
    return %c0_i32, %c0_i32_0, %c0_i32_1 : i32, i32, i32
  }
  func.func @transform_6(%arg0: i32) -> (i32, i32, i32) {
    %c0_i32 = arith.constant 0 : i32
    %c0_i32_0 = arith.constant 0 : i32
    %c0_i32_1 = arith.constant 0 : i32
    %c0_i32_2 = arith.constant 0 : i32
    return %c0_i32, %c0_i32_0, %c0_i32_1 : i32, i32, i32
  }
  func.func @transform_7(%arg0: i32) -> (i32, i32, i32) {
    %c0_i32 = arith.constant 0 : i32
    %c0_i32_0 = arith.constant 0 : i32
    %c0_i32_1 = arith.constant 0 : i32
    %c0_i32_2 = arith.constant 0 : i32
    return %c0_i32, %c0_i32_0, %c0_i32_1 : i32, i32, i32
  }
  func.func @transform_8(%arg0: i32) -> (i32, i32) {
    %c0_i32 = arith.constant 0 : i32
    %c0_i32_0 = arith.constant 0 : i32
    %c0_i32_1 = arith.constant 0 : i32
    return %c0_i32, %c0_i32_0 : i32, i32
  }
  func.func @transform_9(%arg0: i32) -> (i32, i32, i32) {
    %c0_i32 = arith.constant 0 : i32
    %c0_i32_0 = arith.constant 0 : i32
    %c0_i32_1 = arith.constant 0 : i32
    return %arg0, %c0_i32, %c0_i32_0 : i32, i32, i32
  }
}

module attributes {stable_mosaic.version = 11 : i64} {
  func.func @_gate_out_kernel(%arg0: i32, %arg1: memref<64x64xf32, #tpu.memory_space<vmem>>, %arg2: memref<64x64xf32, #tpu.memory_space<vmem>>, %arg3: memref<64x32xf32, #tpu.memory_space<vmem>>, %arg4: memref<1x64xf32, #tpu.memory_space<vmem>>, %arg5: memref<1x64xf32, #tpu.memory_space<vmem>>, %arg6: memref<64x32xf32, #tpu.memory_space<vmem>>, %arg7: memref<1x32xf32, #tpu.memory_space<vmem>>, %arg8: memref<1x32xf32, #tpu.memory_space<vmem>>, %arg9: memref<64x32xf32, #tpu.memory_space<vmem>>) attributes {dimension_semantics = [#tpu.dimension_semantics<parallel>], iteration_bounds = array<i64: 1>, scalar_prefetch = 0 : i64, scratch_operands = 0 : i64, tpu.core_type = #tpu.core_type<tc>, window_params = [{transform_indices = @transform_0, window_bounds = array<i64: 64, 64>}, {transform_indices = @transform_1, window_bounds = array<i64: 64, 64>}, {transform_indices = @transform_2, window_bounds = array<i64: 64, 32>}, {pipeline_mode = #tpu.pipeline_mode<synchronous>, transform_indices = @transform_3, window_bounds = array<i64: 1, 64>}, {pipeline_mode = #tpu.pipeline_mode<synchronous>, transform_indices = @transform_4, window_bounds = array<i64: 1, 64>}, {pipeline_mode = #tpu.pipeline_mode<synchronous>, transform_indices = @transform_5, window_bounds = array<i64: 64, 32>}, {pipeline_mode = #tpu.pipeline_mode<synchronous>, transform_indices = @transform_6, window_bounds = array<i64: 1, 32>}, {pipeline_mode = #tpu.pipeline_mode<synchronous>, transform_indices = @transform_7, window_bounds = array<i64: 1, 32>}, {transform_indices = @transform_8, window_bounds = array<i64: 64, 32>}]} {
    %c0 = arith.constant 0 : index
    %c0_0 = arith.constant 0 : index
    %0 = vector.load %arg1[%c0, %c0_0] : memref<64x64xf32, #tpu.memory_space<vmem>>, vector<64x64xf32>
    %cst = arith.constant dense<0.000000e+00> : vector<64xf32>
    %1 = vector.multi_reduction <add>, %0, %cst [1] : vector<64x64xf32> to vector<64xf32>
    %2 = vector.shape_cast %1 : vector<64xf32> to vector<64x1xf32>
    %cst_1 = arith.constant 6.400000e+01 : f32
    %3 = vector.broadcast %cst_1 : f32 to vector<64x1xf32>
    %4 = arith.divf %2, %3 : vector<64x1xf32>
    %5 = vector.broadcast %4 : vector<64x1xf32> to vector<64x64xf32>
    %6 = arith.subf %0, %5 : vector<64x64xf32>
    %7 = arith.mulf %6, %6 : vector<64x64xf32>
    %cst_2 = arith.constant dense<0.000000e+00> : vector<64xf32>
    %8 = vector.multi_reduction <add>, %7, %cst_2 [1] : vector<64x64xf32> to vector<64xf32>
    %9 = vector.shape_cast %8 : vector<64xf32> to vector<64x1xf32>
    %cst_3 = arith.constant 6.400000e+01 : f32
    %10 = vector.broadcast %cst_3 : f32 to vector<64x1xf32>
    %11 = arith.divf %9, %10 : vector<64x1xf32>
    %12 = vector.broadcast %4 : vector<64x1xf32> to vector<64x64xf32>
    %13 = arith.subf %0, %12 : vector<64x64xf32>
    %cst_4 = arith.constant 9.99999974E-6 : f32
    %14 = vector.broadcast %cst_4 : f32 to vector<64x1xf32>
    %15 = arith.addf %11, %14 : vector<64x1xf32>
    %16 = math.rsqrt %15 : vector<64x1xf32>
    %17 = vector.broadcast %16 : vector<64x1xf32> to vector<64x64xf32>
    %18 = arith.mulf %13, %17 : vector<64x64xf32>
    %c0_5 = arith.constant 0 : index
    %c0_6 = arith.constant 0 : index
    %19 = vector.load %arg4[%c0_5, %c0_6] : memref<1x64xf32, #tpu.memory_space<vmem>>, vector<1x64xf32>
    %20 = vector.broadcast %19 : vector<1x64xf32> to vector<64x64xf32>
    %21 = arith.mulf %18, %20 : vector<64x64xf32>
    %c0_7 = arith.constant 0 : index
    %c0_8 = arith.constant 0 : index
    %22 = vector.load %arg5[%c0_7, %c0_8] : memref<1x64xf32, #tpu.memory_space<vmem>>, vector<1x64xf32>
    %23 = vector.broadcast %22 : vector<1x64xf32> to vector<64x64xf32>
    %24 = arith.addf %21, %23 : vector<64x64xf32>
    %c0_9 = arith.constant 0 : index
    %c0_10 = arith.constant 0 : index
    %25 = vector.load %arg2[%c0_9, %c0_10] : memref<64x64xf32, #tpu.memory_space<vmem>>, vector<64x64xf32>
    %26 = arith.negf %25 : vector<64x64xf32>
    %27 = math.exp %26 : vector<64x64xf32>
    %cst_11 = arith.constant 1.000000e+00 : f32
    %28 = vector.broadcast %cst_11 : f32 to vector<64x64xf32>
    %29 = arith.addf %28, %27 : vector<64x64xf32>
    %30 = arith.divf %28, %29 : vector<64x64xf32>
    %31 = arith.mulf %25, %30 : vector<64x64xf32>
    %32 = arith.mulf %24, %31 : vector<64x64xf32>
    %c0_12 = arith.constant 0 : index
    %c0_13 = arith.constant 0 : index
    %33 = vector.load %arg6[%c0_12, %c0_13] : memref<64x32xf32, #tpu.memory_space<vmem>>, vector<64x32xf32>
    %cst_14 = arith.constant dense<0.000000e+00> : vector<64x32xf32>
    %34 = tpu.matmul %32, %33, %cst_14 {dimension_numbers = #tpu.dot_dimension_numbers<[1], [0], [0], [1], [0, 0, 1, 1], [], []>} : vector<64x64xf32>, vector<64x32xf32>, vector<64x32xf32> -> vector<64x32xf32>
    %c0_15 = arith.constant 0 : index
    %c0_16 = arith.constant 0 : index
    %35 = vector.load %arg3[%c0_15, %c0_16] : memref<64x32xf32, #tpu.memory_space<vmem>>, vector<64x32xf32>
    %36 = arith.addf %35, %34 : vector<64x32xf32>
    %cst_17 = arith.constant dense<0.000000e+00> : vector<64xf32>
    %37 = vector.multi_reduction <add>, %36, %cst_17 [1] : vector<64x32xf32> to vector<64xf32>
    %38 = vector.shape_cast %37 : vector<64xf32> to vector<64x1xf32>
    %cst_18 = arith.constant 3.200000e+01 : f32
    %39 = vector.broadcast %cst_18 : f32 to vector<64x1xf32>
    %40 = arith.divf %38, %39 : vector<64x1xf32>
    %41 = vector.broadcast %40 : vector<64x1xf32> to vector<64x32xf32>
    %42 = arith.subf %36, %41 : vector<64x32xf32>
    %43 = arith.mulf %42, %42 : vector<64x32xf32>
    %cst_19 = arith.constant dense<0.000000e+00> : vector<64xf32>
    %44 = vector.multi_reduction <add>, %43, %cst_19 [1] : vector<64x32xf32> to vector<64xf32>
    %45 = vector.shape_cast %44 : vector<64xf32> to vector<64x1xf32>
    %cst_20 = arith.constant 3.200000e+01 : f32
    %46 = vector.broadcast %cst_20 : f32 to vector<64x1xf32>
    %47 = arith.divf %45, %46 : vector<64x1xf32>
    %48 = vector.broadcast %40 : vector<64x1xf32> to vector<64x32xf32>
    %49 = arith.subf %36, %48 : vector<64x32xf32>
    %cst_21 = arith.constant 9.99999974E-6 : f32
    %50 = vector.broadcast %cst_21 : f32 to vector<64x1xf32>
    %51 = arith.addf %47, %50 : vector<64x1xf32>
    %52 = math.rsqrt %51 : vector<64x1xf32>
    %53 = vector.broadcast %52 : vector<64x1xf32> to vector<64x32xf32>
    %54 = arith.mulf %49, %53 : vector<64x32xf32>
    %c0_22 = arith.constant 0 : index
    %c0_23 = arith.constant 0 : index
    %55 = vector.load %arg7[%c0_22, %c0_23] : memref<1x32xf32, #tpu.memory_space<vmem>>, vector<1x32xf32>
    %56 = vector.broadcast %55 : vector<1x32xf32> to vector<64x32xf32>
    %57 = arith.mulf %54, %56 : vector<64x32xf32>
    %c0_24 = arith.constant 0 : index
    %c0_25 = arith.constant 0 : index
    %58 = vector.load %arg8[%c0_24, %c0_25] : memref<1x32xf32, #tpu.memory_space<vmem>>, vector<1x32xf32>
    %59 = vector.broadcast %58 : vector<1x32xf32> to vector<64x32xf32>
    %60 = arith.addf %57, %59 : vector<64x32xf32>
    %c0_26 = arith.constant 0 : index
    %c0_27 = arith.constant 0 : index
    %61 = vector.load %arg9[%c0_26, %c0_27] : memref<64x32xf32, #tpu.memory_space<vmem>>, vector<64x32xf32>
    tpu.vector_store %arg9[%c0_26, %c0_27], %60 {strides = array<i32>} : memref<64x32xf32, #tpu.memory_space<vmem>>, vector<64x32xf32>,
    return
  }
  func.func @transform_0(%arg0: i32) -> (i32, i32) {
    %c0_i32 = arith.constant 0 : i32
    %c0_i32_0 = arith.constant 0 : i32
    return %arg0, %c0_i32 : i32, i32
  }
  func.func @transform_1(%arg0: i32) -> (i32, i32) {
    %c0_i32 = arith.constant 0 : i32
    %c0_i32_0 = arith.constant 0 : i32
    return %arg0, %c0_i32 : i32, i32
  }
  func.func @transform_2(%arg0: i32) -> (i32, i32) {
    %c0_i32 = arith.constant 0 : i32
    %c0_i32_0 = arith.constant 0 : i32
    return %arg0, %c0_i32 : i32, i32
  }
  func.func @transform_3(%arg0: i32) -> (i32, i32) {
    %c0_i32 = arith.constant 0 : i32
    %c0_i32_0 = arith.constant 0 : i32
    %c0_i32_1 = arith.constant 0 : i32
    return %c0_i32, %c0_i32_0 : i32, i32
  }
  func.func @transform_4(%arg0: i32) -> (i32, i32) {
    %c0_i32 = arith.constant 0 : i32
    %c0_i32_0 = arith.constant 0 : i32
    %c0_i32_1 = arith.constant 0 : i32
    return %c0_i32, %c0_i32_0 : i32, i32
  }
  func.func @transform_5(%arg0: i32) -> (i32, i32) {
    %c0_i32 = arith.constant 0 : i32
    %c0_i32_0 = arith.constant 0 : i32
    %c0_i32_1 = arith.constant 0 : i32
    return %c0_i32, %c0_i32_0 : i32, i32
  }
  func.func @transform_6(%arg0: i32) -> (i32, i32) {
    %c0_i32 = arith.constant 0 : i32
    %c0_i32_0 = arith.constant 0 : i32
    %c0_i32_1 = arith.constant 0 : i32
    return %c0_i32, %c0_i32_0 : i32, i32
  }
  func.func @transform_7(%arg0: i32) -> (i32, i32) {
    %c0_i32 = arith.constant 0 : i32
    %c0_i32_0 = arith.constant 0 : i32
    %c0_i32_1 = arith.constant 0 : i32
    return %c0_i32, %c0_i32_0 : i32, i32
  }
  func.func @transform_8(%arg0: i32) -> (i32, i32) {
    %c0_i32 = arith.constant 0 : i32
    %c0_i32_0 = arith.constant 0 : i32
    return %arg0, %c0_i32 : i32, i32
  }
}

module attributes {stable_mosaic.version = 11 : i64} {
  func.func @_pool_kernel(%arg0: memref<2x8x4x32xf32, #tpu.memory_space<vmem>>, %arg1: memref<2x4x32xf32, #tpu.memory_space<vmem>>, %arg2: memref<2x32xf32, #tpu.memory_space<vmem>>) attributes {dimension_semantics = [], scalar_prefetch = 0 : i64, scratch_operands = 0 : i64, tpu.core_type = #tpu.core_type<tc>} {
    %c0 = arith.constant 0 : index
    %c0_0 = arith.constant 0 : index
    %c0_1 = arith.constant 0 : index
    %c0_2 = arith.constant 0 : index
    %0 = vector.load %arg0[%c0, %c0_0, %c0_1, %c0_2] : memref<2x8x4x32xf32, #tpu.memory_space<vmem>>, vector<2x8x4x32xf32>
    %cst = arith.constant dense<0xFF800000> : vector<2x4x32xf32>
    %1 = vector.multi_reduction <maximumf>, %0, %cst [1] : vector<2x8x4x32xf32> to vector<2x4x32xf32>
    %c0_3 = arith.constant 0 : index
    %c0_4 = arith.constant 0 : index
    %c0_5 = arith.constant 0 : index
    %2 = vector.load %arg1[%c0_3, %c0_4, %c0_5] : memref<2x4x32xf32, #tpu.memory_space<vmem>>, vector<2x4x32xf32>
    tpu.vector_store %arg1[%c0_3, %c0_4, %c0_5], %1 {strides = array<i32>} : memref<2x4x32xf32, #tpu.memory_space<vmem>>, vector<2x4x32xf32>,
    %cst_6 = arith.constant dense<0xFF800000> : vector<2x32xf32>
    %3 = vector.multi_reduction <maximumf>, %1, %cst_6 [1] : vector<2x4x32xf32> to vector<2x32xf32>
    %c0_7 = arith.constant 0 : index
    %c0_8 = arith.constant 0 : index
    %4 = vector.load %arg2[%c0_7, %c0_8] : memref<2x32xf32, #tpu.memory_space<vmem>>, vector<2x32xf32>
    tpu.vector_store %arg2[%c0_7, %c0_8], %3 {strides = array<i32>} : memref<2x32xf32, #tpu.memory_space<vmem>>, vector<2x32xf32>,
    return
  }
}

module attributes {stable_mosaic.version = 11 : i64} {
  func.func @_head_kernel(%arg0: memref<2x32xf32, #tpu.memory_space<vmem>>, %arg1: memref<32x4xf32, #tpu.memory_space<vmem>>, %arg2: memref<1x4xf32, #tpu.memory_space<vmem>>, %arg3: memref<2x4xf32, #tpu.memory_space<vmem>>, %arg4: memref<2x4xf32, #tpu.memory_space<vmem>>) attributes {dimension_semantics = [], scalar_prefetch = 0 : i64, scratch_operands = 0 : i64, tpu.core_type = #tpu.core_type<tc>} {
    %c0 = arith.constant 0 : index
    %c0_0 = arith.constant 0 : index
    %0 = vector.load %arg0[%c0, %c0_0] : memref<2x32xf32, #tpu.memory_space<vmem>>, vector<2x32xf32>
    %c0_1 = arith.constant 0 : index
    %c0_2 = arith.constant 0 : index
    %1 = vector.load %arg1[%c0_1, %c0_2] : memref<32x4xf32, #tpu.memory_space<vmem>>, vector<32x4xf32>
    %cst = arith.constant dense<0.000000e+00> : vector<2x4xf32>
    %2 = tpu.matmul %0, %1, %cst {dimension_numbers = #tpu.dot_dimension_numbers<[1], [0], [0], [1], [0, 0, 1, 1], [], []>} : vector<2x32xf32>, vector<32x4xf32>, vector<2x4xf32> -> vector<2x4xf32>
    %c0_3 = arith.constant 0 : index
    %c0_4 = arith.constant 0 : index
    %3 = vector.load %arg2[%c0_3, %c0_4] : memref<1x4xf32, #tpu.memory_space<vmem>>, vector<1x4xf32>
    %4 = vector.broadcast %3 : vector<1x4xf32> to vector<2x4xf32>
    %5 = arith.addf %2, %4 : vector<2x4xf32>
    %c0_5 = arith.constant 0 : index
    %c0_6 = arith.constant 0 : index
    %6 = vector.load %arg3[%c0_5, %c0_6] : memref<2x4xf32, #tpu.memory_space<vmem>>, vector<2x4xf32>
    tpu.vector_store %arg3[%c0_5, %c0_6], %5 {strides = array<i32>} : memref<2x4xf32, #tpu.memory_space<vmem>>, vector<2x4xf32>,
    %cst_7 = arith.constant dense<0xFF800000> : vector<2xf32>
    %7 = vector.multi_reduction <maximumf>, %5, %cst_7 [1] : vector<2x4xf32> to vector<2xf32>
    %8 = vector.shape_cast %7 : vector<2xf32> to vector<2x1xf32>
    %9 = vector.broadcast %8 : vector<2x1xf32> to vector<2x4xf32>
    %10 = arith.subf %5, %9 : vector<2x4xf32>
    %11 = math.exp %10 : vector<2x4xf32>
    %cst_8 = arith.constant dense<0.000000e+00> : vector<2xf32>
    %12 = vector.multi_reduction <add>, %11, %cst_8 [1] : vector<2x4xf32> to vector<2xf32>
    %13 = vector.shape_cast %12 : vector<2xf32> to vector<2x1xf32>
    %14 = tpu.reciprocal %13 {approx = true} : vector<2x1xf32> -> vector<2x1xf32>
    %15 = vector.broadcast %14 : vector<2x1xf32> to vector<2x4xf32>
    %16 = arith.mulf %11, %15 : vector<2x4xf32>
    %c0_9 = arith.constant 0 : index
    %c0_10 = arith.constant 0 : index
    %17 = vector.load %arg4[%c0_9, %c0_10] : memref<2x4xf32, #tpu.memory_space<vmem>>, vector<2x4xf32>
    tpu.vector_store %arg4[%c0_9, %c0_10], %16 {strides = array<i32>} : memref<2x4xf32, #tpu.memory_space<vmem>>, vector<2x4xf32>,
    return
  }
}

module attributes {stable_mosaic.version = 11 : i64} {
  func.func @_projector_kernel(%arg0: memref<8x32xf32, #tpu.memory_space<vmem>>, %arg1: memref<32x32xf32, #tpu.memory_space<vmem>>, %arg2: memref<32x64xf32, #tpu.memory_space<vmem>>, %arg3: memref<8x64xf32, #tpu.memory_space<vmem>>) attributes {dimension_semantics = [], scalar_prefetch = 0 : i64, scratch_operands = 0 : i64, tpu.core_type = #tpu.core_type<tc>} {
    %c0 = arith.constant 0 : index
    %c0_0 = arith.constant 0 : index
    %0 = vector.load %arg0[%c0, %c0_0] : memref<8x32xf32, #tpu.memory_space<vmem>>, vector<8x32xf32>
    %c0_1 = arith.constant 0 : index
    %c0_2 = arith.constant 0 : index
    %1 = vector.load %arg1[%c0_1, %c0_2] : memref<32x32xf32, #tpu.memory_space<vmem>>, vector<32x32xf32>
    %cst = arith.constant dense<0.000000e+00> : vector<8x32xf32>
    %2 = tpu.matmul %0, %1, %cst {dimension_numbers = #tpu.dot_dimension_numbers<[1], [0], [0], [1], [0, 0, 1, 1], [], []>} : vector<8x32xf32>, vector<32x32xf32>, vector<8x32xf32> -> vector<8x32xf32>
    %cst_3 = arith.constant 0.000000e+00 : f32
    %3 = vector.broadcast %cst_3 : f32 to vector<8x32xf32>
    %4 = arith.maximumf %2, %3 : vector<8x32xf32>
    %c0_4 = arith.constant 0 : index
    %c0_5 = arith.constant 0 : index
    %5 = vector.load %arg2[%c0_4, %c0_5] : memref<32x64xf32, #tpu.memory_space<vmem>>, vector<32x64xf32>
    %cst_6 = arith.constant dense<0.000000e+00> : vector<8x64xf32>
    %6 = tpu.matmul %4, %5, %cst_6 {dimension_numbers = #tpu.dot_dimension_numbers<[1], [0], [0], [1], [0, 0, 1, 1], [], []>} : vector<8x32xf32>, vector<32x64xf32>, vector<8x64xf32> -> vector<8x64xf32>
    %c0_7 = arith.constant 0 : index
    %c0_8 = arith.constant 0 : index
    %7 = vector.load %arg3[%c0_7, %c0_8] : memref<8x64xf32, #tpu.memory_space<vmem>>, vector<8x64xf32>
    tpu.vector_store %arg3[%c0_7, %c0_8], %6 {strides = array<i32>} : memref<8x64xf32, #tpu.memory_space<vmem>>, vector<8x64xf32>,
    return
  }
}

</mosaic_0001>

<bundles_post_ra>
// kernel: tree_mamba_forward.6
= control target key start
LH: loop header
LB: loop body
LE: loop exit
PB: predicated region body
PF: predicated region fallthrough
CT: control target
= control target key end

     0   :  { %vm50_vm0 = vcmask 392192   ;;  %vm188_vm1 = vcmask 261120   ;;  %vm465_vm2 = vcmask 523264   ;;  %s1096_s1 = inlined_call_operand.vmem [shape: f32[48,32], index: 1, kind: input, shape index: {}]   ;;  %s1097_s0 = inlined_call_operand.vmem [shape: f32[64,48], index: 0, kind: input, shape index: {}]   ;;  %s1098_s2 = inlined_call_operand.vmem [shape: f32[1,32], index: 2, kind: input, shape index: {}]   ;;  %s1099_s7 = inlined_call_operand.vmem [shape: f32[64,32], index: 7, kind: output, shape index: {0}]   ;;  %s1100_s5 = inlined_call_operand.vmem [shape: f32[32,64], index: 5, kind: input, shape index: {}]   ;;  %s1101_s6 = inlined_call_operand.vmem [shape: f32[32,64], index: 6, kind: input, shape index: {}]   ;;  %s1102_s3 = inlined_call_operand.vmem [shape: f32[1,32], index: 3, kind: input, shape index: {}]   ;;  %s1103_s4 = inlined_call_operand.vmem [shape: f32[1,32], index: 4, kind: input, shape index: {}]   ;;  %s1104_s8 = inlined_call_operand.vmem [shape: f32[64,64], index: 8, kind: output, shape index: {1}]   ;;  %s1105_s9 = inlined_call_operand.vmem [shape: f32[64,64], index: 9, kind: output, shape index: {2}]  }
   0x1   :  { %v37_v0 = vld [vmem:[%s1096_s1] sm:$0xff]  ;;  %v38_v1 = vld [vmem:[%s1096_s1 + $0x8] sm:$0xff]  ;;  %v39_v2 = vld [vmem:[%s1096_s1 + $0x10] sm:$0xff] }
   0x2   :  { %v732_v3 = vpack.c.bf16 %v38_v1, %v37_v0  ;;  %v40_v4 = vld [vmem:[%s1096_s1 + $0x18] sm:$0xff]  ;;  %v41_v6 = vld [vmem:[%s1096_s1 + $0x20] sm:$0xff]  ;;  %v42_v7 = vld [vmem:[%s1096_s1 + $0x28] sm:$0xff] }
   0x3   :  { %v736_v5 = vpack.c.bf16 %v40_v4, %v39_v2  ;;  %v29_v8 = vld [vmem:[%s1097_s0] sm:$0xff]  ;;  %v740_v9 = vpack.c.bf16 %v42_v7, %v41_v6  ;;  %v30_v10 = vld [vmem:[%s1097_s0 + $0x8] sm:$0xff]  ;;  %v31_v11 = vld [vmem:[%s1097_s0 + $0x10] sm:$0xff] }
   0x4   :  { %733 = vmatprep.subr.bf16.mxu0 %v732_v3  ;;  %680 = vmatprep.mubr.msk.f32.mxu0 %vm50_vm0, %v29_v8  ;;  %v32_v12 = vld [vmem:[%s1097_s0 + $0x18] sm:$0xff]  ;;  %v33_v13 = vld [vmem:[%s1097_s0 + $0x20] sm:$0xff]  ;;  %v34_v14 = vld [vmem:[%s1097_s0 + $0x28] sm:$0xff] }
   0x5   :  { %735 = vmatpush3.bf16.msra.mxu0 %v732_v3  ;;  %v35_v15 = vld [vmem:[%s1097_s0 + $0x30] sm:$0xff]  ;;  %v36_v16 = vld [vmem:[%s1097_s0 + $0x38] sm:$0xff]  ;;  %v603_v17 = vld [vmem:[%s1098_s2] ss:$0 sm:$0xff] }
   0x6   :  { %737 = vmatprep.subr.bf16.mxu0 %v736_v5 }
   0x9   :  { %739 = vmatpush3.bf16.msra.mxu0 %v736_v5 }
   0xa   :  { %741 = vmatprep.subr.bf16.mxu0 %v740_v9 }
   0xd   :  { %743 = vmatpush3.bf16.msra.mxu0 %v740_v9 }
  0x10   :  { %681 = vmatmul.mubr.msk.f32.vlgmr.msra.gmra.mrb[0].mxu0 %vm50_vm0, %v30_v10 }
  0x11   :  { %683 = vmatprep.mubr.msk.f32.mxu0 %vm50_vm0, %v31_v11 }
  0x14   :  { %684 = vmatmul.mubr.msk.f32.gmra.mrb[2].mxu0 %vm50_vm0, %v32_v12 }
  0x15   :  { %686 = vmatprep.mubr.msk.f32.mxu0 %vm50_vm0, %v33_v13 }
  0x18   :  { %687 = vmatmul.mubr.msk.f32.gmra.mrb[4].mxu0 %vm50_vm0, %v34_v14 }
  0x19   :  { %689 = vmatprep.mubr.msk.f32.mxu0 %vm50_vm0, %v35_v15 }
  0x1c   :  { %690 = vmatmul.mubr.msk.f32.gmra.mrb[6].mxu0 %vm50_vm0, %v36_v16 }
  0xe3   :  { %v682_v18 = vpop.f32.mrb[0].mxu0 }
  0xe4   :  { %v147_v19 = vadd.f32 %v682_v18, %v603_v17  ;;  %v141_v20 = vpop.f32.mrb[1].mxu0 }
  0xe5   :  { %v142_v21 = vadd.f32 %v603_v17, %v141_v20 }
  0xe6   :  { %v883_v22 = vmax.f32 %v147_v19, 0.0 }
  0xe7   :  { %v180_v23 = vmax.f32 %v142_v21, 0.0  ;;  %v685_v24 = vpop.f32.mrb[2].mxu0 }
  0xe8   :  { %190 = vst.msk [vmem:[%s1099_s7 + $0x8] sm:$0xff] %vm188_vm1, %v883_v22  ;;  %v157_v25 = vadd.f32 %v685_v24, %v603_v17  ;;  %v151_v26 = vpop.f32.mrb[3].mxu0  ;;  %v200_v47 = vsel %vm188_vm1, %v883_v22, 0.0 }
  0xe9   :  { %189 = vst.msk [vmem:[%s1099_s7] sm:$0xff] %vm188_vm1, %v180_v23  ;;  %v152_v27 = vadd.f32 %v603_v17, %v151_v26  ;;  %v197_v46 = vsel %vm188_vm1, %v180_v23, 0.0  ;;  %v332_v26 = vld [vmem:[%s1100_s5] sm:$0xff] }
  0xea   :  { %v894_v28 = vmax.f32 %v157_v25, 0.0 }
  0xeb   :  { %v896_v29 = vmax.f32 %v152_v27, 0.0  ;;  %v688_v30 = vpop.f32.mrb[4].mxu0  ;;  %v333_v27 = vld [vmem:[%s1100_s5 + $0x8] sm:$0xff] }
  0xec   :  { %192 = vst.msk [vmem:[%s1099_s7 + $0x18] sm:$0xff] %vm188_vm1, %v894_v28  ;;  %v167_v31 = vadd.f32 %v688_v30, %v603_v17  ;;  %v161_v32 = vpop.f32.mrb[5].mxu0  ;;  %v206_v49 = vsel %vm188_vm1, %v894_v28, 0.0  ;;  %v335_v30 = vld [vmem:[%s1100_s5 + $0x18] sm:$0xff] }
  0xed   :  { %191 = vst.msk [vmem:[%s1099_s7 + $0x10] sm:$0xff] %vm188_vm1, %v896_v29  ;;  %v162_v33 = vadd.f32 %v603_v17, %v161_v32  ;;  %v203_v48 = vsel %vm188_vm1, %v896_v29, 0.0  ;;  %v474_v32 = vld [vmem:[%s1101_s6] sm:$0xff] }
  0xee   :  { %v185_v34 = vmax.f32 %v167_v31, 0.0 }
  0xef   :  { %v184_v35 = vmax.f32 %v162_v33, 0.0  ;;  %v691_v36 = vpop.f32.mrb[6].mxu0  ;;  %v475_v33 = vld [vmem:[%s1101_s6 + $0x8] sm:$0xff] }
  0xf0   :  { %194 = vst.msk [vmem:[%s1099_s7 + $0x28] sm:$0xff] %vm188_vm1, %v185_v34  ;;  %v177_v37 = vadd.f32 %v691_v36, %v603_v17  ;;  %v171_v38 = vpop.f32.mrb[7].mxu0  ;;  %v212_v44 = vsel %vm188_vm1, %v185_v34, 0.0 }
  0xf1   :  { %193 = vst.msk [vmem:[%s1099_s7 + $0x20] sm:$0xff] %vm188_vm1, %v184_v35  ;;  %v172_v39 = vadd.f32 %v603_v17, %v171_v38  ;;  %v209_v40 = vsel %vm188_vm1, %v184_v35, 0.0 }
  0xf2   :  { %v187_v41 = vmax.f32 %v177_v37, 0.0  ;;  %210 = vadd.xlane.f32.xlu0 %v209_v40 }
  0xf3   :  { %v186_v42 = vmax.f32 %v172_v39, 0.0 }
  0xf4   :  { %196 = vst.msk [vmem:[%s1099_s7 + $0x38] sm:$0xff] %vm188_vm1, %v187_v41  ;;  %v218_v45 = vsel %vm188_vm1, %v187_v41, 0.0 }
  0xf5   :  { %195 = vst.msk [vmem:[%s1099_s7 + $0x30] sm:$0xff] %vm188_vm1, %v186_v42  ;;  %v215_v43 = vsel %vm188_vm1, %v186_v42, 0.0 }
  0xf6   :  { %216 = vadd.xlane.f32.xlu1 %v215_v43  ;;  %213 = vadd.xlane.f32.xlu0 %v212_v44 }
  0xfa   :  { %219 = vadd.xlane.f32.xlu1 %v218_v45  ;;  %198 = vadd.xlane.f32.xlu0 %v197_v46 }
  0xfe   :  { %201 = vadd.xlane.f32.xlu1 %v200_v47  ;;  %204 = vadd.xlane.f32.xlu0 %v203_v48 }
 0x102   :  { %207 = vadd.xlane.f32.xlu1 %v206_v49 }
 0x17f   :  { %v211_v50 = vpop.xlane.xlu0 %210 }
 0x180   :  { %v226_v51 = vmul.f32 0.03125, %v211_v50 }
 0x182   :  { %v935_v52 = vsub.f32 %v184_v35, %v226_v51 }
 0x183   :  { %v217_v53 = vpop.xlane.xlu1 %216  ;;  %v214_v54 = vpop.xlane.xlu0 %213 }
 0x184   :  { %v228_v55 = vmul.f32 0.03125, %v217_v53  ;;  %v227_v56 = vmul.f32 0.03125, %v214_v54  ;;  %v242_v57 = vmul.f32 %v935_v52, %v935_v52 }
 0x186   :  { %v939_v58 = vsub.f32 %v186_v42, %v228_v55  ;;  %v941_v59 = vsub.f32 %v185_v34, %v227_v56  ;;  %v258_v60 = vsel %vm188_vm1, %v242_v57, 0.0  ;;  %v752_v34 = vpack.c.bf16 %v475_v33, %v474_v32  ;;  %v612_v56 = vld [vmem:[%s1102_s3] ss:$0 sm:$0xff] }
 0x187   :  { %v220_v61 = vpop.xlane.xlu1 %219  ;;  %259 = vadd.xlane.f32.xlu0 %v258_v60  ;;  %v199_v62 = vpop.xlane.xlu0 %198 }
 0x188   :  { %v229_v63 = vmul.f32 0.03125, %v220_v61  ;;  %v222_v0 = vmul.f32 0.03125, %v199_v62  ;;  %v243_v1 = vmul.f32 %v941_v59, %v941_v59  ;;  %v244_v2 = vmul.f32 %v939_v58, %v939_v58 }
 0x18a   :  { %v948_v3 = vsub.f32 %v187_v41, %v229_v63  ;;  %v950_v4 = vsub.f32 %v180_v23, %v222_v0  ;;  %v261_v5 = vsel %vm188_vm1, %v243_v1, 0.0  ;;  %v264_v6 = vsel %vm188_vm1, %v244_v2, 0.0  ;;  %v613_v63 = vld [vmem:[%s1103_s4] ss:$0 sm:$0xff] }
 0x18b   :  { %v202_v7 = vpop.xlane.xlu1 %201  ;;  %262 = vadd.xlane.f32.xlu1 %v261_v5  ;;  %265 = vadd.xlane.f32.xlu0 %v264_v6  ;;  %v205_v8 = vpop.xlane.xlu0 %204 }
 0x18c   :  { %v223_v9 = vmul.f32 0.03125, %v202_v7  ;;  %v224_v10 = vmul.f32 0.03125, %v205_v8  ;;  %v245_v11 = vmul.f32 %v948_v3, %v948_v3  ;;  %v238_v12 = vmul.f32 %v950_v4, %v950_v4 }
 0x18e   :  { %v959_v13 = vsub.f32 %v883_v22, %v223_v9  ;;  %v962_v14 = vsub.f32 %v896_v29, %v224_v10  ;;  %v267_v15 = vsel %vm188_vm1, %v245_v11, 0.0  ;;  %v246_v16 = vsel %vm188_vm1, %v238_v12, 0.0  ;;  %v334_v29 = vld [vmem:[%s1100_s5 + $0x10] sm:$0xff]  ;;  %v477_v10 = vld [vmem:[%s1101_s6 + $0x18] sm:$0xff] }
 0x18f   :  { %v208_v17 = vpop.xlane.xlu1 %207  ;;  %268 = vadd.xlane.f32.xlu1 %v267_v15  ;;  %247 = vadd.xlane.f32.xlu0 %v246_v16  ;;  %v748_v31 = vpack.c.bf16 %v335_v30, %v334_v29 }
 0x190   :  { %v225_v18 = vmul.f32 0.03125, %v208_v17  ;;  %v239_v19 = vmul.f32 %v959_v13, %v959_v13  ;;  %v240_v20 = vmul.f32 %v962_v14, %v962_v14 }
 0x192   :  { %v971_v21 = vsub.f32 %v894_v28, %v225_v18  ;;  %v249_v22 = vsel %vm188_vm1, %v239_v19, 0.0  ;;  %v252_v23 = vsel %vm188_vm1, %v240_v20, 0.0  ;;  %v744_v28 = vpack.c.bf16 %v333_v27, %v332_v26 }
 0x193   :  { %250 = vadd.xlane.f32.xlu1 %v249_v22  ;;  %253 = vadd.xlane.f32.xlu0 %v252_v23 }
 0x194   :  { %v241_v24 = vmul.f32 %v971_v21, %v971_v21  ;;  %760 = vmatprep.subr.bf16.mxu1 %v744_v28  ;;  %745 = vmatprep.subr.bf16.mxu0 %v744_v28 }
 0x195   :  { %762 = vmatpush3.bf16.msra.mxu1 %v744_v28  ;;  %747 = vmatpush3.bf16.msra.mxu0 %v744_v28 }
 0x196   :  { %v255_v25 = vsel %vm188_vm1, %v241_v24, 0.0  ;;  %761 = vmatprep.subr.bf16.mxu1 %v748_v31  ;;  %749 = vmatprep.subr.bf16.mxu0 %v748_v31 }
 0x197   :  { %256 = vadd.xlane.f32.xlu1 %v255_v25 }
 0x199   :  { %763 = vmatpush3.bf16.msra.mxu1 %v748_v31  ;;  %751 = vmatpush3.bf16.msra.mxu0 %v748_v31 }
 0x19a   :  { %753 = vmatprep.subr.bf16.mxu1 %v752_v34 }
 0x214   :  { %v260_v35 = vpop.xlane.xlu0 %259 }
 0x215   :  { %v274_v36 = vmul.f32 0.03125, %v260_v35 }
 0x217   :  { %v282_v37 = vadd.f32 1e-05, %v274_v36 }
 0x218   :  { %v263_v38 = vpop.xlane.xlu1 %262  ;;  %v266_v39 = vpop.xlane.xlu0 %265 }
 0x219   :  { %764 = vrsqrt.f32 %v282_v37  ;;  %v275_v40 = vmul.f32 0.03125, %v263_v38  ;;  %v276_v41 = vmul.f32 0.03125, %v266_v39 }
 0x21b   :  { %v283_v42 = vadd.f32 1e-05, %v275_v40  ;;  %v284_v43 = vadd.f32 1e-05, %v276_v41 }
 0x21c   :  { %v269_v44 = vpop.xlane.xlu1 %268  ;;  %v248_v45 = vpop.xlane.xlu0 %247 }
 0x21d   :  { %766 = vrsqrt.f32 %v283_v42  ;;  %v277_v46 = vmul.f32 0.03125, %v269_v44  ;;  %v270_v47 = vmul.f32 0.03125, %v248_v45 }
 0x21e   :  { %768 = vrsqrt.f32 %v284_v43 }
 0x21f   :  { %v285_v48 = vadd.f32 1e-05, %v277_v46  ;;  %v278_v49 = vadd.f32 1e-05, %v270_v47 }
 0x220   :  { %v251_v50 = vpop.xlane.xlu1 %250  ;;  %v254_v51 = vpop.xlane.xlu0 %253 }
 0x221   :  { %770 = vrsqrt.f32 %v285_v48  ;;  %v271_v53 = vmul.f32 0.03125, %v251_v50  ;;  %v272_v54 = vmul.f32 0.03125, %v254_v51 }
 0x222   :  { %772 = vrsqrt.f32 %v278_v49 }
 0x223   :  { %v765_v55 = vpop.eup %764  ;;  %v279_v57 = vadd.f32 1e-05, %v271_v53  ;;  %v280_v60 = vadd.f32 1e-05, %v272_v54 }
 0x224   :  { %v257_v61 = vpop.xlane.xlu1 %256  ;;  %v298_v62 = vmul.f32 %v765_v55, %v935_v52  ;;  %v476_v52 = vld [vmem:[%s1101_s6 + $0x10] sm:$0xff] }
 0x225   :  { %774 = vrsqrt.f32 %v279_v57  ;;  %v273_v0 = vmul.f32 0.03125, %v257_v61  ;;  %v756_v18 = vpack.c.bf16 %v477_v10, %v476_v52 }
 0x226   :  { %776 = vrsqrt.f32 %v280_v60  ;;  %v313_v1 = vmul.f32 %v612_v56, %v298_v62 }
 0x227   :  { %v767_v2 = vpop.eup %766  ;;  %v281_v5 = vadd.f32 1e-05, %v273_v0 }
 0x228   :  { %v769_v6 = vpop.eup %768  ;;  %v328_v7 = vadd.f32 %v613_v63, %v313_v1  ;;  %v299_v8 = vmul.f32 %v767_v2, %v941_v59 }
 0x229   :  { %778 = vrsqrt.f32 %v281_v5  ;;  %v300_v9 = vmul.f32 %v769_v6, %v939_v58 }
 0x22a   :  { %706 = vmatprep.mubr.msk.f32.mxu1 %vm188_vm1, %v328_v7  ;;  %v314_v11 = vmul.f32 %v612_v56, %v299_v8 }
 0x22b   :  { %v771_v12 = vpop.eup %770  ;;  %v315_v15 = vmul.f32 %v612_v56, %v300_v9 }
 0x22c   :  { %v773_v16 = vpop.eup %772  ;;  %v329_v17 = vadd.f32 %v613_v63, %v314_v11  ;;  %v301_v59 = vmul.f32 %v771_v12, %v948_v3 }
 0x22d   :  { %v330_v19 = vadd.f32 %v613_v63, %v315_v15  ;;  %v294_v58 = vmul.f32 %v773_v16, %v950_v4 }
 0x22e   :  { %707 = vmatmul.mubr.msk.f32.vlgmr.msra.gmra.mrb[0].mxu1 %vm188_vm1, %v329_v17  ;;  %v316_v20 = vmul.f32 %v612_v56, %v301_v59 }
 0x22f   :  { %v775_v22 = vpop.eup %774  ;;  %755 = vmatpush3.bf16.msra.mxu1 %v752_v34  ;;  %709 = vmatprep.mubr.msk.f32.mxu1 %vm188_vm1, %v330_v19  ;;  %v309_v23 = vmul.f32 %v612_v56, %v294_v58 }
 0x230   :  { %v777_v24 = vpop.eup %776  ;;  %v295_v25 = vmul.f32 %v775_v22, %v959_v13  ;;  %757 = vmatprep.subr.bf16.mxu1 %v756_v18  ;;  %v331_v26 = vadd.f32 %v613_v63, %v316_v20 }
 0x231   :  { %v324_v27 = vadd.f32 %v613_v63, %v309_v23  ;;  %v296_v28 = vmul.f32 %v777_v24, %v962_v14 }
 0x232   :  { %v310_v3 = vmul.f32 %v612_v56, %v295_v25  ;;  %710 = vmatmul.mubr.msk.f32.gmra.mrb[2].mxu1 %vm188_vm1, %v331_v26 }
 0x233   :  { %v779_v4 = vpop.eup %778  ;;  %700 = vmatprep.mubr.msk.f32.mxu0 %vm188_vm1, %v324_v27  ;;  %759 = vmatpush3.bf16.msra.mxu1 %v756_v18  ;;  %v311_v29 = vmul.f32 %v612_v56, %v296_v28 }
 0x234   :  { %v325_v30 = vadd.f32 %v613_v63, %v310_v3  ;;  %720 = vmatprep.mubr.msk.f32.mxu1 %vm188_vm1, %v324_v27  ;;  %v297_v31 = vmul.f32 %v779_v4, %v971_v21 }
 0x235   :  { %v326_v32 = vadd.f32 %v613_v63, %v311_v29 }
 0x236   :  { %701 = vmatmul.mubr.msk.f32.vlgmr.msra.gmra.mrb[8].mxu0 %vm188_vm1, %v325_v30  ;;  %721 = vmatmul.mubr.msk.f32.vlgmr.msra.gmra.mrb[4].mxu1 %vm188_vm1, %v325_v30  ;;  %v312_v13 = vmul.f32 %v612_v56, %v297_v31 }
 0x237   :  { %703 = vmatprep.mubr.msk.f32.mxu0 %vm188_vm1, %v326_v32  ;;  %723 = vmatprep.mubr.msk.f32.mxu1 %vm188_vm1, %v326_v32 }
 0x238   :  { %v327_v14 = vadd.f32 %v613_v63, %v312_v13 }
 0x23a   :  { %704 = vmatmul.mubr.msk.f32.gmra.mrb[10].mxu0 %vm188_vm1, %v327_v14  ;;  %724 = vmatmul.mubr.msk.f32.gmra.mrb[6].mxu1 %vm188_vm1, %v327_v14 }
 0x23b   :  { %726 = vmatprep.mubr.msk.f32.mxu1 %vm188_vm1, %v328_v7 }
 0x23e   :  { %727 = vmatmul.mubr.msk.f32.gmra.mrb[8].mxu1 %vm188_vm1, %v329_v17 }
 0x23f   :  { %729 = vmatprep.mubr.msk.f32.mxu1 %vm188_vm1, %v330_v19 }
 0x242   :  { %730 = vmatmul.mubr.msk.f32.gmra.mrb[10].mxu1 %vm188_vm1, %v331_v26 }
 0x301   :  { %v708_v21 = vpop.f32.mrb[0].mxu1 }
 0x302   :  { %471 = vst.msk [vmem:[%s1104_s8 + $0x28] sm:$0xff] %vm465_vm2, %v708_v21  ;;  %v446_v33 = vpop.f32.mrb[1].mxu1 }
 0x303   :  { %470 = vst.msk [vmem:[%s1104_s8 + $0x20] sm:$0xff] %vm465_vm2, %v446_v33 }
 0x305   :  { %v711_v34 = vpop.f32.mrb[2].mxu1 }
 0x306   :  { %473 = vst.msk [vmem:[%s1104_s8 + $0x38] sm:$0xff] %vm465_vm2, %v711_v34  ;;  %v456_v35 = vpop.f32.mrb[3].mxu1 }
 0x307   :  { %472 = vst.msk [vmem:[%s1104_s8 + $0x30] sm:$0xff] %vm465_vm2, %v456_v35 }
 0x309   :  { %v702_v36 = vpop.f32.mrb[8].mxu0  ;;  %v722_v37 = vpop.f32.mrb[4].mxu1 }
 0x30a   :  { %467 = vst.msk [vmem:[%s1104_s8 + $0x8] sm:$0xff] %vm465_vm2, %v702_v36  ;;  %584 = vst.msk [vmem:[%s1105_s9 + $0x8] sm:$0xff] %vm465_vm2, %v722_v37  ;;  %v426_v38 = vpop.f32.mrb[9].mxu0  ;;  %v544_v39 = vpop.f32.mrb[5].mxu1 }
 0x30b   :  { %466 = vst.msk [vmem:[%s1104_s8] sm:$0xff] %vm465_vm2, %v426_v38  ;;  %583 = vst.msk [vmem:[%s1105_s9] sm:$0xff] %vm465_vm2, %v544_v39 }
 0x30d   :  { %v705_v40 = vpop.f32.mrb[10].mxu0  ;;  %v725_v41 = vpop.f32.mrb[6].mxu1 }
 0x30e   :  { %469 = vst.msk [vmem:[%s1104_s8 + $0x18] sm:$0xff] %vm465_vm2, %v705_v40  ;;  %586 = vst.msk [vmem:[%s1105_s9 + $0x18] sm:$0xff] %vm465_vm2, %v725_v41  ;;  %v436_v42 = vpop.f32.mrb[11].mxu0  ;;  %v554_v43 = vpop.f32.mrb[7].mxu1 }
 0x30f   :  { %468 = vst.msk [vmem:[%s1104_s8 + $0x10] sm:$0xff] %vm465_vm2, %v436_v42  ;;  %585 = vst.msk [vmem:[%s1105_s9 + $0x10] sm:$0xff] %vm465_vm2, %v554_v43 }
 0x311   :  { %v728_v44 = vpop.f32.mrb[8].mxu1 }
 0x312   :  { %588 = vst.msk [vmem:[%s1105_s9 + $0x28] sm:$0xff] %vm465_vm2, %v728_v44  ;;  %v564_v45 = vpop.f32.mrb[9].mxu1 }
 0x313   :  { %587 = vst.msk [vmem:[%s1105_s9 + $0x20] sm:$0xff] %vm465_vm2, %v564_v45 }
 0x315   :  { %v731_v46 = vpop.f32.mrb[10].mxu1 }
 0x316   :  { %590 = vst.msk [vmem:[%s1105_s9 + $0x38] sm:$0xff] %vm465_vm2, %v731_v46  ;;  %v574_v47 = vpop.f32.mrb[11].mxu1 }
 0x317   :  { %589 = vst.msk [vmem:[%s1105_s9 + $0x30] sm:$0xff] %vm465_vm2, %v574_v47 }

// kernel: tile.14
= control target key start
LH: loop header
LB: loop body
LE: loop exit
PB: predicated region body
PF: predicated region fallthrough
CT: control target
= control target key end

     0   :  { %vm35_vm0 = vcmask 1045507   ;;  %s20_s12 = smov 3  ;;  %s26_s13 = smov 3  ;;  %vm17_vm1 = vcmask 523264   ;;  %vm39_vm2 = vcmask 1048064   ;;  %s85_s0 = inlined_call_operand.vmem [shape: f32[3,4,64], index: 0, kind: input, shape index: {}]   ;;  %s86_s1 = inlined_call_operand.vmem [shape: f32[3,256], index: 1, kind: output, shape index: {}]  }
   0x1   :  { %v55_v0 = vld [vmem:[%s85_s0 + $0x8] sm:$0xf]  ;;  %v56_v1 = vld [vmem:[%s85_s0 + $0x4] sm:$0xf]  ;;  %v13_v2 = vld [vmem:[%s85_s0] sm:$0xf] }
   0x2   :  { %8 = vst [vmem:[#allocation1 + $0x10] sm:$0xf] %v55_v0  ;;  %12 = vst [vmem:[#allocation1 + $0x8] sm:$0xf] %v56_v1  ;;  %s15_s0 = smov 3  ;;  %s59_s14 = smov 64  }
   0x3   :  { %14 = vst [vmem:[#allocation1] sm:$0xf] %v13_v2 }
   0x9   :  { %v21_v7 = vld [vmem:[#allocation1 + $0x8] ss:$2 sm:%s20_s12]  }
   0xa   :  { %v32_v3 = vld [vmem:[#allocation1 + $0x1] ss:$8 sm:$0x7]   ;;  %v34_v4 = vld [vmem:[#allocation1 - $0x15] ss:$8 sm:$0x38]  }
   0xb   :  { %v36_v5 = vsel %vm35_vm0, %v34_v4, %v32_v3  ;;  %v16_v6 = vld [vmem:[#allocation1] ss:$2 sm:%s15_s0]   ;;  %v27_v8 = vld [vmem:[#allocation1 + $0x10] ss:$2 sm:%s26_s13]  }
   0xc   :  { %37 = vrot.lane.b32.xlu0 %v36_v5, %s59_s14  ;;  %18 = vst.msk [vmem:[#allocation0] ss:$8 sm:$0x3] %vm17_vm1, %v16_v6   ;;  %24 = vst.msk [vmem:[#allocation0 + $0x1] ss:$8 sm:$0x3] %vm17_vm1, %v21_v7  }
   0xd   :  { %30 = vst.msk [vmem:[#allocation0 + $0x2] ss:$8 sm:$0x3] %vm17_vm1, %v27_v8  }
  0x7e   :  { %v38_v9 = vpop.permute.xlu0 %37  }
  0x7f   :  { %40 = vst.msk [vmem:[#allocation0] sm:$0x7] %vm39_vm2, %v38_v9   ;;  %42 = vst.msk [vmem:[#allocation0 + $0x5] sm:$0x38] %vm39_vm2, %v38_v9  }
  0x86   :  { %v46_v10 = vld [vmem:[#allocation0] sm:$0xf]  ;;  %v50_v11 = vld [vmem:[#allocation0 + $0x8] sm:$0xf] }
  0x87   :  { %48 = vst [vmem:[%s86_s1] sm:$0xf] %v46_v10  ;;  %57 = vst [vmem:[%s86_s1 + $0x4] sm:$0xf] %v50_v11 }

// kernel: tile.18
= control target key start
LH: loop header
LB: loop body
LE: loop exit
PB: predicated region body
PF: predicated region fallthrough
CT: control target
= control target key end

     0   :  { %s22_s0 = inlined_call_operand.vmem [shape: f32[64], index: 0, kind: input, shape index: {}]   ;;  %s23_s1 = inlined_call_operand.vmem [shape: f32[4,64], index: 1, kind: output, shape index: {}]  }
   0x1   :  { %v4_v0 = vld [vmem:[%s22_s0] ss:$0 sm:$0xff] }
   0x2   :  { %5 = vst [vmem:[%s23_s1] sm:$0xf] %v4_v0 }

// kernel: tile.19
= control target key start
LH: loop header
LB: loop body
LE: loop exit
PB: predicated region body
PF: predicated region fallthrough
CT: control target
= control target key end

     0   :  { %s6_s8 = smov 3  ;;  %vm8_vm0 = vcmask 523264   ;;  %s30_s9 = smov 64   ;;  %vm15_vm1 = vcmask 1048064   ;;  %s50_s0 = inlined_call_operand.vmem [shape: f32[4,64], index: 0, kind: input, shape index: {}]   ;;  %s51_s1 = inlined_call_operand.vmem [shape: f32[1,256], index: 1, kind: output, shape index: {}]  }
   0x1   :  { %v4_v0 = vld [vmem:[%s50_s0] sm:$0xf]  ;;  %s11_s0 = smov 3 }
   0x2   :  { %5 = vst [vmem:[#allocation1] sm:$0xf] %v4_v0 }
   0x9   :  { %v12_v1 = vld [vmem:[#allocation1 + $0x1] ss:$2 sm:%s11_s0]   ;;  %v7_v2 = vld [vmem:[#allocation1] ss:$2 sm:%s6_s8]  }
   0xa   :  { %13 = vrot.lane.b32.xlu0 %v12_v1, %s30_s9  ;;  %9 = vst.msk [vmem:[#allocation0] ss:$8 sm:$0x3] %vm8_vm0, %v7_v2  }
  0x7c   :  { %v14_v3 = vpop.permute.xlu0 %13  }
  0x7d   :  { %16 = vst.msk [vmem:[#allocation0] ss:$8 sm:$0x3] %vm15_vm1, %v14_v3  }
  0x84   :  { %v20_v4 = vld [vmem:[#allocation0] sm:$0x1]  ;;  %v24_v5 = vld [vmem:[#allocation0 + $0x8] sm:$0x1] }
  0x85   :  { %22 = vst [vmem:[%s51_s1] sm:$0x1] %v20_v4  ;;  %28 = vst [vmem:[%s51_s1 + $0x1] sm:$0x1] %v24_v5 }

// kernel: tree_mamba_forward.9
= control target key start
LH: loop header
LB: loop body
LE: loop exit
PB: predicated region body
PF: predicated region fallthrough
CT: control target
= control target key end

     0   :  { %vm26_vm0 = vcmask 257024   ;;  %vm75_vm1 = vcmask 1041409   ;;  %vm78_vm2 = vcmask 254976   ;;  %s180_s0 = inlined_call_operand.vmem [shape: f32[2,8,4,32], index: 0, kind: input, shape index: {}]   ;;  %s181_s1 = inlined_call_operand.vmem [shape: f32[2,4,32], index: 1, kind: output, shape index: {0}]   ;;  %s182_s2 = inlined_call_operand.vmem [shape: f32[2,32], index: 2, kind: output, shape index: {1}]  }
   0x1   :  { %v10_v0 = vld [vmem:[%s180_s0] sm:$0xf]  ;;  %v11_v1 = vld [vmem:[%s180_s0 + $0x4] sm:$0xf]  ;;  %v12_v2 = vld [vmem:[%s180_s0 + $0x8] sm:$0xf] }
   0x2   :  { %v13_v3 = vld [vmem:[%s180_s0 + $0xc] sm:$0xf]  ;;  %v14_v4 = vld [vmem:[%s180_s0 + $0x10] sm:$0xf]  ;;  %v15_v5 = vld [vmem:[%s180_s0 + $0x14] sm:$0xf] }
   0x3   :  { %v16_v6 = vld [vmem:[%s180_s0 + $0x18] sm:$0xf]  ;;  %v17_v7 = vld [vmem:[%s180_s0 + $0x1c] sm:$0xf]  ;;  %v27_v8 = vsel %vm26_vm0, %v10_v0, -inf  ;;  %v28_v9 = vsel %vm26_vm0, %v11_v1, -inf }
   0x4   :  { %v29_v10 = vsel %vm26_vm0, %v12_v2, -inf  ;;  %v31_v11 = vsel %vm26_vm0, %v13_v3, -inf  ;;  %v33_v12 = vsel %vm26_vm0, %v14_v4, -inf  ;;  %v35_v13 = vsel %vm26_vm0, %v15_v5, -inf  ;;  %v18_v14 = vld [vmem:[%s180_s0 + $0x20] sm:$0xf] }
   0x5   :  { %v30_v15 = vmax.f32 %v27_v8, %v29_v10  ;;  %v32_v16 = vmax.f32 %v28_v9, %v31_v11  ;;  %v37_v17 = vsel %vm26_vm0, %v16_v6, -inf  ;;  %v39_v18 = vsel %vm26_vm0, %v17_v7, -inf  ;;  %v19_v19 = vld [vmem:[%s180_s0 + $0x24] sm:$0xf]  ;;  %v20_v20 = vld [vmem:[%s180_s0 + $0x28] sm:$0xf] }
   0x6   :  { %v21_v21 = vld [vmem:[%s180_s0 + $0x2c] sm:$0xf]  ;;  %v22_v22 = vld [vmem:[%s180_s0 + $0x30] sm:$0xf]  ;;  %v23_v23 = vld [vmem:[%s180_s0 + $0x34] sm:$0xf] }
   0x7   :  { %v34_v24 = vmax.f32 %v30_v15, %v33_v12  ;;  %v36_v25 = vmax.f32 %v32_v16, %v35_v13  ;;  %v24_v26 = vld [vmem:[%s180_s0 + $0x38] sm:$0xf]  ;;  %v25_v27 = vld [vmem:[%s180_s0 + $0x3c] sm:$0xf]  ;;  %v42_v28 = vsel %vm26_vm0, %v18_v14, -inf  ;;  %v43_v29 = vsel %vm26_vm0, %v19_v19, -inf }
   0x8   :  { %v44_v30 = vsel %vm26_vm0, %v20_v20, -inf  ;;  %v46_v31 = vsel %vm26_vm0, %v21_v21, -inf  ;;  %v48_v32 = vsel %vm26_vm0, %v22_v22, -inf  ;;  %v50_v33 = vsel %vm26_vm0, %v23_v23, -inf }
   0x9   :  { %v38_v34 = vmax.f32 %v34_v24, %v37_v17  ;;  %v40_v35 = vmax.f32 %v36_v25, %v39_v18  ;;  %v45_v36 = vmax.f32 %v42_v28, %v44_v30  ;;  %v47_v37 = vmax.f32 %v43_v29, %v46_v31 }
   0xa   :  { %v52_v38 = vsel %vm26_vm0, %v24_v26, -inf  ;;  %v54_v39 = vsel %vm26_vm0, %v25_v27, -inf }
   0xb   :  { %v41_v40 = vmax.f32 %v38_v34, %v40_v35  ;;  %v49_v41 = vmax.f32 %v45_v36, %v48_v32  ;;  %v51_v42 = vmax.f32 %v47_v37, %v50_v33 }
   0xd   :  { %57 = vst.msk [vmem:[%s181_s1] sm:$0xf] %vm26_vm0, %v41_v40  ;;  %v59_v43 = vsel %vm26_vm0, %v41_v40, -inf  ;;  %v53_v44 = vmax.f32 %v49_v41, %v52_v38  ;;  %v55_v45 = vmax.f32 %v51_v42, %v54_v39 }
   0xe   :  { %v60_v46 = vrot.slane %v59_v43, 4 }
   0xf   :  { %v56_v47 = vmax.f32 %v53_v44, %v55_v45 }
  0x10   :  { %v61_v48 = vmax.f32 %v59_v43, %v60_v46 }
  0x11   :  { %58 = vst.msk [vmem:[%s181_s1 + $0x4] sm:$0xf] %vm26_vm0, %v56_v47  ;;  %v66_v49 = vsel %vm26_vm0, %v56_v47, -inf }
  0x12   :  { %v62_v50 = vrot.slane %v61_v48, 2  ;;  %v67_v51 = vrot.slane %v66_v49, 4 }
  0x14   :  { %v68_v52 = vmax.f32 %v66_v49, %v67_v51  ;;  %v63_v53 = vmax.f32 %v61_v48, %v62_v50 }
  0x16   :  { %v69_v54 = vrot.slane %v68_v52, 2  ;;  %v64_v55 = vrot.slane %v63_v53, 1 }
  0x18   :  { %v70_v56 = vmax.f32 %v68_v52, %v69_v54  ;;  %v65_v57 = vmax.f32 %v63_v53, %v64_v55 }
  0x1a   :  { %v71_v58 = vrot.slane %v70_v56, 1 }
  0x1c   :  { %v72_v59 = vmax.f32 %v70_v56, %v71_v58 }
  0x1e   :  { %v76_v60 = vsel %vm75_vm1, %v72_v59, %v65_v57 }
  0x1f   :  { %79 = vst.msk [vmem:[%s182_s2] sm:$0x3] %vm78_vm2, %v76_v60 }

// kernel: tree_mamba_forward.8
= control target key start
LH: loop header
LB: loop body
LE: loop exit
PB: predicated region body
PF: predicated region fallthrough
CT: control target
= control target key end

     0   :  { %vm37_vm0 = vcmask 523264   ;;  %vm398_vm1 = vcmask 261120   ;;  %s1045_s0 = inlined_call_operand.vmem [shape: f32[64,64], index: 0, kind: input, shape index: {}]   ;;  %s1046_s5 = inlined_call_operand.vmem [shape: f32[64,32], index: 5, kind: input, shape index: {}]   ;;  %s1047_s1 = inlined_call_operand.vmem [shape: f32[64,64], index: 1, kind: input, shape index: {}]   ;;  %s1048_s3 = inlined_call_operand.vmem [shape: f32[1,64], index: 3, kind: input, shape index: {}]   ;;  %s1049_s4 = inlined_call_operand.vmem [shape: f32[1,64], index: 4, kind: input, shape index: {}]   ;;  %s1050_s2 = inlined_call_operand.vmem [shape: f32[64,32], index: 2, kind: input, shape index: {}]   ;;  %s1051_s6 = inlined_call_operand.vmem [shape: f32[1,32], index: 6, kind: input, shape index: {}]   ;;  %s1052_s7 = inlined_call_operand.vmem [shape: f32[1,32], index: 7, kind: input, shape index: {}]   ;;  %s1053_s8 = inlined_call_operand.vmem [shape: f32[64,32], index: 8, kind: output, shape index: {}]  }
   0x1   :  { %v29_v0 = vld [vmem:[%s1045_s0] sm:$0xff]  ;;  %v30_v1 = vld [vmem:[%s1045_s0 + $0x8] sm:$0xff]  ;;  %v31_v8 = vld [vmem:[%s1045_s0 + $0x10] sm:$0xff] }
   0x2   :  { %v33_v2 = vld [vmem:[%s1045_s0 + $0x20] sm:$0xff]  ;;  %v38_v3 = vsel %vm37_vm0, %v29_v0, 0.0  ;;  %v41_v4 = vsel %vm37_vm0, %v30_v1, 0.0  ;;  %v34_v5 = vld [vmem:[%s1045_s0 + $0x28] sm:$0xff]  ;;  %v35_v9 = vld [vmem:[%s1045_s0 + $0x30] sm:$0xff]  ;;  %v44_v10 = vsel %vm37_vm0, %v31_v8, 0.0 }
   0x3   :  { %39 = vadd.xlane.f32.xlu0 %v38_v3  ;;  %42 = vadd.xlane.f32.xlu1 %v41_v4  ;;  %v50_v6 = vsel %vm37_vm0, %v33_v2, 0.0  ;;  %v53_v7 = vsel %vm37_vm0, %v34_v5, 0.0  ;;  %v56_v11 = vsel %vm37_vm0, %v35_v9, 0.0  ;;  %v32_v12 = vld [vmem:[%s1045_s0 + $0x18] sm:$0xff]  ;;  %v245_v56 = vld [vmem:[%s1046_s5] sm:$0xff]  ;;  %v246_v57 = vld [vmem:[%s1046_s5 + $0x8] sm:$0xff] }
   0x4   :  { %v36_v13 = vld [vmem:[%s1045_s0 + $0x38] sm:$0xff]  ;;  %v47_v14 = vsel %vm37_vm0, %v32_v12, 0.0  ;;  %v610_v58 = vpack.c.bf16 %v246_v57, %v245_v56  ;;  %v247_v59 = vld [vmem:[%s1046_s5 + $0x10] sm:$0xff]  ;;  %v249_v62 = vld [vmem:[%s1046_s5 + $0x20] sm:$0xff] }
   0x5   :  { %v59_v15 = vsel %vm37_vm0, %v36_v13, 0.0  ;;  %v248_v60 = vld [vmem:[%s1046_s5 + $0x18] sm:$0xff]  ;;  %v250_v63 = vld [vmem:[%s1046_s5 + $0x28] sm:$0xff]  ;;  %v842_v4 = vld [vmem:[%s1047_s1] sm:$0xff] }
   0x6   :  { %611 = vmatprep.subr.bf16.mxu0 %v610_v58  ;;  %626 = vmatprep.subr.bf16.mxu1 %v610_v58  ;;  %v614_v61 = vpack.c.bf16 %v248_v60, %v247_v59 }
   0x7   :  { %51 = vadd.xlane.f32.xlu0 %v50_v6  ;;  %54 = vadd.xlane.f32.xlu1 %v53_v7  ;;  %v848_v6 = vld [vmem:[%s1047_s1 + $0x8] sm:$0xff]  ;;  %v853_v7 = vld [vmem:[%s1047_s1 + $0x20] sm:$0xff] }
   0x8   :  { %613 = vmatpush3.bf16.msra.mxu0 %v610_v58  ;;  %630 = vmatpush3.bf16.msra.mxu1 %v610_v58 }
   0x9   :  { %615 = vmatprep.subr.bf16.mxu0 %v614_v61  ;;  %627 = vmatprep.subr.bf16.mxu1 %v614_v61 }
   0xb   :  { %45 = vadd.xlane.f32.xlu0 %v44_v10  ;;  %57 = vadd.xlane.f32.xlu1 %v56_v11  ;;  %v860_v10 = vld [vmem:[%s1047_s1 + $0x10] sm:$0xff]  ;;  %v865_v11 = vld [vmem:[%s1047_s1 + $0x28] sm:$0xff] }
   0xc   :  { %617 = vmatpush3.bf16.msra.mxu0 %v614_v61  ;;  %631 = vmatpush3.bf16.msra.mxu1 %v614_v61 }
   0xf   :  { %48 = vadd.xlane.f32.xlu0 %v47_v14  ;;  %60 = vadd.xlane.f32.xlu1 %v59_v15  ;;  %v872_v14 = vld [vmem:[%s1047_s1 + $0x18] sm:$0xff]  ;;  %v877_v15 = vld [vmem:[%s1047_s1 + $0x30] sm:$0xff] }
  0x90   :  { %v40_v16 = vpop.xlane.xlu0 %39  ;;  %v43_v17 = vpop.xlane.xlu1 %42 }
  0x91   :  { %v63_v18 = vmul.f32 0.015625, %v40_v16  ;;  %v64_v19 = vmul.f32 0.015625, %v43_v17  ;;  %v551_v16 = vmul.f32 -1.442695, %v872_v14  ;;  %v554_v17 = vmul.f32 -1.442695, %v877_v15 }
  0x93   :  { %v775_v20 = vsub.f32 %v29_v0, %v63_v18  ;;  %v777_v21 = vsub.f32 %v30_v1, %v64_v19  ;;  %v618_v0 = vpack.c.bf16 %v250_v63, %v249_v62  ;;  %v251_v1 = vld [vmem:[%s1046_s5 + $0x30] sm:$0xff]  ;;  %v884_v18 = vld [vmem:[%s1047_s1 + $0x38] sm:$0xff] }
  0x94   :  { %v52_v22 = vpop.xlane.xlu0 %51  ;;  %v55_v23 = vpop.xlane.xlu1 %54 }
  0x95   :  { %v67_v24 = vmul.f32 0.015625, %v52_v22  ;;  %v68_v25 = vmul.f32 0.015625, %v55_v23  ;;  %v79_v26 = vmul.f32 %v775_v20, %v775_v20  ;;  %v80_v27 = vmul.f32 %v777_v21, %v777_v21  ;;  %619 = vmatprep.subr.bf16.mxu0 %v618_v0  ;;  %628 = vmatprep.subr.bf16.mxu1 %v618_v0 }
  0x96   :  { %621 = vmatpush3.bf16.msra.mxu0 %v618_v0  ;;  %632 = vmatpush3.bf16.msra.mxu1 %v618_v0  ;;  %v555_v22 = vmul.f32 -1.442695, %v884_v18 }
  0x97   :  { %v783_v28 = vsub.f32 %v33_v2, %v67_v24  ;;  %v785_v29 = vsub.f32 %v34_v5, %v68_v25  ;;  %v87_v30 = vsel %vm37_vm0, %v79_v26, 0.0  ;;  %v90_v33 = vsel %vm37_vm0, %v80_v27, 0.0  ;;  %v252_v2 = vld [vmem:[%s1046_s5 + $0x38] sm:$0xff] }
  0x98   :  { %88 = vadd.xlane.f32.xlu0 %v87_v30  ;;  %v46_v31 = vpop.xlane.xlu0 %45  ;;  %v58_v32 = vpop.xlane.xlu1 %57  ;;  %v622_v3 = vpack.c.bf16 %v252_v2, %v251_v1  ;;  %v548_v5 = vmul.f32 -1.442695, %v842_v4  ;;  %v890_v2 = vld [vmem:[%s1048_s3] ss:$0 sm:$0xff] }
  0x99   :  { %v65_v34 = vmul.f32 0.015625, %v46_v31  ;;  %v69_v35 = vmul.f32 0.015625, %v58_v32  ;;  %v83_v36 = vmul.f32 %v783_v28, %v783_v28  ;;  %v84_v37 = vmul.f32 %v785_v29, %v785_v29 }
  0x9a   :  { %623 = vmatprep.subr.bf16.mxu0 %v622_v3  ;;  %629 = vmatprep.subr.bf16.mxu1 %v622_v3  ;;  %634 = vpow2.f32 %v548_v5 }
  0x9b   :  { %v793_v38 = vsub.f32 %v31_v8, %v65_v34  ;;  %v795_v39 = vsub.f32 %v35_v9, %v69_v35  ;;  %v99_v40 = vsel %vm37_vm0, %v83_v36, 0.0  ;;  %v102_v43 = vsel %vm37_vm0, %v84_v37, 0.0  ;;  %625 = vmatpush3.bf16.msra.mxu0 %v622_v3  ;;  %633 = vmatpush3.bf16.msra.mxu1 %v622_v3 }
  0x9c   :  { %91 = vadd.xlane.f32.xlu0 %v90_v33  ;;  %100 = vadd.xlane.f32.xlu1 %v99_v40  ;;  %v49_v41 = vpop.xlane.xlu0 %48  ;;  %v61_v42 = vpop.xlane.xlu1 %60  ;;  %v549_v8 = vmul.f32 -1.442695, %v848_v6  ;;  %v552_v9 = vmul.f32 -1.442695, %v853_v7 }
  0x9d   :  { %v66_v44 = vmul.f32 0.015625, %v49_v41  ;;  %v70_v45 = vmul.f32 0.015625, %v61_v42  ;;  %v81_v46 = vmul.f32 %v793_v38, %v793_v38  ;;  %v85_v47 = vmul.f32 %v795_v39, %v795_v39 }
  0x9e   :  { %636 = vpow2.f32 %v549_v8 }
  0x9f   :  { %v803_v48 = vsub.f32 %v32_v12, %v66_v44  ;;  %v805_v49 = vsub.f32 %v36_v13, %v70_v45  ;;  %v93_v50 = vsel %vm37_vm0, %v81_v46, 0.0  ;;  %v105_v51 = vsel %vm37_vm0, %v85_v47, 0.0 }
  0xa0   :  { %103 = vadd.xlane.f32.xlu1 %v102_v43  ;;  %94 = vadd.xlane.f32.xlu0 %v93_v50  ;;  %v550_v12 = vmul.f32 -1.442695, %v860_v10  ;;  %638 = vpow2.f32 %v552_v9  ;;  %v553_v13 = vmul.f32 -1.442695, %v865_v11 }
  0xa1   :  { %v82_v52 = vmul.f32 %v803_v48, %v803_v48  ;;  %v86_v53 = vmul.f32 %v805_v49, %v805_v49 }
  0xa2   :  { %640 = vpow2.f32 %v550_v12 }
  0xa3   :  { %v96_v54 = vsel %vm37_vm0, %v82_v52, 0.0  ;;  %v108_v55 = vsel %vm37_vm0, %v86_v53, 0.0  ;;  %642 = vpow2.f32 %v553_v13  ;;  %v547_v13 = vld [vmem:[%s1049_s4] ss:$0 sm:$0xff] }
  0xa4   :  { %106 = vadd.xlane.f32.xlu1 %v105_v51  ;;  %97 = vadd.xlane.f32.xlu0 %v96_v54  ;;  %v635_v19 = vpop.eup %634  ;;  %644 = vpow2.f32 %v551_v16 }
  0xa5   :  { %646 = vpow2.f32 %v554_v17  ;;  %v205_v25 = vadd.f32 1.0, %v635_v19 }
  0xa6   :  { %648 = vpow2.f32 %v555_v22 }
  0xa7   :  { %650 = vrcp.f32 %v205_v25 }
  0xa8   :  { %109 = vadd.xlane.f32.xlu1 %v108_v55  ;;  %v637_v23 = vpop.eup %636 }
  0xa9   :  { %v206_v31 = vadd.f32 1.0, %v637_v23 }
  0xaa   :  { %v639_v26 = vpop.eup %638 }
  0xab   :  { %v209_v35 = vadd.f32 1.0, %v639_v26 }
  0xac   :  { %v641_v32 = vpop.eup %640 }
  0xad   :  { %v643_v36 = vpop.eup %642  ;;  %v207_v43 = vadd.f32 1.0, %v641_v32 }
  0xae   :  { %v645_v44 = vpop.eup %644  ;;  %v210_v47 = vadd.f32 1.0, %v643_v36 }
  0xaf   :  { %v647_v50 = vpop.eup %646  ;;  %v208_v55 = vadd.f32 1.0, %v645_v44 }
  0xb0   :  { %v211_v58 = vadd.f32 1.0, %v647_v50  ;;  %v649_v59 = vpop.eup %648 }
  0xb1   :  { %v651_v62 = vpop.eup %650  ;;  %v212_v8 = vadd.f32 1.0, %v649_v59 }
  0xb2   :  { %v229_v19 = vmul.f32 %v651_v62, %v842_v4 }
 0x125   :  { %v89_v24 = vpop.xlane.xlu0 %88 }
 0x126   :  { %v111_v27 = vmul.f32 0.015625, %v89_v24 }
 0x128   :  { %v119_v30 = vadd.f32 1e-05, %v111_v27 }
 0x129   :  { %v101_v33 = vpop.xlane.xlu1 %100  ;;  %v92_v34 = vpop.xlane.xlu0 %91 }
 0x12a   :  { %652 = vrsqrt.f32 %v119_v30  ;;  %v115_v37 = vmul.f32 0.015625, %v101_v33  ;;  %v112_v40 = vmul.f32 0.015625, %v92_v34 }
 0x12b   :  { %654 = vrcp.f32 %v206_v31 }
 0x12c   :  { %v123_v41 = vadd.f32 1e-05, %v115_v37  ;;  %v120_v42 = vadd.f32 1e-05, %v112_v40  ;;  %656 = vrcp.f32 %v209_v35 }
 0x12d   :  { %v104_v45 = vpop.xlane.xlu1 %103  ;;  %v95_v46 = vpop.xlane.xlu0 %94 }
 0x12e   :  { %658 = vrsqrt.f32 %v123_v41  ;;  %v116_v51 = vmul.f32 0.015625, %v104_v45  ;;  %v113_v52 = vmul.f32 0.015625, %v95_v46 }
 0x12f   :  { %660 = vrsqrt.f32 %v120_v42 }
 0x130   :  { %v124_v53 = vadd.f32 1e-05, %v116_v51  ;;  %v121_v54 = vadd.f32 1e-05, %v113_v52  ;;  %662 = vrcp.f32 %v207_v43 }
 0x131   :  { %v107_v56 = vpop.xlane.xlu1 %106  ;;  %v98_v57 = vpop.xlane.xlu0 %97  ;;  %664 = vrcp.f32 %v210_v47 }
 0x132   :  { %666 = vrsqrt.f32 %v124_v53  ;;  %v117_v60 = vmul.f32 0.015625, %v107_v56  ;;  %v114_v61 = vmul.f32 0.015625, %v98_v57 }
 0x133   :  { %668 = vrsqrt.f32 %v121_v54 }
 0x134   :  { %v653_v63 = vpop.eup %652  ;;  %v125_v0 = vadd.f32 1e-05, %v117_v60  ;;  %v122_v1 = vadd.f32 1e-05, %v114_v61  ;;  %670 = vrcp.f32 %v208_v55 }
 0x135   :  { %v110_v3 = vpop.xlane.xlu1 %109  ;;  %v135_v5 = vmul.f32 %v653_v63, %v775_v20  ;;  %672 = vrcp.f32 %v211_v58  ;;  %v655_v9 = vpop.eup %654 }
 0x136   :  { %674 = vrsqrt.f32 %v125_v0  ;;  %v118_v12 = vmul.f32 0.015625, %v110_v3  ;;  %v657_v16 = vpop.eup %656  ;;  %v230_v35 = vmul.f32 %v655_v9, %v848_v6  ;;  %v382_v0 = vld [vmem:[%s1050_s2] sm:$0xff]  ;;  %v387_v3 = vld [vmem:[%s1050_s2 + $0x28] sm:$0xff] }
 0x137   :  { %676 = vrsqrt.f32 %v122_v1  ;;  %v150_v17 = vmul.f32 %v890_v2, %v135_v5  ;;  %v233_v33 = vmul.f32 %v657_v16, %v853_v7 }
 0x138   :  { %v659_v22 = vpop.eup %658  ;;  %v126_v23 = vadd.f32 1e-05, %v118_v12  ;;  %678 = vrcp.f32 %v212_v8  ;;  %v386_v8 = vld [vmem:[%s1050_s2 + $0x20] sm:$0xff] }
 0x139   :  { %v661_v24 = vpop.eup %660  ;;  %v165_v25 = vadd.f32 %v547_v13, %v150_v17  ;;  %v139_v20 = vmul.f32 %v659_v22, %v783_v28 }
 0x13a   :  { %v663_v26 = vpop.eup %662  ;;  %v136_v27 = vmul.f32 %v661_v24, %v777_v21  ;;  %680 = vrsqrt.f32 %v126_v23  ;;  %v385_v23 = vld [vmem:[%s1050_s2 + $0x18] sm:$0xff] }
 0x13b   :  { %v665_v30 = vpop.eup %664  ;;  %v237_v31 = vmul.f32 %v229_v19, %v165_v25  ;;  %v154_v32 = vmul.f32 %v890_v2, %v139_v20  ;;  %v231_v47 = vmul.f32 %v663_v26, %v860_v10  ;;  %v384_v25 = vld [vmem:[%s1050_s2 + $0x10] sm:$0xff] }
 0x13c   :  { %v667_v34 = vpop.eup %666  ;;  %v151_v4 = vmul.f32 %v890_v2, %v136_v27  ;;  %v234_v7 = vmul.f32 %v665_v30, %v865_v11  ;;  %v389_v30 = vld [vmem:[%s1050_s2 + $0x38] sm:$0xff] }
 0x13d   :  { %v669_v36 = vpop.eup %668  ;;  %v140_v37 = vmul.f32 %v667_v34, %v785_v29  ;;  %598 = vmatprep.mubr.msk.f32.mxu0 %vm37_vm0, %v237_v31  ;;  %v169_v28 = vadd.f32 %v547_v13, %v154_v32  ;;  %v388_v32 = vld [vmem:[%s1050_s2 + $0x30] sm:$0xff] }
 0x13e   :  { %v671_v40 = vpop.eup %670  ;;  %v137_v21 = vmul.f32 %v669_v36, %v793_v38  ;;  %v166_v41 = vadd.f32 %v547_v13, %v151_v4 }
 0x13f   :  { %v673_v42 = vpop.eup %672  ;;  %v241_v43 = vmul.f32 %v233_v33, %v169_v28  ;;  %v155_v44 = vmul.f32 %v890_v2, %v140_v37 }
 0x140   :  { %v675_v45 = vpop.eup %674  ;;  %v238_v46 = vmul.f32 %v230_v35, %v166_v41  ;;  %v152_v6 = vmul.f32 %v890_v2, %v137_v21  ;;  %v235_v55 = vmul.f32 %v673_v42, %v877_v15 }
 0x141   :  { %v677_v29 = vpop.eup %676  ;;  %v141_v50 = vmul.f32 %v675_v45, %v795_v39  ;;  %604 = vmatprep.mubr.msk.f32.mxu1 %vm37_vm0, %v241_v43  ;;  %v170_v51 = vadd.f32 %v547_v13, %v155_v44  ;;  %v232_v39 = vmul.f32 %v671_v40, %v872_v14 }
 0x142   :  { %v138_v38 = vmul.f32 %v677_v29, %v803_v48  ;;  %599 = vmatmul.mubr.msk.f32.vlgmr.msra.gmra.mrb[0].mxu0 %vm37_vm0, %v238_v46  ;;  %v167_v52 = vadd.f32 %v547_v13, %v152_v6  ;;  %v679_v53 = vpop.eup %678 }
 0x143   :  { %v242_v54 = vmul.f32 %v234_v7, %v170_v51  ;;  %v156_v11 = vmul.f32 %v890_v2, %v141_v50  ;;  %v236_v62 = vmul.f32 %v679_v53, %v884_v18 }
 0x144   :  { %v681_v56 = vpop.eup %680  ;;  %v239_v57 = vmul.f32 %v231_v47, %v167_v52  ;;  %v153_v10 = vmul.f32 %v890_v2, %v138_v38 }
 0x145   :  { %v142_v58 = vmul.f32 %v681_v56, %v805_v49  ;;  %605 = vmatmul.mubr.msk.f32.vlgmr.msra.gmra.mrb[0].mxu1 %vm37_vm0, %v242_v54  ;;  %v171_v48 = vadd.f32 %v547_v13, %v156_v11  ;;  %v383_v49 = vld [vmem:[%s1050_s2 + $0x8] sm:$0xff] }
 0x146   :  { %601 = vmatprep.mubr.msk.f32.mxu0 %vm37_vm0, %v239_v57  ;;  %v168_v59 = vadd.f32 %v547_v13, %v153_v10 }
 0x147   :  { %v243_v60 = vmul.f32 %v235_v55, %v171_v48  ;;  %v157_v61 = vmul.f32 %v890_v2, %v142_v58 }
 0x148   :  { %v240_v15 = vmul.f32 %v232_v39, %v168_v59 }
 0x149   :  { %607 = vmatprep.mubr.msk.f32.mxu1 %vm37_vm0, %v243_v60  ;;  %v172_v63 = vadd.f32 %v547_v13, %v157_v61 }
 0x14a   :  { %602 = vmatmul.mubr.msk.f32.gmra.mrb[2].mxu0 %vm37_vm0, %v240_v15 }
 0x14b   :  { %v244_v14 = vmul.f32 %v236_v62, %v172_v63 }
 0x14d   :  { %608 = vmatmul.mubr.msk.f32.gmra.mrb[2].mxu1 %vm37_vm0, %v244_v14 }
 0x215   :  { %v600_v1 = vpop.f32.mrb[0].mxu0 }
 0x216   :  { %v391_v18 = vadd.f32 %v600_v1, %v383_v49  ;;  %v343_v2 = vpop.f32.mrb[1].mxu0 }
 0x217   :  { %v390_v5 = vadd.f32 %v382_v0, %v343_v2 }
 0x218   :  { %v606_v9 = vpop.f32.mrb[0].mxu1  ;;  %v402_v12 = vsel %vm398_vm1, %v391_v18, 0.0 }
 0x219   :  { %v395_v13 = vadd.f32 %v606_v9, %v387_v3  ;;  %403 = vadd.xlane.f32.xlu1 %v402_v12  ;;  %v363_v16 = vpop.f32.mrb[1].mxu1  ;;  %v399_v17 = vsel %vm398_vm1, %v390_v5, 0.0 }
 0x21a   :  { %v394_v19 = vadd.f32 %v386_v8, %v363_v16  ;;  %400 = vadd.xlane.f32.xlu0 %v399_v17 }
 0x21b   :  { %v414_v22 = vsel %vm398_vm1, %v395_v13, 0.0 }
 0x21c   :  { %v411_v24 = vsel %vm398_vm1, %v394_v19, 0.0 }
 0x21d   :  { %415 = vadd.xlane.f32.xlu1 %v414_v22  ;;  %v603_v20 = vpop.f32.mrb[2].mxu0 }
 0x21e   :  { %v393_v26 = vadd.f32 %v603_v20, %v385_v23  ;;  %412 = vadd.xlane.f32.xlu0 %v411_v24  ;;  %v353_v27 = vpop.f32.mrb[3].mxu0 }
 0x21f   :  { %v392_v31 = vadd.f32 %v384_v25, %v353_v27 }
 0x220   :  { %v609_v33 = vpop.f32.mrb[2].mxu1  ;;  %v408_v34 = vsel %vm398_vm1, %v393_v26, 0.0 }
 0x221   :  { %v397_v4 = vadd.f32 %v609_v33, %v389_v30  ;;  %409 = vadd.xlane.f32.xlu1 %v408_v34  ;;  %v373_v35 = vpop.f32.mrb[3].mxu1  ;;  %v405_v36 = vsel %vm398_vm1, %v392_v31, 0.0 }
 0x222   :  { %v396_v37 = vadd.f32 %v388_v32, %v373_v35  ;;  %406 = vadd.xlane.f32.xlu0 %v405_v36 }
 0x223   :  { %v420_v28 = vsel %vm398_vm1, %v397_v4, 0.0 }
 0x224   :  { %v417_v40 = vsel %vm398_vm1, %v396_v37, 0.0 }
 0x225   :  { %421 = vadd.xlane.f32.xlu1 %v420_v28 }
 0x226   :  { %418 = vadd.xlane.f32.xlu0 %v417_v40  ;;  %v564_v40 = vld [vmem:[%s1051_s6] ss:$0 sm:$0xff] }
 0x2a6   :  { %v404_v21 = vpop.xlane.xlu1 %403 }
 0x2a7   :  { %v425_v41 = vmul.f32 0.03125, %v404_v21  ;;  %v401_v42 = vpop.xlane.xlu0 %400 }
 0x2a8   :  { %v424_v43 = vmul.f32 0.03125, %v401_v42 }
 0x2a9   :  { %v959_v44 = vsub.f32 %v391_v18, %v425_v41 }
 0x2aa   :  { %v961_v7 = vsub.f32 %v390_v5, %v424_v43  ;;  %v416_v45 = vpop.xlane.xlu1 %415 }
 0x2ab   :  { %v429_v46 = vmul.f32 0.03125, %v416_v45  ;;  %v413_v6 = vpop.xlane.xlu0 %412  ;;  %v441_v47 = vmul.f32 %v959_v44, %v959_v44  ;;  %v565_v45 = vld [vmem:[%s1052_s7] ss:$0 sm:$0xff] }
 0x2ac   :  { %v428_v29 = vmul.f32 0.03125, %v413_v6  ;;  %v440_v50 = vmul.f32 %v961_v7, %v961_v7 }
 0x2ad   :  { %v967_v51 = vsub.f32 %v395_v13, %v429_v46  ;;  %v451_v38 = vsel %vm398_vm1, %v441_v47, 0.0 }
 0x2ae   :  { %v970_v52 = vsub.f32 %v394_v19, %v428_v29  ;;  %452 = vadd.xlane.f32.xlu1 %v451_v38  ;;  %v410_v53 = vpop.xlane.xlu1 %409  ;;  %v448_v54 = vsel %vm398_vm1, %v440_v50, 0.0 }
 0x2af   :  { %v427_v11 = vmul.f32 0.03125, %v410_v53  ;;  %449 = vadd.xlane.f32.xlu0 %v448_v54  ;;  %v407_v55 = vpop.xlane.xlu0 %406  ;;  %v445_v56 = vmul.f32 %v967_v51, %v967_v51 }
 0x2b0   :  { %v426_v57 = vmul.f32 0.03125, %v407_v55  ;;  %v444_v10 = vmul.f32 %v970_v52, %v970_v52 }
 0x2b1   :  { %v977_v39 = vsub.f32 %v393_v26, %v427_v11  ;;  %v463_v58 = vsel %vm398_vm1, %v445_v56, 0.0 }
 0x2b2   :  { %v980_v48 = vsub.f32 %v392_v31, %v426_v57  ;;  %464 = vadd.xlane.f32.xlu1 %v463_v58  ;;  %v422_v59 = vpop.xlane.xlu1 %421  ;;  %v460_v60 = vsel %vm398_vm1, %v444_v10, 0.0 }
 0x2b3   :  { %v431_v61 = vmul.f32 0.03125, %v422_v59  ;;  %461 = vadd.xlane.f32.xlu0 %v460_v60  ;;  %v419_v62 = vpop.xlane.xlu0 %418  ;;  %v443_v15 = vmul.f32 %v977_v39, %v977_v39 }
 0x2b4   :  { %v430_v63 = vmul.f32 0.03125, %v419_v62  ;;  %v442_v14 = vmul.f32 %v980_v48, %v980_v48 }
 0x2b5   :  { %v987_v49 = vsub.f32 %v397_v4, %v431_v61  ;;  %v457_v0 = vsel %vm398_vm1, %v443_v15, 0.0 }
 0x2b6   :  { %v990_v1 = vsub.f32 %v396_v37, %v430_v63  ;;  %458 = vadd.xlane.f32.xlu1 %v457_v0  ;;  %v454_v18 = vsel %vm398_vm1, %v442_v14, 0.0 }
 0x2b7   :  { %455 = vadd.xlane.f32.xlu0 %v454_v18  ;;  %v447_v2 = vmul.f32 %v987_v49, %v987_v49 }
 0x2b8   :  { %v446_v3 = vmul.f32 %v990_v1, %v990_v1 }
 0x2b9   :  { %v469_v5 = vsel %vm398_vm1, %v447_v2, 0.0 }
 0x2ba   :  { %470 = vadd.xlane.f32.xlu1 %v469_v5  ;;  %v466_v8 = vsel %vm398_vm1, %v446_v3, 0.0 }
 0x2bb   :  { %467 = vadd.xlane.f32.xlu0 %v466_v8 }
 0x33b   :  { %v453_v9 = vpop.xlane.xlu1 %452 }
 0x33c   :  { %v473_v12 = vmul.f32 0.03125, %v453_v9  ;;  %v450_v13 = vpop.xlane.xlu0 %449 }
 0x33d   :  { %v472_v16 = vmul.f32 0.03125, %v450_v13 }
 0x33e   :  { %v481_v17 = vadd.f32 1e-05, %v473_v12 }
 0x33f   :  { %v480_v19 = vadd.f32 1e-05, %v472_v16  ;;  %v465_v22 = vpop.xlane.xlu1 %464 }
 0x340   :  { %682 = vrsqrt.f32 %v481_v17  ;;  %v477_v23 = vmul.f32 0.03125, %v465_v22  ;;  %v462_v24 = vpop.xlane.xlu0 %461 }
 0x341   :  { %684 = vrsqrt.f32 %v480_v19  ;;  %v476_v25 = vmul.f32 0.03125, %v462_v24 }
 0x342   :  { %v485_v20 = vadd.f32 1e-05, %v477_v23 }
 0x343   :  { %v484_v26 = vadd.f32 1e-05, %v476_v25  ;;  %v459_v27 = vpop.xlane.xlu1 %458 }
 0x344   :  { %686 = vrsqrt.f32 %v485_v20  ;;  %v475_v30 = vmul.f32 0.03125, %v459_v27  ;;  %v456_v31 = vpop.xlane.xlu0 %455 }
 0x345   :  { %688 = vrsqrt.f32 %v484_v26  ;;  %v474_v32 = vmul.f32 0.03125, %v456_v31 }
 0x346   :  { %v483_v33 = vadd.f32 1e-05, %v475_v30 }
 0x347   :  { %v482_v34 = vadd.f32 1e-05, %v474_v32  ;;  %v471_v4 = vpop.xlane.xlu1 %470 }
 0x348   :  { %690 = vrsqrt.f32 %v483_v33  ;;  %v479_v35 = vmul.f32 0.03125, %v471_v4  ;;  %v468_v36 = vpop.xlane.xlu0 %467 }
 0x349   :  { %692 = vrsqrt.f32 %v482_v34  ;;  %v478_v37 = vmul.f32 0.03125, %v468_v36 }
 0x34a   :  { %v683_v28 = vpop.eup %682  ;;  %v487_v21 = vadd.f32 1e-05, %v479_v35 }
 0x34b   :  { %v685_v41 = vpop.eup %684  ;;  %v497_v42 = vmul.f32 %v683_v28, %v959_v44  ;;  %v486_v43 = vadd.f32 1e-05, %v478_v37 }
 0x34c   :  { %v496_v46 = vmul.f32 %v685_v41, %v961_v7  ;;  %694 = vrsqrt.f32 %v487_v21 }
 0x34d   :  { %v512_v6 = vmul.f32 %v564_v40, %v497_v42  ;;  %696 = vrsqrt.f32 %v486_v43 }
 0x34e   :  { %v687_v47 = vpop.eup %686  ;;  %v511_v29 = vmul.f32 %v564_v40, %v496_v46 }
 0x34f   :  { %v689_v50 = vpop.eup %688  ;;  %v527_v38 = vadd.f32 %v565_v45, %v512_v6  ;;  %v501_v53 = vmul.f32 %v687_v47, %v967_v51 }
 0x350   :  { %v526_v54 = vadd.f32 %v565_v45, %v511_v29  ;;  %v500_v11 = vmul.f32 %v689_v50, %v970_v52 }
 0x351   :  { %535 = vst.msk [vmem:[%s1053_s8 + $0x8] sm:$0xff] %vm398_vm1, %v527_v38  ;;  %v516_v44 = vmul.f32 %v564_v40, %v501_v53 }
 0x352   :  { %v691_v55 = vpop.eup %690  ;;  %534 = vst.msk [vmem:[%s1053_s8] sm:$0xff] %vm398_vm1, %v526_v54  ;;  %v515_v7 = vmul.f32 %v564_v40, %v500_v11 }
 0x353   :  { %v693_v56 = vpop.eup %692  ;;  %v531_v57 = vadd.f32 %v565_v45, %v516_v44  ;;  %v499_v51 = vmul.f32 %v691_v55, %v977_v39 }
 0x354   :  { %v530_v10 = vadd.f32 %v565_v45, %v515_v7  ;;  %v498_v52 = vmul.f32 %v693_v56, %v980_v48 }
 0x355   :  { %539 = vst.msk [vmem:[%s1053_s8 + $0x28] sm:$0xff] %vm398_vm1, %v531_v57  ;;  %v514_v58 = vmul.f32 %v564_v40, %v499_v51 }
 0x356   :  { %v695_v59 = vpop.eup %694  ;;  %538 = vst.msk [vmem:[%s1053_s8 + $0x20] sm:$0xff] %vm398_vm1, %v530_v10  ;;  %v513_v60 = vmul.f32 %v564_v40, %v498_v52 }
 0x357   :  { %v697_v61 = vpop.eup %696  ;;  %v529_v62 = vadd.f32 %v565_v45, %v514_v58  ;;  %v503_v39 = vmul.f32 %v695_v59, %v987_v49 }
 0x358   :  { %v528_v15 = vadd.f32 %v565_v45, %v513_v60  ;;  %v502_v48 = vmul.f32 %v697_v61, %v990_v1 }
 0x359   :  { %537 = vst.msk [vmem:[%s1053_s8 + $0x18] sm:$0xff] %vm398_vm1, %v529_v62  ;;  %v518_v63 = vmul.f32 %v564_v40, %v503_v39 }
 0x35a   :  { %536 = vst.msk [vmem:[%s1053_s8 + $0x10] sm:$0xff] %vm398_vm1, %v528_v15  ;;  %v517_v14 = vmul.f32 %v564_v40, %v502_v48 }
 0x35b   :  { %v533_v0 = vadd.f32 %v565_v45, %v518_v63 }
 0x35c   :  { %v532_v18 = vadd.f32 %v565_v45, %v517_v14 }
 0x35d   :  { %541 = vst.msk [vmem:[%s1053_s8 + $0x38] sm:$0xff] %vm398_vm1, %v533_v0 }
 0x35e   :  { %540 = vst.msk [vmem:[%s1053_s8 + $0x30] sm:$0xff] %vm398_vm1, %v532_v18 }

// kernel: tree_mamba_forward.11
= control target key start
LH: loop header
LB: loop body
LE: loop exit
PB: predicated region body
PF: predicated region fallthrough
CT: control target
= control target key end

     0   :  { %10 = vsyncpa [#allocation3], 0  ;;  %v227_v3 = vmov 0.0|0.0   ;;  %vm228_vm0 = vmmov 0   ;;  %v229_v6 = vmov 0.0   ;;  %s303_s0 = inlined_call_operand.vmem [shape: f32[2,32], index: 0, kind: input, shape index: {}]   ;;  %s304_s1 = inlined_call_operand.vmem [shape: f32[32,4], index: 1, kind: input, shape index: {}]   ;;  %s305_s2 = inlined_call_operand.vmem [shape: f32[1,4], index: 2, kind: input, shape index: {}]   ;;  %s306_s3 = inlined_call_operand.hbm [shape: f32[2,4], index: 3, kind: output, shape index: {0}]   ;;  %s307_s4 = inlined_call_operand.hbm [shape: f32[2,4], index: 4, kind: output, shape index: {1}]  }
   0x1   :  { %v19_v0 = vld [vmem:[%s304_s1] sm:$0xff]  ;;  %v20_v1 = vld [vmem:[%s304_s1 + $0x8] sm:$0xff]  ;;  %v21_v2 = vld [vmem:[%s304_s1 + $0x10] sm:$0xff]  ;;  %164 = vmatprep.subr.bf16.mxu0 %v227_v3  ;;  %161 = vmatprep.mubr.msk.f32.mxu0 %vm228_vm0, %v229_v6 }
   0x2   :  { %v165_v4 = vpack.c.bf16 %v20_v1, %v19_v0  ;;  %v22_v5 = vld [vmem:[%s304_s1 + $0x18] sm:$0xff] }
   0x3   :  { %11 = vsyncpa [#allocation5], 0  ;;  %v168_v7 = vpack.c.bf16 %v22_v5, %v21_v2  ;;  %v18_v8 = vld [vmem:[%s303_s0] sm:$0x3]  ;;  %vm30_vm1 = vcmask 261120   ;;  %vm104_vm2 = vcmask 25600  }
   0x4   :  { %166 = vmatpush3.bf16.msra.mxu0 %v165_v4  ;;  %v146_v9 = vld [vmem:[%s305_s2] ss:$0 sm:$0xff]  ;;  %s230_s0 = smov [#allocation2]  }
   0x5   :  { %167 = vmatprep.subr.bf16.mxu0 %v227_v3  ;;  %s124_s1 = sshll.u32 %s230_s0, 4  ;;  %s125_s1 = int_to_ptr.vmem [resolvable:$true] %s124_s1 }
   0x6   :  { %s179_s2 = scalar_lea.vmem %s125_s1, 32  ;;  %p184_p1 = scmp.lt.s32.totalorder %s125_s1, %s125_s1 }
   0x7   :  { %p180_p0 = scmp.ne.s32.totalorder %s125_s1, %s179_s2  ;;  %p185_p2 = scmp.lt.s32.totalorder %s179_s2, %s179_s2 }
   0x8   :  { %169 = vmatpush3.bf16.msra.mxu0 %v168_v7 }
   0x9   :  { %p186_p3 = por %p185_p2, %p184_p1 }
   0xb   :  { %162 = vmatmul.mubr.msk.f32.vlgmr.msra.gmra.mrb[0].mxu0 %vm30_vm1, %v18_v8  ;;  %p187_p4 = pnand %p186_p3, %p180_p0 }
  0xde   :  { %v100_v10 = vpop.f32.mrb[0].mxu0 }
  0xdf   :  { %v101_v11 = vadd.f32 %v146_v9, %v100_v10  ;;  %v163_v12 = vpop.f32.mrb[1].mxu0 }
  0xe1   :  { %v106_v13 = vsel %vm104_vm2, %v101_v11, -inf  ;;  %105 = vst.msk [vmem:[#allocation2] sm:$0x3] %vm104_vm2, %v101_v11 }
  0xe2   :  { %107 = vmax.xlane.f32.xlu0 %v106_v13 }
 0x16f   :  { %v108_v14 = vpop.xlane.xlu0 %107 }
 0x170   :  { %v109_v15 = vsub.f32 %v101_v11, %v108_v14 }
 0x172   :  { %v110_v16 = vmul.f32 1.442695, %v109_v15 }
 0x174   :  { %175 = vpow2.f32 %v110_v16 }
 0x17e   :  { %v176_v17 = vpop.eup %175 }
 0x17f   :  { %v112_v18 = vsel %vm104_vm2, %v176_v17, 0.0 }
 0x180   :  { %113 = vadd.xlane.f32.xlu0 %v112_v18 }
 0x181   :  { %190 = shalt.err (!%p187_p4)
}
 0x182   :  { %s191_s29 = scalar_lea.hbm %s306_s3, 32 }
 0x183   :  { %p192_p5 = scmp.ne.s32.totalorder %s306_s3, %s191_s29  ;;  %p195_p6 = scmp.lt.u32.totalorder %s191_s29, %s306_s3 }
 0x185   :  { %p197_p7 = pnand %p195_p6, %p192_p5 }
 0x187   :  { %200 = shalt.err (!%p197_p7)
}
 0x188   :  { %127 = dma.vmem_to_hbm [thread:$0]  %s125_s1, 32, %s306_s3, [#allocation3]  }
 0x189   :  { %s231_s10 = smov [#allocation4]  }
 0x18a   :  { %s134_s11 = sshll.u32 %s231_s10, 4  ;;  %s135_s11 = int_to_ptr.vmem [resolvable:$true] %s134_s11 }
 0x18b   :  { %s201_s12 = scalar_lea.vmem %s135_s11, 32  ;;  %p206_p9 = scmp.lt.s32.totalorder %s135_s11, %s135_s11 }
 0x18c   :  { %p202_p8 = scmp.ne.s32.totalorder %s135_s11, %s201_s12  ;;  %p207_p10 = scmp.lt.s32.totalorder %s201_s12, %s201_s12 }
 0x18e   :  { %p208_p11 = por %p207_p10, %p206_p9 }
 0x190   :  { %p209_p12 = pnand %p208_p11, %p202_p8 }
 0x20d   :  { %v114_v19 = vpop.xlane.xlu0 %113 }
 0x20e   :  { %177 = vrcp.f32 %v114_v19 }
 0x218   :  { %v178_v20 = vpop.eup %177 }
 0x219   :  { %v116_v21 = vmul.f32 %v178_v20, %v176_v17 }
 0x21b   :  { %117 = vst.msk [vmem:[#allocation4] sm:$0x3] %vm104_vm2, %v116_v21 }
 0x21c   :  { %212 = shalt.err (!%p209_p12)
}
 0x21d   :  { %s213_s3 = scalar_lea.hbm %s307_s4, 32 }
 0x21e   :  { %p214_p13 = scmp.ne.s32.totalorder %s307_s4, %s213_s3  ;;  %p217_p0 = scmp.lt.u32.totalorder %s213_s3, %s307_s4 }
 0x220   :  { %p219_p1 = pnand %p217_p0, %p214_p13 }
 0x222   :  { %222 = shalt.err (!%p219_p1)
}
 0x223   :  { %137 = dma.vmem_to_hbm [thread:$0]  %s135_s11, 32, %s307_s4, [#allocation5]  }
 0x224   :  { %223 = dma.done.wait [#allocation3], 32  }
 0x225   :  { %224 = vsyncadd [#allocation3], 4294967264 }
 0x226   :  { %225 = dma.done.wait [#allocation5], 32  }
 0x227   :  { %226 = vsyncadd [#allocation5], 4294967264 }
 0x228   :  { %144 = vsyncpa [#allocation3], 1 }
 0x229   :  { %145 = vsyncpa [#allocation5], 1 }

// kernel: tree_mamba_forward.10
= control target key start
LH: loop header
LB: loop body
LE: loop exit
PB: predicated region body
PF: predicated region fallthrough
CT: control target
= control target key end

     0   :  { %v262_v3 = vmov 0.0|0.0   ;;  %vm263_vm0 = vmmov 0   ;;  %v264_v6 = vmov 0.0   ;;  %s325_s0 = inlined_call_operand.vmem [shape: f32[8,32], index: 0, kind: input, shape index: {}]   ;;  %s326_s1 = inlined_call_operand.vmem [shape: f32[32,32], index: 1, kind: input, shape index: {}]   ;;  %s327_s2 = inlined_call_operand.vmem [shape: f32[32,64], index: 2, kind: input, shape index: {}]   ;;  %s328_s3 = inlined_call_operand.hbm [shape: f32[8,64], index: 3, kind: output, shape index: {}]  }
   0x1   :  { %v16_v0 = vld [vmem:[%s326_s1] sm:$0xff]  ;;  %v17_v1 = vld [vmem:[%s326_s1 + $0x8] sm:$0xff]  ;;  %v18_v2 = vld [vmem:[%s326_s1 + $0x10] sm:$0xff]  ;;  %222 = vmatprep.subr.bf16.mxu0 %v262_v3  ;;  %208 = vmatprep.mubr.msk.f32.mxu0 %vm263_vm0, %v264_v6 }
   0x2   :  { %v223_v4 = vpack.c.bf16 %v17_v1, %v16_v0  ;;  %v19_v5 = vld [vmem:[%s326_s1 + $0x18] sm:$0xff]  ;;  %v95_v7 = vld [vmem:[%s327_s2] sm:$0xff]  ;;  %228 = vmatprep.subr.bf16.mxu1 %v262_v3  ;;  %v96_v8 = vld [vmem:[%s327_s2 + $0x8] sm:$0xff]  ;;  %219 = vmatprep.mubr.msk.f32.mxu1 %vm263_vm0, %v264_v6 }
   0x3   :  { %8 = vsyncpa [#allocation3], 0  ;;  %v226_v9 = vpack.c.bf16 %v19_v5, %v18_v2  ;;  %v229_v10 = vpack.c.bf16 %v96_v8, %v95_v7  ;;  %v15_v11 = vld [vmem:[%s325_s0] sm:$0xff]  ;;  %vm20_vm1 = vcmask 261120   ;;  %v97_v12 = vld [vmem:[%s327_s2 + $0x10] sm:$0xff]  ;;  %s265_s29 = smov [#allocation2]  }
   0x4   :  { %224 = vmatpush3.bf16.msra.mxu0 %v223_v4  ;;  %v98_v13 = vld [vmem:[%s327_s2 + $0x18] sm:$0xff]  ;;  %s180_s30 = sshll.u32 %s265_s29, 4  ;;  %vm172_vm2 = vcmask 523264   ;;  %s181_s30 = int_to_ptr.vmem [resolvable:$true] %s180_s30 }
   0x5   :  { %225 = vmatprep.subr.bf16.mxu0 %v262_v3  ;;  %230 = vmatpush3.bf16.msra.mxu1 %v229_v10  ;;  %v232_v14 = vpack.c.bf16 %v98_v13, %v97_v12  ;;  %s238_s0 = scalar_lea.vmem %s181_s30, 128  ;;  %p243_p1 = scmp.lt.s32.totalorder %s181_s30, %s181_s30 }
   0x6   :  { %231 = vmatprep.subr.bf16.mxu1 %v262_v3  ;;  %p239_p0 = scmp.ne.s32.totalorder %s181_s30, %s238_s0  ;;  %p244_p2 = scmp.lt.s32.totalorder %s238_s0, %s238_s0 }
   0x8   :  { %227 = vmatpush3.bf16.msra.mxu0 %v226_v9  ;;  %p245_p3 = por %p244_p2, %p243_p1 }
   0x9   :  { %233 = vmatpush3.bf16.msra.mxu1 %v232_v14 }
   0xa   :  { %p246_p4 = pnand %p245_p3, %p239_p0 }
   0xb   :  { %209 = vmatmul.mubr.msk.f32.vlgmr.msra.gmra.mrb[0].mxu0 %vm20_vm1, %v15_v11 }
  0xde   :  { %v90_v15 = vpop.f32.mrb[0].mxu0 }
  0xdf   :  { %v94_v16 = vmax.f32 %v90_v15, 0.0  ;;  %v210_v17 = vpop.f32.mrb[1].mxu0 }
  0xe1   :  { %220 = vmatmul.mubr.msk.f32.vlgmr.msra.gmra.mrb[0].mxu1 %vm20_vm1, %v94_v16 }
 0x1b4   :  { %v168_v18 = vpop.f32.mrb[0].mxu1 }
 0x1b5   :  { %173 = vst.msk [vmem:[#allocation2] sm:$0xff] %vm172_vm2, %v168_v18  ;;  %v221_v19 = vpop.f32.mrb[1].mxu1 }
 0x1b6   :  { %249 = shalt.err (!%p246_p4)
}
 0x1b7   :  { %s250_s5 = scalar_lea.hbm %s328_s3, 128 }
 0x1b8   :  { %p251_p5 = scmp.ne.s32.totalorder %s328_s3, %s250_s5  ;;  %p254_p6 = scmp.lt.u32.totalorder %s250_s5, %s328_s3 }
 0x1ba   :  { %p256_p7 = pnand %p254_p6, %p251_p5 }
 0x1bc   :  { %259 = shalt.err (!%p256_p7)
}
 0x1bd   :  { %183 = dma.vmem_to_hbm [thread:$0]  %s181_s30, 128, %s328_s3, [#allocation3]  }
 0x1be   :  { %260 = dma.done.wait [#allocation3], 128  }
 0x1bf   :  { %261 = vsyncadd [#allocation3], 4294967168 }
 0x1c0   :  { %187 = vsyncpa [#allocation3], 1 }

// kernel: tree_mamba_forward.7
= control target key start
LH: loop header
LB: loop body
LE: loop exit
PB: predicated region body
PF: predicated region fallthrough
CT: control target
= control target key end

     0   :  { %s4099_s30 = smov 0   ;;  %s6751_s0 = inlined_call_operand.vmem [shape: f32[2,8,256], index: 0, kind: input, shape index: {}]   ;;  %s6752_s1 = inlined_call_operand.vmem [shape: f32[3,256], index: 1, kind: input, shape index: {}]   ;;  %s6753_s2 = inlined_call_operand.vmem [shape: f32[1,256], index: 2, kind: input, shape index: {}]   ;;  %s6754_s3 = inlined_call_operand.vmem [shape: f32[256,256], index: 3, kind: input, shape index: {}]   ;;  %s6755_s4 = inlined_call_operand.vmem [shape: f32[1,256], index: 4, kind: input, shape index: {}]   ;;  %s6756_s5 = inlined_call_operand.vmem [shape: f32[4,256,256], index: 5, kind: input, shape index: {}]   ;;  %s6757_s6 = inlined_call_operand.vmem [shape: f32[4,256,256], index: 6, kind: input, shape index: {}]   ;;  %s6758_s7 = inlined_call_operand.vmem [shape: f32[4,1,256], index: 7, kind: input, shape index: {}]   ;;  %s6759_s8 = inlined_call_operand.vmem [shape: f32[1,256], index: 8, kind: input, shape index: {}]   ;;  %s6760_s9 = inlined_call_operand.vmem [shape: f32[2,8,256], index: 9, kind: output, shape index: {}]  }
   0x1 LB: > { %s2965_s10 = sadd.s32 4294967295, %s4045_s30   ;;  %p2969_p0 = scmp.ge.s32.totalorder %s4045_s30, 1  ;;  %s4045_s30 = sphi %s4099_s30, %s19_s30  }
   0x2   : > { %p287_p1 = scmp.lt.s32.totalorder %s4045_s30, 3 }
   0x4   : > { %p288_p2 = pnand %p2969_p0, %p287_p1 }
   0x6   : > { %291 = sbr.rel (%p288_p2) target bundleno = 615 (0x267), region = 56 }
   0xd   : > { %v491_v0 = vld [vmem:[%s6754_s3 + $0x8] sm:$0xff]  ;;  %v493_v1 = vld [vmem:[%s6754_s3 + $0x18] sm:$0xff]  ;;  %v335_v3 = vlaneseq  ;;  %v490_v6 = vld [vmem:[%s6754_s3] sm:$0xff]  ;;  %v6772_v13 = vmov 0  ;;  %v4047_v18 = vmov 0.0   ;;  %p4322_p3 = scmp.lt.s32.totalorder %s2965_s10, 1 }
   0xe   : > { %v666_v2 = vld [vmem:[%s6756_s5 + $0x8] sm:$0xff]  ;;  %v3371_v4 = vpack.c.bf16 %v493_v1, %v491_v0  ;;  %v668_v5 = vld [vmem:[%s6756_s5 + $0x18] sm:$0xff]  ;;  %v492_v7 = vld [vmem:[%s6754_s3 + $0x10] sm:$0xff]  ;;  %vm408_vm1 = vcmask 1046528   ;;  %vm449_vm2 = vcmask 1045504   ;;  %vm1867_vm7 = vcmask 1040384  }
   0xf   : > { %v3435_v8 = vpack.c.bf16 %v668_v5, %v666_v2  ;;  %v3373_v9 = vpack.c.bf16 %v492_v7, %v490_v6  ;;  %v665_v10 = vld [vmem:[%s6756_s5] sm:$0xff]  ;;  %v667_v11 = vld [vmem:[%s6756_s5 + $0x10] sm:$0xff]  ;;  %v495_v12 = vld [vmem:[%s6754_s3 + $0x28] sm:$0xff]  ;;  %vm4135_vm0 = vcmp.lt.s32.totalorder %v335_v3, 256  ;;  %s6810_s10 = smov (!%p4322_p3, %s2965_s10), 1 }
  0x10   : > { %v6773_v13 = vsel %vm4135_vm0, 4294967295, %v6772_v13  ;;  %3372 = vmatprep.subr.bf16.mxu0 %v3371_v4  ;;  %v3437_v14 = vpack.c.bf16 %v667_v11, %v665_v10  ;;  %v497_v15 = vld [vmem:[%s6754_s3 + $0x38] sm:$0xff]  ;;  %v670_v16 = vld [vmem:[%s6756_s5 + $0x28] sm:$0xff]  ;;  %339 = vst.msk [vmem:[#allocation2] ss:$8 sm:$0x3] %vm4135_vm0, %v4047_v18 }
  0x11   : > { %6774 = vst [vmem:[#allocation7_spill] sm:$0xff] %v6773_v13  ;;  %v672_v17 = vld [vmem:[%s6756_s5 + $0x38] sm:$0xff]  ;;  %342 = vst.msk [vmem:[#allocation2 + $0x11] ss:$8 sm:$0x3] %vm4135_vm0, %v4047_v18  ;;  %3436 = vmatprep.subr.bf16.mxu1 %v3435_v8  ;;  %3374 = vmatpush1.bf16.msra.mxu0 %v3373_v9  ;;  %v3375_v19 = vpack.c.bf16 %v497_v15, %v495_v12  ;;  %v494_v21 = vld [vmem:[%s6754_s3 + $0x20] sm:$0xff] }
  0x12   : > { %v3439_v20 = vpack.c.bf16 %v672_v17, %v670_v16  ;;  %v496_v22 = vld [vmem:[%s6754_s3 + $0x30] sm:$0xff]  ;;  %v669_v23 = vld [vmem:[%s6756_s5 + $0x20] sm:$0xff]  ;;  %3438 = vmatpush1.bf16.msra.mxu1 %v3437_v14  ;;  %v499_v26 = vld [vmem:[%s6754_s3 + $0x48] sm:$0xff]  ;;  %s3369_s28 = sshll.u32 %s6810_s10, 4 }
  0x13   : > { %v3377_v24 = vpack.c.bf16 %v496_v22, %v494_v21  ;;  %v671_v25 = vld [vmem:[%s6756_s5 + $0x30] sm:$0xff]  ;;  %v501_v27 = vld [vmem:[%s6754_s3 + $0x58] sm:$0xff]  ;;  %3376 = vmatprep.subr.bf16.mxu0 %v3375_v19  ;;  %v674_v30 = vld [vmem:[%s6756_s5 + $0x48] sm:$0xff]  ;;  %s327_s29 = scalar_lea.vmem %s6751_s0, %s3369_s28  ;;  %s6659_s25 = scalar_lea.vmem %s6760_s9, %s3369_s28 }
  0x14   : > { %3440 = vmatprep.subr.bf16.mxu1 %v3439_v20  ;;  %v3441_v28 = vpack.c.bf16 %v671_v25, %v669_v23  ;;  %v3379_v29 = vpack.c.bf16 %v501_v27, %v499_v26  ;;  %v676_v31 = vld [vmem:[%s6756_s5 + $0x58] sm:$0xff]  ;;  %v498_v32 = vld [vmem:[%s6754_s3 + $0x40] sm:$0xff]  ;;  %v500_v34 = vld [vmem:[%s6754_s3 + $0x50] sm:$0xff] }
  0x15   : > { %v3443_v33 = vpack.c.bf16 %v676_v31, %v674_v30  ;;  %v673_v35 = vld [vmem:[%s6756_s5 + $0x40] sm:$0xff]  ;;  %v675_v36 = vld [vmem:[%s6756_s5 + $0x50] sm:$0xff]  ;;  %3378 = vmatpush1.bf16.msra.mxu0 %v3377_v24  ;;  %v3381_v37 = vpack.c.bf16 %v500_v34, %v498_v32  ;;  %v503_v38 = vld [vmem:[%s6754_s3 + $0x68] sm:$0xff] }
  0x16   : > { %v505_v39 = vld [vmem:[%s6754_s3 + $0x78] sm:$0xff]  ;;  %v678_v40 = vld [vmem:[%s6756_s5 + $0x68] sm:$0xff]  ;;  %3442 = vmatpush1.bf16.msra.mxu1 %v3441_v28  ;;  %3380 = vmatprep.subr.bf16.mxu0 %v3379_v29  ;;  %v3445_v41 = vpack.c.bf16 %v675_v36, %v673_v35  ;;  %v502_v44 = vld [vmem:[%s6754_s3 + $0x60] sm:$0xff] }
  0x17   : > { %v3383_v42 = vpack.c.bf16 %v505_v39, %v503_v38  ;;  %v680_v43 = vld [vmem:[%s6756_s5 + $0x78] sm:$0xff]  ;;  %v504_v45 = vld [vmem:[%s6754_s3 + $0x70] sm:$0xff]  ;;  %3444 = vmatprep.subr.bf16.mxu1 %v3443_v33  ;;  %v677_v47 = vld [vmem:[%s6756_s5 + $0x60] sm:$0xff] }
  0x18   : > { %v3447_v46 = vpack.c.bf16 %v680_v43, %v678_v40  ;;  %v679_v48 = vld [vmem:[%s6756_s5 + $0x70] sm:$0xff]  ;;  %v507_v49 = vld [vmem:[%s6754_s3 + $0x88] sm:$0xff]  ;;  %v509_v50 = vld [vmem:[%s6754_s3 + $0x98] sm:$0xff]  ;;  %v3385_v53 = vpack.c.bf16 %v504_v45, %v502_v44 }
  0x19   : > { %v682_v51 = vld [vmem:[%s6756_s5 + $0x88] sm:$0xff]  ;;  %v684_v52 = vld [vmem:[%s6756_s5 + $0x98] sm:$0xff]  ;;  %3382 = vmatpush1.bf16.msra.mxu0 %v3381_v37  ;;  %v3449_v54 = vpack.c.bf16 %v679_v48, %v677_v47  ;;  %v3387_v55 = vpack.c.bf16 %v509_v50, %v507_v49  ;;  %v506_v56 = vld [vmem:[%s6754_s3 + $0x80] sm:$0xff] }
  0x1a   : > { %3446 = vmatpush1.bf16.msra.mxu1 %v3445_v41  ;;  %3384 = vmatprep.subr.bf16.mxu0 %v3383_v42  ;;  %v508_v57 = vld [vmem:[%s6754_s3 + $0x90] sm:$0xff]  ;;  %v681_v58 = vld [vmem:[%s6756_s5 + $0x80] sm:$0xff]  ;;  %v3451_v59 = vpack.c.bf16 %v684_v52, %v682_v51  ;;  %v511_v61 = vld [vmem:[%s6754_s3 + $0xa8] sm:$0xff] }
  0x1b   : > { %3448 = vmatprep.subr.bf16.mxu1 %v3447_v46  ;;  %v683_v60 = vld [vmem:[%s6756_s5 + $0x90] sm:$0xff]  ;;  %v513_v62 = vld [vmem:[%s6754_s3 + $0xb8] sm:$0xff]  ;;  %v686_v63 = vld [vmem:[%s6756_s5 + $0xa8] sm:$0xff]  ;;  %v3389_v1 = vpack.c.bf16 %v508_v57, %v506_v56 }
  0x1c   : > { %v688_v0 = vld [vmem:[%s6756_s5 + $0xb8] sm:$0xff]  ;;  %v3453_v2 = vpack.c.bf16 %v683_v60, %v681_v58  ;;  %v3391_v4 = vpack.c.bf16 %v513_v62, %v511_v61  ;;  %v510_v5 = vld [vmem:[%s6754_s3 + $0xa0] sm:$0xff]  ;;  %v512_v6 = vld [vmem:[%s6754_s3 + $0xb0] sm:$0xff] }
  0x1d   : > { %3386 = vmatpush1.bf16.msra.mxu0 %v3385_v53  ;;  %v685_v7 = vld [vmem:[%s6756_s5 + $0xa0] sm:$0xff]  ;;  %v3455_v8 = vpack.c.bf16 %v688_v0, %v686_v63  ;;  %v687_v9 = vld [vmem:[%s6756_s5 + $0xb0] sm:$0xff]  ;;  %v515_v10 = vld [vmem:[%s6754_s3 + $0xc8] sm:$0xff]  ;;  %v3393_v15 = vpack.c.bf16 %v512_v6, %v510_v5  ;;  %v4391_v6 = vshrl.u32 %v335_v3, 7 }
  0x1e   : > { %3450 = vmatpush1.bf16.msra.mxu1 %v3449_v54  ;;  %3388 = vmatprep.subr.bf16.mxu0 %v3387_v55  ;;  %v517_v11 = vld [vmem:[%s6754_s3 + $0xd8] sm:$0xff]  ;;  %v690_v12 = vld [vmem:[%s6756_s5 + $0xc8] sm:$0xff]  ;;  %v3457_v16 = vpack.c.bf16 %v687_v9, %v685_v7  ;;  %v514_v18 = vld [vmem:[%s6754_s3 + $0xc0] sm:$0xff] }
  0x1f   : > { %3452 = vmatprep.subr.bf16.mxu1 %v3451_v59  ;;  %v692_v14 = vld [vmem:[%s6756_s5 + $0xd8] sm:$0xff]  ;;  %v3395_v17 = vpack.c.bf16 %v517_v11, %v515_v10  ;;  %v516_v19 = vld [vmem:[%s6754_s3 + $0xd0] sm:$0xff]  ;;  %v689_v20 = vld [vmem:[%s6756_s5 + $0xc0] sm:$0xff] }
  0x20   : > { %v3459_v21 = vpack.c.bf16 %v692_v14, %v690_v12  ;;  %v691_v22 = vld [vmem:[%s6756_s5 + $0xd0] sm:$0xff]  ;;  %v519_v23 = vld [vmem:[%s6754_s3 + $0xe8] sm:$0xff]  ;;  %v521_v24 = vld [vmem:[%s6754_s3 + $0xf8] sm:$0xff]  ;;  %v3397_v27 = vpack.c.bf16 %v516_v19, %v514_v18 }
  0x21   : > { %3390 = vmatpush1.bf16.msra.mxu0 %v3389_v1  ;;  %v694_v25 = vld [vmem:[%s6756_s5 + $0xe8] sm:$0xff]  ;;  %v696_v26 = vld [vmem:[%s6756_s5 + $0xf8] sm:$0xff]  ;;  %v3461_v28 = vpack.c.bf16 %v691_v22, %v689_v20  ;;  %v3399_v29 = vpack.c.bf16 %v521_v24, %v519_v23  ;;  %v518_v30 = vld [vmem:[%s6754_s3 + $0xe0] sm:$0xff]  ;;  %v388_v22 = vsub.s32 5, %v4391_v6 }
  0x22   : > { %3454 = vmatpush1.bf16.msra.mxu1 %v3453_v2  ;;  %3392 = vmatprep.subr.bf16.mxu0 %v3391_v4  ;;  %v520_v31 = vld [vmem:[%s6754_s3 + $0xf0] sm:$0xff]  ;;  %v693_v32 = vld [vmem:[%s6756_s5 + $0xe0] sm:$0xff]  ;;  %v3463_v33 = vpack.c.bf16 %v696_v26, %v694_v25  ;;  %v523_v35 = vld [vmem:[%s6754_s3 + $0x108] sm:$0xff] }
  0x23   : > { %3456 = vmatprep.subr.bf16.mxu1 %v3455_v8  ;;  %v695_v34 = vld [vmem:[%s6756_s5 + $0xf0] sm:$0xff]  ;;  %v525_v36 = vld [vmem:[%s6754_s3 + $0x118] sm:$0xff]  ;;  %v698_v37 = vld [vmem:[%s6756_s5 + $0x108] sm:$0xff]  ;;  %v3401_v39 = vpack.c.bf16 %v520_v31, %v518_v30 }
  0x24   : > { %v700_v38 = vld [vmem:[%s6756_s5 + $0x118] sm:$0xff]  ;;  %v3465_v40 = vpack.c.bf16 %v695_v34, %v693_v32  ;;  %v3403_v41 = vpack.c.bf16 %v525_v36, %v523_v35  ;;  %v522_v42 = vld [vmem:[%s6754_s3 + $0x100] sm:$0xff]  ;;  %v524_v43 = vld [vmem:[%s6754_s3 + $0x110] sm:$0xff]  ;;  %v4461_v34 = vsub.s32 1, %v4391_v6 }
  0x25   : > { %3394 = vmatpush1.bf16.msra.mxu0 %v3393_v15  ;;  %v697_v44 = vld [vmem:[%s6756_s5 + $0x100] sm:$0xff]  ;;  %v3467_v45 = vpack.c.bf16 %v700_v38, %v698_v37  ;;  %v699_v46 = vld [vmem:[%s6756_s5 + $0x110] sm:$0xff]  ;;  %v527_v47 = vld [vmem:[%s6754_s3 + $0x128] sm:$0xff]  ;;  %v3405_v51 = vpack.c.bf16 %v524_v43, %v522_v42 }
  0x26   : > { %3458 = vmatpush1.bf16.msra.mxu1 %v3457_v16  ;;  %3396 = vmatprep.subr.bf16.mxu0 %v3395_v17  ;;  %v529_v48 = vld [vmem:[%s6754_s3 + $0x138] sm:$0xff]  ;;  %v702_v49 = vld [vmem:[%s6756_s5 + $0x128] sm:$0xff]  ;;  %v3469_v52 = vpack.c.bf16 %v699_v46, %v697_v44  ;;  %v526_v54 = vld [vmem:[%s6754_s3 + $0x120] sm:$0xff] }
  0x27   : > { %3460 = vmatprep.subr.bf16.mxu1 %v3459_v21  ;;  %v704_v50 = vld [vmem:[%s6756_s5 + $0x138] sm:$0xff]  ;;  %v3407_v53 = vpack.c.bf16 %v529_v48, %v527_v47  ;;  %v528_v55 = vld [vmem:[%s6754_s3 + $0x130] sm:$0xff]  ;;  %v701_v56 = vld [vmem:[%s6756_s5 + $0x120] sm:$0xff] }
  0x28   : > { %v3471_v57 = vpack.c.bf16 %v704_v50, %v702_v49  ;;  %v703_v58 = vld [vmem:[%s6756_s5 + $0x130] sm:$0xff]  ;;  %v531_v59 = vld [vmem:[%s6754_s3 + $0x148] sm:$0xff]  ;;  %v533_v60 = vld [vmem:[%s6754_s3 + $0x158] sm:$0xff]  ;;  %v3409_v63 = vpack.c.bf16 %v528_v55, %v526_v54 }
  0x29   : > { %3398 = vmatpush1.bf16.msra.mxu0 %v3397_v27  ;;  %v706_v61 = vld [vmem:[%s6756_s5 + $0x148] sm:$0xff]  ;;  %v708_v62 = vld [vmem:[%s6756_s5 + $0x158] sm:$0xff]  ;;  %v3473_v0 = vpack.c.bf16 %v703_v58, %v701_v56  ;;  %v3411_v1 = vpack.c.bf16 %v533_v60, %v531_v59  ;;  %v530_v2 = vld [vmem:[%s6754_s3 + $0x140] sm:$0xff]  ;;  %v364_v27 = vsub.s32 4, %v4391_v6 }
  0x2a   : > { %3462 = vmatpush1.bf16.msra.mxu1 %v3461_v28  ;;  %3400 = vmatprep.subr.bf16.mxu0 %v3399_v29  ;;  %v532_v4 = vld [vmem:[%s6754_s3 + $0x150] sm:$0xff]  ;;  %v705_v5 = vld [vmem:[%s6756_s5 + $0x140] sm:$0xff]  ;;  %v3475_v7 = vpack.c.bf16 %v708_v62, %v706_v61  ;;  %v535_v9 = vld [vmem:[%s6754_s3 + $0x168] sm:$0xff]  ;;  %v429_v28 = vsub.s32 6, %v4391_v6 }
  0x2b   : > { %3464 = vmatprep.subr.bf16.mxu1 %v3463_v33  ;;  %v707_v8 = vld [vmem:[%s6756_s5 + $0x150] sm:$0xff]  ;;  %v537_v10 = vld [vmem:[%s6754_s3 + $0x178] sm:$0xff]  ;;  %v710_v11 = vld [vmem:[%s6756_s5 + $0x168] sm:$0xff]  ;;  %v3413_v12 = vpack.c.bf16 %v532_v4, %v530_v2 }
  0x2c   : > { %v712_v3 = vld [vmem:[%s6756_s5 + $0x178] sm:$0xff]  ;;  %v534_v14 = vld [vmem:[%s6754_s3 + $0x160] sm:$0xff]  ;;  %v536_v15 = vld [vmem:[%s6754_s3 + $0x170] sm:$0xff]  ;;  %v3477_v17 = vpack.c.bf16 %v707_v8, %v705_v5  ;;  %v3415_v18 = vpack.c.bf16 %v537_v10, %v535_v9 }
  0x2d   : > { %3402 = vmatpush1.bf16.msra.mxu0 %v3401_v39  ;;  %v709_v16 = vld [vmem:[%s6756_s5 + $0x160] sm:$0xff]  ;;  %v711_v19 = vld [vmem:[%s6756_s5 + $0x170] sm:$0xff]  ;;  %v539_v20 = vld [vmem:[%s6754_s3 + $0x188] sm:$0xff]  ;;  %v3479_v23 = vpack.c.bf16 %v712_v3, %v710_v11  ;;  %v3417_v36 = vpack.c.bf16 %v536_v15, %v534_v14 }
  0x2e   : > { %3466 = vmatpush1.bf16.msra.mxu1 %v3465_v40  ;;  %3404 = vmatprep.subr.bf16.mxu0 %v3403_v41  ;;  %v541_v21 = vld [vmem:[%s6754_s3 + $0x198] sm:$0xff]  ;;  %v714_v24 = vld [vmem:[%s6756_s5 + $0x188] sm:$0xff]  ;;  %v4443_v29 = vld [vmem:[%s6754_s3 + $0x180] sm:$0xff]  ;;  %v4479_v40 = vsub.s32 0, %v4391_v6  ;;  %v425_v41 = vsub.s32 2, %v4391_v6  ;;  %v3481_v42 = vpack.c.bf16 %v711_v19, %v709_v16 }
  0x2f   : > { %3468 = vmatprep.subr.bf16.mxu1 %v3467_v45  ;;  %v716_v25 = vld [vmem:[%s6756_s5 + $0x198] sm:$0xff]  ;;  %v334_v26 = vld [vmem:[%s327_s29 + $0x8] sm:$0xff]  ;;  %v4448_v30 = vld [vmem:[%s6754_s3 + $0x190] sm:$0xff]  ;;  %v3419_v43 = vpack.c.bf16 %v541_v21, %v539_v20 }
  0x30   : > { %v4453_v31 = vld [vmem:[%s6756_s5 + $0x180] sm:$0xff]  ;;  %v347_v32 = vrot.slane %v334_v26, 7  ;;  %v4466_v37 = vld [vmem:[%s6756_s5 + $0x190] sm:$0xff]  ;;  %v4471_v38 = vld [vmem:[%s6754_s3 + $0x1a8] sm:$0xff]  ;;  %v3483_v50 = vpack.c.bf16 %v716_v25, %v714_v24  ;;  %v3421_v60 = vpack.c.bf16 %v4448_v30, %v4443_v29 }
  0x31   : > { %3406 = vmatpush1.bf16.msra.mxu0 %v3405_v51  ;;  %v4458_v33 = vld [vmem:[%s6752_s1] sm:$0x77]  ;;  %v4476_v39 = vld [vmem:[%s6754_s3 + $0x1b8] sm:$0xff]  ;;  %v4485_v44 = vld [vmem:[%s6756_s5 + $0x1a8] sm:$0xff]  ;;  %v3485_v61 = vpack.c.bf16 %v4466_v37, %v4453_v31 }
  0x32   : > { %3470 = vmatpush1.bf16.msra.mxu1 %v3469_v52  ;;  %3408 = vmatprep.subr.bf16.mxu0 %v3407_v53  ;;  %v333_v35 = vld [vmem:[%s327_s29] sm:$0xff]  ;;  %v4490_v45 = vld [vmem:[%s6756_s5 + $0x1b8] sm:$0xff]  ;;  %v4500_v47 = vld [vmem:[%s6754_s3 + $0x1b0] sm:$0xff]  ;;  %351 = vst [vmem:[#allocation2 + $0x8] sm:$0xfe] %v347_v32  ;;  %v389_v48 = vrot.slane %v4458_v33, %v388_v22  ;;  %v365_v54 = vrot.slane %v4458_v33, %v364_v27 }
  0x33   : > { %3472 = vmatprep.subr.bf16.mxu1 %v3471_v57  ;;  %v4495_v46 = vld [vmem:[%s6754_s3 + $0x1a0] sm:$0xff]  ;;  %353 = vst [vmem:[#allocation2 + $0x18] sm:$0x1] %v347_v32  ;;  %v346_v49 = vrot.slane %v333_v35, 7  ;;  %v4511_v52 = vld [vmem:[%s6756_s5 + $0x1b0] sm:$0xff]  ;;  %v4516_v53 = vld [vmem:[%s6754_s3 + $0x1c8] sm:$0xff]  ;;  %v430_v55 = vrot.slane %v4458_v33, %v429_v28  ;;  %v385_v59 = vrot.slane %v4458_v33, %v4461_v34  ;;  %v3423_v2 = vpack.c.bf16 %v4476_v39, %v4471_v38 }
  0x34   : > { %v4506_v51 = vld [vmem:[%s6756_s5 + $0x1a0] sm:$0xff]  ;;  %v4523_v56 = vld [vmem:[%s6754_s3 + $0x1d8] sm:$0xff]  ;;  %v4528_v57 = vld [vmem:[%s6756_s5 + $0x1c8] sm:$0xff]  ;;  %v399_v8 = vrot.slane %v389_v48, %v4461_v34  ;;  %v361_v9 = vrot.slane %v4458_v33, %v4479_v40  ;;  %v3487_v10 = vpack.c.bf16 %v4490_v45, %v4485_v44  ;;  %v3425_v11 = vpack.c.bf16 %v4500_v47, %v4495_v46 }
  0x35   : > { %3410 = vmatpush1.bf16.msra.mxu0 %v3409_v63  ;;  %v4533_v58 = vld [vmem:[%s6756_s5 + $0x1d8] sm:$0xff]  ;;  %350 = vst [vmem:[#allocation2] sm:$0xfe] %v346_v49  ;;  %352 = vst [vmem:[#allocation2 + $0x10] sm:$0x1] %v346_v49  ;;  %v4544_v62 = vld [vmem:[%s6754_s3 + $0x1c0] sm:$0xff]  ;;  %v375_v3 = vrot.slane %v365_v54, %v4479_v40  ;;  %v3489_v14 = vpack.c.bf16 %v4511_v52, %v4506_v51  ;;  %v3427_v15 = vpack.c.bf16 %v4523_v56, %v4516_v53 }
  0x36   : > { %3474 = vmatpush1.bf16.msra.mxu1 %v3473_v0  ;;  %3412 = vmatprep.subr.bf16.mxu0 %v3411_v1  ;;  %v4549_v63 = vld [vmem:[%s6754_s3 + $0x1d0] sm:$0xff]  ;;  %v4554_v0 = vld [vmem:[%s6756_s5 + $0x1c0] sm:$0xff]  ;;  %v426_v1 = vrot.slane %v4458_v33, %v425_v41  ;;  %v4567_v5 = vld [vmem:[%s6754_s3 + $0x1e8] sm:$0xff]  ;;  %v3491_v16 = vpack.c.bf16 %v4533_v58, %v4528_v57  ;;  %v395_v20 = vrot.slane %v385_v59, %v4461_v34 }
  0x37   : > { %3476 = vmatprep.subr.bf16.mxu1 %v3475_v7  ;;  %v4562_v4 = vld [vmem:[%s6756_s5 + $0x1d0] sm:$0xff]  ;;  %v4572_v7 = vld [vmem:[%s6754_s3 + $0x1f8] sm:$0xff]  ;;  %v4601_v19 = vld [vmem:[%s6753_s2] sm:$0x3]  ;;  %v3429_v21 = vpack.c.bf16 %v4549_v63, %v4544_v62  ;;  %v371_v32 = vrot.slane %v361_v9, %v4479_v40 }
  0x38   : > { %v3493_v22 = vpack.c.bf16 %v4562_v4, %v4554_v0  ;;  %v436_v27 = vrot.slane %v426_v1, %v425_v41  ;;  %v469_v44 = vrot.slane %v4601_v19, %v4461_v34  ;;  %v550_v48 = vld [vmem:[%s6754_s3 + $0x1e0] sm:$0xff]  ;;  %v552_v49 = vld [vmem:[%s6754_s3 + $0x1f0] sm:$0xff]  ;;  %v803_v0 = vld [vmem:[%s6757_s6 + $0x8] sm:$0xff] }
  0x39   : > { %3414 = vmatpush1.bf16.msra.mxu0 %v3413_v12  ;;  %v440_v12 = vrot.slane %v430_v55, %v425_v41  ;;  %v356_v24 = vld [vmem:[#allocation2 + $0x8] sm:$0xff]  ;;  %v725_v54 = vld [vmem:[%s6756_s5 + $0x1e0] sm:$0xff]  ;;  %v727_v55 = vld [vmem:[%s6756_s5 + $0x1f0] sm:$0xff] }
  0x3a   : > { %3478 = vmatpush1.bf16.msra.mxu1 %v3477_v17  ;;  %3416 = vmatprep.subr.bf16.mxu0 %v3415_v18  ;;  %v4591_v17 = vld [vmem:[%s6756_s5 + $0x1e8] sm:$0xff]  ;;  %v4596_v18 = vld [vmem:[%s6756_s5 + $0x1f8] sm:$0xff]  ;;  %v377_v35 = vmul.f32 %v375_v3, %v356_v24 }
  0x3b   : > { %3480 = vmatprep.subr.bf16.mxu1 %v3479_v23  ;;  %v3431_v23 = vpack.c.bf16 %v4572_v7, %v4567_v5  ;;  %v379_v25 = vld [vmem:[#allocation2 + $0x8] sm:$0xfe]  ;;  %v381_v26 = vld [vmem:[#allocation2 + $0x18] sm:$0x1]  ;;  %v3495_v33 = vpack.c.bf16 %v4596_v18, %v4591_v17 }
  0x3c   : > { %v401_v28 = vmul.f32 %v399_v8, %v379_v25  ;;  %v403_v29 = vmul.f32 %v399_v8, %v381_v26  ;;  %v420_v30 = vld [vmem:[#allocation2 + $0x8] sm:$0xfc]  ;;  %v422_v31 = vld [vmem:[#allocation2 + $0x18] sm:$0x3]  ;;  %v355_v38 = vld [vmem:[#allocation2] sm:$0xff]  ;;  %v3497_v8 = vpack.c.bf16 %v727_v55, %v725_v54 }
  0x3d   : > { %3418 = vmatpush1.bf16.msra.mxu0 %v3417_v36  ;;  %v442_v36 = vmul.f32 %v440_v12, %v420_v30  ;;  %v444_v37 = vmul.f32 %v440_v12, %v422_v31  ;;  %v378_v39 = vld [vmem:[#allocation2] sm:$0xfe]  ;;  %v421_v47 = vld [vmem:[#allocation2 + $0x10] sm:$0x3]  ;;  %v376_v57 = vmul.f32 %v371_v32, %v355_v38  ;;  %v805_v1 = vld [vmem:[%s6757_s6 + $0x18] sm:$0xff] }
  0x3e   : > { %3482 = vmatpush1.bf16.msra.mxu1 %v3481_v42  ;;  %3420 = vmatprep.subr.bf16.mxu0 %v3419_v43  ;;  %v380_v42 = vld [vmem:[#allocation2 + $0x10] sm:$0x1]  ;;  %v412_v41 = vrot.slane %v401_v28, 1  ;;  %v413_v43 = vrot.slane %v403_v29, 1  ;;  %v400_v45 = vmul.f32 %v395_v20, %v378_v39  ;;  %v419_v46 = vld [vmem:[#allocation2] sm:$0xfc]  ;;  %v443_v59 = vmul.f32 %v436_v27, %v421_v47 }
  0x3f   : > { %3484 = vmatprep.subr.bf16.mxu1 %v3483_v50  ;;  %v453_v50 = vrot.slane %v442_v36, 2  ;;  %v454_v51 = vrot.slane %v444_v37, 2  ;;  %v402_v52 = vmul.f32 %v395_v20, %v380_v42  ;;  %v441_v53 = vmul.f32 %v436_v27, %v419_v46  ;;  %v2977_v5 = vld [vmem:[%s6756_s5 + $0x208] sm:$0xff]  ;;  %v2979_v7 = vld [vmem:[%s6756_s5 + $0x218] sm:$0xff]  ;;  %v802_v25 = vld [vmem:[%s6757_s6] sm:$0xff] }
  0x40   : > { %v414_v56 = vsel %vm408_vm1, %v412_v41, %v413_v43  ;;  %v409_v58 = vrot.slane %v400_v45, 1  ;;  %v451_v4 = vrot.slane %v443_v59, 2  ;;  %v804_v26 = vld [vmem:[%s6757_s6 + $0x10] sm:$0xff]  ;;  %v2976_v28 = vld [vmem:[%s6756_s5 + $0x200] sm:$0xff]  ;;  %v807_v30 = vld [vmem:[%s6757_s6 + $0x28] sm:$0xff] }
  0x41   : > { %3422 = vmatpush1.bf16.msra.mxu0 %v3421_v60  ;;  %v418_v60 = vadd.f32 %v414_v56, %v377_v35  ;;  %v410_v62 = vrot.slane %v402_v52, 1  ;;  %v450_v63 = vrot.slane %v441_v53, 2  ;;  %v2978_v29 = vld [vmem:[%s6756_s5 + $0x210] sm:$0xff]  ;;  %v809_v32 = vld [vmem:[%s6757_s6 + $0x38] sm:$0xff]  ;;  %v3501_v37 = vpack.c.bf16 %v804_v26, %v802_v25  ;;  %v806_v39 = vld [vmem:[%s6757_s6 + $0x20] sm:$0xff] }
  0x42   : > { %3486 = vmatpush1.bf16.msra.mxu1 %v3485_v61  ;;  %3424 = vmatprep.subr.bf16.mxu0 %v3423_v2  ;;  %v455_v61 = vsel %vm449_vm2, %v453_v50, %v454_v51  ;;  %v3433_v2 = vpack.c.bf16 %v552_v49, %v550_v48  ;;  %v2983_v35 = vld [vmem:[%s6756_s5 + $0x238] sm:$0xff]  ;;  %v3565_v38 = vpack.c.bf16 %v2978_v29, %v2976_v28  ;;  %v808_v42 = vld [vmem:[%s6757_s6 + $0x30] sm:$0xff]  ;;  %v2980_v45 = vld [vmem:[%s6756_s5 + $0x220] sm:$0xff] }
  0x43   : > { %3488 = vmatprep.subr.bf16.mxu1 %v3487_v10  ;;  %v459_v9 = vadd.f32 %v455_v61, %v418_v60  ;;  %v411_v10 = vsel %vm408_vm1, %v409_v58, %v410_v62  ;;  %v452_v12 = vsel %vm449_vm2, %v450_v63, %v451_v4  ;;  %v3503_v43 = vpack.c.bf16 %v809_v32, %v807_v30  ;;  %v2982_v46 = vld [vmem:[%s6756_s5 + $0x230] sm:$0xff]  ;;  %v811_v47 = vld [vmem:[%s6757_s6 + $0x48] sm:$0xff]  ;;  %v813_v48 = vld [vmem:[%s6757_s6 + $0x58] sm:$0xff] }
  0x44   : > { %v417_v3 = vadd.f32 %v411_v10, %v376_v57  ;;  %v2985_v49 = vld [vmem:[%s6756_s5 + $0x248] sm:$0xff]  ;;  %v2987_v50 = vld [vmem:[%s6756_s5 + $0x258] sm:$0xff]  ;;  %v3505_v51 = vpack.c.bf16 %v808_v42, %v806_v39  ;;  %v3569_v52 = vpack.c.bf16 %v2982_v46, %v2980_v45  ;;  %v810_v53 = vld [vmem:[%s6757_s6 + $0x40] sm:$0xff]  ;;  %v3507_v55 = vpack.c.bf16 %v813_v48, %v811_v47 }
  0x45   : > { %3426 = vmatpush1.bf16.msra.mxu0 %v3425_v11  ;;  %v465_v11 = vrot.slane %v4601_v19, %v4479_v40  ;;  %v812_v54 = vld [vmem:[%s6757_s6 + $0x50] sm:$0xff]  ;;  %v3571_v56 = vpack.c.bf16 %v2987_v50, %v2985_v49  ;;  %v2984_v57 = vld [vmem:[%s6756_s5 + $0x240] sm:$0xff]  ;;  %v815_v59 = vld [vmem:[%s6757_s6 + $0x68] sm:$0xff] }
  0x46   : > { %3490 = vmatpush1.bf16.msra.mxu1 %v3489_v14  ;;  %3428 = vmatprep.subr.bf16.mxu0 %v3427_v15  ;;  %v3499_v14 = vpack.c.bf16 %v805_v1, %v803_v0  ;;  %v473_v15 = vadd.f32 %v469_v44, %v459_v9  ;;  %v458_v17 = vadd.f32 %v452_v12, %v417_v3  ;;  %v2986_v58 = vld [vmem:[%s6756_s5 + $0x250] sm:$0xff]  ;;  %v817_v60 = vld [vmem:[%s6757_s6 + $0x78] sm:$0xff]  ;;  %v2989_v61 = vld [vmem:[%s6756_s5 + $0x268] sm:$0xff] }
  0x47   : > { %3492 = vmatprep.subr.bf16.mxu1 %v3491_v16  ;;  %v3563_v16 = vpack.c.bf16 %v2979_v7, %v2977_v5  ;;  %v2991_v62 = vld [vmem:[%s6756_s5 + $0x278] sm:$0xff]  ;;  %v3509_v63 = vpack.c.bf16 %v812_v54, %v810_v53  ;;  %v3573_v0 = vpack.c.bf16 %v2986_v58, %v2984_v57  ;;  %v814_v1 = vld [vmem:[%s6757_s6 + $0x60] sm:$0xff]  ;;  %v3511_v4 = vpack.c.bf16 %v817_v60, %v815_v59  ;;  %v819_v9 = vld [vmem:[%s6757_s6 + $0x88] sm:$0xff] }
  0x48   : > { %v2975_v18 = vmul.f32 -1.442695, %v473_v15  ;;  %v472_v20 = vadd.f32 %v465_v11, %v458_v17  ;;  %v3575_v5 = vpack.c.bf16 %v2991_v62, %v2989_v61  ;;  %v2988_v7 = vld [vmem:[%s6756_s5 + $0x260] sm:$0xff]  ;;  %v821_v10 = vld [vmem:[%s6757_s6 + $0x98] sm:$0xff]  ;;  %v2993_v11 = vld [vmem:[%s6756_s5 + $0x288] sm:$0xff] }
  0x49   : > { %3430 = vmatpush1.bf16.msra.mxu0 %v3429_v21  ;;  %v2995_v3 = vld [vmem:[%s6756_s5 + $0x298] sm:$0xff]  ;;  %v3515_v17 = vpack.c.bf16 %v821_v10, %v819_v9  ;;  %v824_v28 = vld [vmem:[%s6757_s6 + $0xb0] sm:$0xff]  ;;  %v2996_v32 = vld [vmem:[%s6756_s5 + $0x2a0] sm:$0xff] }
  0x4a   : > { %3494 = vmatpush1.bf16.msra.mxu1 %v3493_v22  ;;  %3432 = vmatprep.subr.bf16.mxu0 %v3431_v23  ;;  %3957 = vpow2.f32 %v2975_v18  ;;  %v2974_v21 = vmul.f32 -1.442695, %v472_v20  ;;  %v3579_v18 = vpack.c.bf16 %v2995_v3, %v2993_v11  ;;  %v3000_v47 = vld [vmem:[%s6756_s5 + $0x2c0] sm:$0xff]  ;;  %v3002_v48 = vld [vmem:[%s6756_s5 + $0x2d0] sm:$0xff]  ;;  %v831_v49 = vld [vmem:[%s6757_s6 + $0xe8] sm:$0xff] }
  0x4b   : > { %3496 = vmatprep.subr.bf16.mxu1 %v3495_v33  ;;  %v2981_v33 = vld [vmem:[%s6756_s5 + $0x228] sm:$0xff]  ;;  %v833_v50 = vld [vmem:[%s6757_s6 + $0xf8] sm:$0xff]  ;;  %v3589_v54 = vpack.c.bf16 %v3002_v48, %v3000_v47  ;;  %v3004_v59 = vld [vmem:[%s6756_s5 + $0x2e0] sm:$0xff] }
  0x4c   : > { %3959 = vpow2.f32 %v2974_v21  ;;  %v3567_v44 = vpack.c.bf16 %v2983_v35, %v2981_v33  ;;  %v2994_v21 = vld [vmem:[%s6756_s5 + $0x290] sm:$0xff]  ;;  %v827_v35 = vld [vmem:[%s6757_s6 + $0xc8] sm:$0xff]  ;;  %v3527_v57 = vpack.c.bf16 %v833_v50, %v831_v49  ;;  %v837_v62 = vld [vmem:[%s6757_s6 + $0x118] sm:$0xff] }
  0x4d   : > { %3434 = vmatpush1.bf16.msra.mxu0 %v3433_v2  ;;  %v816_v2 = vld [vmem:[%s6757_s6 + $0x70] sm:$0xff]  ;;  %v835_v61 = vld [vmem:[%s6757_s6 + $0x108] sm:$0xff]  ;;  %v3008_v9 = vld [vmem:[%s6756_s5 + $0x300] sm:$0xff] }
  0x4e   : > { %3498 = vmatpush1.bf16.msra.mxu1 %v3497_v8  ;;  %3500 = vmatprep.subr.bf16.mxu0 %v3499_v14  ;;  %v2990_v8 = vld [vmem:[%s6756_s5 + $0x270] sm:$0xff]  ;;  %v3513_v12 = vpack.c.bf16 %v816_v2, %v814_v1  ;;  %v839_v11 = vld [vmem:[%s6757_s6 + $0x128] sm:$0xff]  ;;  %v841_v3 = vld [vmem:[%s6757_s6 + $0x138] sm:$0xff] }
  0x4f   : > { %3564 = vmatprep.subr.bf16.mxu1 %v3563_v16  ;;  %v3577_v14 = vpack.c.bf16 %v2990_v8, %v2988_v7  ;;  %v820_v16 = vld [vmem:[%s6757_s6 + $0x90] sm:$0xff]  ;;  %v3531_v7 = vpack.c.bf16 %v837_v62, %v835_v61  ;;  %v3020_v49 = vld [vmem:[%s6756_s5 + $0x360] sm:$0xff] }
  0x50   : > { %v2998_v33 = vld [vmem:[%s6756_s5 + $0x2b0] sm:$0xff]  ;;  %v3024_v61 = vld [vmem:[%s6756_s5 + $0x380] sm:$0xff] }
  0x51   : > { %v3585_v42 = vpack.c.bf16 %v2998_v33, %v2996_v32  ;;  %v3006_v60 = vld [vmem:[%s6756_s5 + $0x2f0] sm:$0xff] }
  0x52   : > { %v3593_v2 = vpack.c.bf16 %v3006_v60, %v3004_v59  ;;  %v3010_v10 = vld [vmem:[%s6756_s5 + $0x310] sm:$0xff] }
  0x53   : > { %v3022_v50 = vld [vmem:[%s6756_s5 + $0x370] sm:$0xff] }
  0x54   : > { %v3958_v19 = vpop.eup %3957  ;;  %v3026_v62 = vld [vmem:[%s6756_s5 + $0x390] sm:$0xff] }
  0x55   : > { %v481_v22 = vadd.f32 1.0, %v3958_v19  ;;  %v823_v19 = vld [vmem:[%s6757_s6 + $0xa8] sm:$0xff] }
  0x56   : > { %v3960_v23 = vpop.eup %3959 }
  0x57   : > { %3961 = vrcp.f32 %v481_v22  ;;  %v480_v24 = vadd.f32 1.0, %v3960_v23  ;;  %v825_v22 = vld [vmem:[%s6757_s6 + $0xb8] sm:$0xff]  ;;  %v2997_v23 = vld [vmem:[%s6756_s5 + $0x2a8] sm:$0xff] }
  0x58   : > { %v3519_v29 = vpack.c.bf16 %v825_v22, %v823_v19  ;;  %v3012_v19 = vld [vmem:[%s6756_s5 + $0x320] sm:$0xff]  ;;  %v3014_v22 = vld [vmem:[%s6756_s5 + $0x330] sm:$0xff] }
  0x59   : > { %3963 = vrcp.f32 %v480_v24  ;;  %v2999_v24 = vld [vmem:[%s6756_s5 + $0x2b8] sm:$0xff] }
  0x5a   : > { %v3583_v30 = vpack.c.bf16 %v2999_v24, %v2997_v23  ;;  %v843_v23 = vld [vmem:[%s6757_s6 + $0x148] sm:$0xff]  ;;  %v845_v24 = vld [vmem:[%s6757_s6 + $0x158] sm:$0xff] }
  0x5b   : > { %v3539_v32 = vpack.c.bf16 %v845_v24, %v843_v23  ;;  %v3032_v23 = vld [vmem:[%s6756_s5 + $0x3c0] sm:$0xff]  ;;  %v3034_v24 = vld [vmem:[%s6756_s5 + $0x3d0] sm:$0xff] }
  0x61   : > { %v3962_v27 = vpop.eup %3961 }
  0x62   : > { %v4660_v31 = vmul.f32 %v3962_v27, %v473_v15  ;;  %v818_v15 = vld [vmem:[%s6757_s6 + $0x80] sm:$0xff] }
  0x63   : > { %v3964_v36 = vpop.eup %3963  ;;  %v3517_v25 = vpack.c.bf16 %v820_v16, %v818_v15  ;;  %v822_v27 = vld [vmem:[%s6757_s6 + $0xa0] sm:$0xff]  ;;  %v3597_v16 = vpack.c.bf16 %v3010_v10, %v3008_v9 }
  0x64   : > { %630 = vmatprep.mubr.f32.mxu0 %v4660_v31  ;;  %489 = vst [vmem:[#allocation3 + $0x8] sm:$0xff] %v4660_v31  ;;  %793 = vmatprep.mubr.f32.mxu1 %v4660_v31  ;;  %v4680_v41 = vmul.f32 %v3964_v36, %v472_v20  ;;  %v2992_v20 = vld [vmem:[%s6756_s5 + $0x280] sm:$0xff]  ;;  %v829_v36 = vld [vmem:[%s6757_s6 + $0xd8] sm:$0xff]  ;;  %v3521_v39 = vpack.c.bf16 %v824_v28, %v822_v27 }
  0x65   : > { %v3581_v26 = vpack.c.bf16 %v2994_v21, %v2992_v20  ;;  %v3523_v45 = vpack.c.bf16 %v829_v36, %v827_v35  ;;  %v3535_v20 = vpack.c.bf16 %v841_v3, %v839_v11  ;;  %v3601_v28 = vpack.c.bf16 %v3014_v22, %v3012_v19  ;;  %v3016_v35 = vld [vmem:[%s6756_s5 + $0x340] sm:$0xff]  ;;  %v3018_v36 = vld [vmem:[%s6756_s5 + $0x350] sm:$0xff] }
  0x66   : > { %631 = vmatmul.mubr.f32.vlgmr.msra.gmra.mrb[0].mxu0 %v4680_v41  ;;  %488 = vst [vmem:[#allocation3] sm:$0xff] %v4680_v41  ;;  %794 = vmatmul.mubr.f32.vlgmr.msra.gmra.mrb[0].mxu1 %v4680_v41  ;;  %v3028_v11 = vld [vmem:[%s6756_s5 + $0x3a0] sm:$0xff]  ;;  %v3030_v3 = vld [vmem:[%s6756_s5 + $0x3b0] sm:$0xff] }
  0x67   : > { %3502 = vmatpush1.bf16.msra.mxu0 %v3501_v37  ;;  %3566 = vmatpush1.bf16.msra.mxu1 %v3565_v38  ;;  %v3001_v37 = vld [vmem:[%s6756_s5 + $0x2c8] sm:$0xff]  ;;  %v3003_v38 = vld [vmem:[%s6756_s5 + $0x2d8] sm:$0xff] }
  0x68   : > { %3504 = vmatprep.subr.bf16.mxu0 %v3503_v43  ;;  %3568 = vmatprep.subr.bf16.mxu1 %v3567_v44  ;;  %v826_v43 = vld [vmem:[%s6757_s6 + $0xc0] sm:$0xff]  ;;  %v828_v44 = vld [vmem:[%s6757_s6 + $0xd0] sm:$0xff]  ;;  %v3587_v46 = vpack.c.bf16 %v3003_v38, %v3001_v37  ;;  %v847_v37 = vld [vmem:[%s6757_s6 + $0x168] sm:$0xff] }
  0x69   : > { %930 = vmatprep.mubr.f32.mxu0 %v4660_v31  ;;  %1068 = vmatprep.mubr.f32.mxu1 %v4660_v31  ;;  %v3525_v53 = vpack.c.bf16 %v828_v44, %v826_v43  ;;  %v849_v38 = vld [vmem:[%s6757_s6 + $0x178] sm:$0xff]  ;;  %v3605_v44 = vpack.c.bf16 %v3018_v36, %v3016_v35 }
  0x6a   : > { %v3543_v47 = vpack.c.bf16 %v849_v38, %v847_v37  ;;  %v3036_v37 = vld [vmem:[%s6756_s5 + $0x3e0] sm:$0xff]  ;;  %v3038_v38 = vld [vmem:[%s6756_s5 + $0x3f0] sm:$0xff] }
  0x6b   : > { %3506 = vmatpush1.bf16.msra.mxu0 %v3505_v51  ;;  %3570 = vmatpush1.bf16.msra.mxu1 %v3569_v52  ;;  %v3005_v51 = vld [vmem:[%s6756_s5 + $0x2e8] sm:$0xff]  ;;  %v3007_v52 = vld [vmem:[%s6756_s5 + $0x2f8] sm:$0xff] }
  0x6c   : > { %3508 = vmatprep.subr.bf16.mxu0 %v3507_v55  ;;  %3572 = vmatprep.subr.bf16.mxu1 %v3571_v56  ;;  %v830_v55 = vld [vmem:[%s6757_s6 + $0xe0] sm:$0xff]  ;;  %v832_v56 = vld [vmem:[%s6757_s6 + $0xf0] sm:$0xff]  ;;  %v3591_v58 = vpack.c.bf16 %v3007_v52, %v3005_v51  ;;  %v851_v51 = vld [vmem:[%s6757_s6 + $0x188] sm:$0xff] }
  0x6d   : > { %v3529_v1 = vpack.c.bf16 %v832_v56, %v830_v55  ;;  %v853_v52 = vld [vmem:[%s6757_s6 + $0x198] sm:$0xff]  ;;  %v3609_v56 = vpack.c.bf16 %v3022_v50, %v3020_v49 }
  0x6e   : > { %v3547_v59 = vpack.c.bf16 %v853_v52, %v851_v51  ;;  %v3104_v51 = vld [vmem:[%s6756_s5 + $0x400] sm:$0xff]  ;;  %v3106_v52 = vld [vmem:[%s6756_s5 + $0x410] sm:$0xff] }
  0x6f   : > { %3510 = vmatpush1.bf16.msra.mxu0 %v3509_v63  ;;  %3574 = vmatpush1.bf16.msra.mxu1 %v3573_v0  ;;  %v3009_v63 = vld [vmem:[%s6756_s5 + $0x308] sm:$0xff]  ;;  %v3011_v0 = vld [vmem:[%s6756_s5 + $0x318] sm:$0xff] }
  0x70   : > { %3512 = vmatprep.subr.bf16.mxu0 %v3511_v4  ;;  %3576 = vmatprep.subr.bf16.mxu1 %v3575_v5  ;;  %v834_v4 = vld [vmem:[%s6757_s6 + $0x100] sm:$0xff]  ;;  %v836_v5 = vld [vmem:[%s6757_s6 + $0x110] sm:$0xff]  ;;  %v3595_v8 = vpack.c.bf16 %v3011_v0, %v3009_v63  ;;  %v855_v63 = vld [vmem:[%s6757_s6 + $0x1a8] sm:$0xff] }
  0x71   : > { %v3533_v15 = vpack.c.bf16 %v836_v5, %v834_v4  ;;  %v857_v0 = vld [vmem:[%s6757_s6 + $0x1b8] sm:$0xff]  ;;  %v3613_v5 = vpack.c.bf16 %v3026_v62, %v3024_v61 }
  0x72   : > { %v3551_v9 = vpack.c.bf16 %v857_v0, %v855_v63  ;;  %v3108_v63 = vld [vmem:[%s6756_s5 + $0x420] sm:$0xff]  ;;  %v3110_v0 = vld [vmem:[%s6756_s5 + $0x430] sm:$0xff] }
  0x73   : > { %3514 = vmatpush1.bf16.msra.mxu0 %v3513_v12  ;;  %3578 = vmatpush1.bf16.msra.mxu1 %v3577_v14  ;;  %v3013_v12 = vld [vmem:[%s6756_s5 + $0x328] sm:$0xff]  ;;  %v3015_v14 = vld [vmem:[%s6756_s5 + $0x338] sm:$0xff] }
  0x74   : > { %3516 = vmatprep.subr.bf16.mxu0 %v3515_v17  ;;  %3580 = vmatprep.subr.bf16.mxu1 %v3579_v18  ;;  %v838_v17 = vld [vmem:[%s6757_s6 + $0x120] sm:$0xff]  ;;  %v840_v18 = vld [vmem:[%s6757_s6 + $0x130] sm:$0xff]  ;;  %v3599_v21 = vpack.c.bf16 %v3015_v14, %v3013_v12  ;;  %v859_v12 = vld [vmem:[%s6757_s6 + $0x1c8] sm:$0xff] }
  0x75   : > { %v3537_v27 = vpack.c.bf16 %v840_v18, %v838_v17  ;;  %v861_v14 = vld [vmem:[%s6757_s6 + $0x1d8] sm:$0xff]  ;;  %v3617_v18 = vpack.c.bf16 %v3030_v3, %v3028_v11 }
  0x76   : > { %v3555_v19 = vpack.c.bf16 %v861_v14, %v859_v12  ;;  %v3114_v12 = vld [vmem:[%s6756_s5 + $0x450] sm:$0xff]  ;;  %v3053_v14 = vld [vmem:[%s6757_s6 + $0x268] sm:$0xff] }
  0x77   : > { %3518 = vmatpush1.bf16.msra.mxu0 %v3517_v25  ;;  %3582 = vmatpush1.bf16.msra.mxu1 %v3581_v26  ;;  %v3017_v25 = vld [vmem:[%s6756_s5 + $0x348] sm:$0xff]  ;;  %v3019_v26 = vld [vmem:[%s6756_s5 + $0x358] sm:$0xff] }
  0x78   : > { %3520 = vmatprep.subr.bf16.mxu0 %v3519_v29  ;;  %3584 = vmatprep.subr.bf16.mxu1 %v3583_v30  ;;  %v842_v29 = vld [vmem:[%s6757_s6 + $0x140] sm:$0xff]  ;;  %v844_v30 = vld [vmem:[%s6757_s6 + $0x150] sm:$0xff]  ;;  %v3603_v33 = vpack.c.bf16 %v3019_v26, %v3017_v25  ;;  %v863_v25 = vld [vmem:[%s6757_s6 + $0x1e8] sm:$0xff] }
  0x79   : > { %v3541_v43 = vpack.c.bf16 %v844_v30, %v842_v29  ;;  %v865_v26 = vld [vmem:[%s6757_s6 + $0x1f8] sm:$0xff]  ;;  %v3621_v30 = vpack.c.bf16 %v3034_v24, %v3032_v23  ;;  %v3118_v24 = vld [vmem:[%s6756_s5 + $0x470] sm:$0xff] }
  0x7a   : > { %v3559_v35 = vpack.c.bf16 %v865_v26, %v863_v25  ;;  %v3057_v25 = vld [vmem:[%s6757_s6 + $0x288] sm:$0xff]  ;;  %v3059_v26 = vld [vmem:[%s6757_s6 + $0x298] sm:$0xff] }
  0x7b   : > { %3522 = vmatpush1.bf16.msra.mxu0 %v3521_v39  ;;  %3586 = vmatpush1.bf16.msra.mxu1 %v3585_v42  ;;  %v3021_v39 = vld [vmem:[%s6756_s5 + $0x368] sm:$0xff]  ;;  %v3023_v42 = vld [vmem:[%s6756_s5 + $0x378] sm:$0xff] }
  0x7c   : > { %3524 = vmatprep.subr.bf16.mxu0 %v3523_v45  ;;  %3588 = vmatprep.subr.bf16.mxu1 %v3587_v46  ;;  %v846_v45 = vld [vmem:[%s6757_s6 + $0x160] sm:$0xff]  ;;  %v848_v46 = vld [vmem:[%s6757_s6 + $0x170] sm:$0xff]  ;;  %v3607_v48 = vpack.c.bf16 %v3023_v42, %v3021_v39  ;;  %v3041_v39 = vld [vmem:[%s6757_s6 + $0x208] sm:$0xff] }
  0x7d   : > { %v3545_v55 = vpack.c.bf16 %v848_v46, %v846_v45  ;;  %v3043_v42 = vld [vmem:[%s6757_s6 + $0x218] sm:$0xff]  ;;  %v3625_v46 = vpack.c.bf16 %v3038_v38, %v3036_v37  ;;  %v3120_v37 = vld [vmem:[%s6756_s5 + $0x480] sm:$0xff]  ;;  %v3122_v38 = vld [vmem:[%s6756_s5 + $0x490] sm:$0xff] }
  0x7e   : > { %v3627_v49 = vpack.c.bf16 %v3043_v42, %v3041_v39  ;;  %v3061_v39 = vld [vmem:[%s6757_s6 + $0x2a8] sm:$0xff]  ;;  %v3063_v42 = vld [vmem:[%s6757_s6 + $0x2b8] sm:$0xff] }
  0x7f   : > { %3526 = vmatpush1.bf16.msra.mxu0 %v3525_v53  ;;  %3590 = vmatpush1.bf16.msra.mxu1 %v3589_v54  ;;  %v3025_v53 = vld [vmem:[%s6756_s5 + $0x388] sm:$0xff]  ;;  %v3027_v54 = vld [vmem:[%s6756_s5 + $0x398] sm:$0xff] }
  0x80   : > { %3528 = vmatprep.subr.bf16.mxu0 %v3527_v57  ;;  %3592 = vmatprep.subr.bf16.mxu1 %v3591_v58  ;;  %v850_v57 = vld [vmem:[%s6757_s6 + $0x180] sm:$0xff]  ;;  %v852_v58 = vld [vmem:[%s6757_s6 + $0x190] sm:$0xff]  ;;  %v3611_v60 = vpack.c.bf16 %v3027_v54, %v3025_v53  ;;  %v3045_v53 = vld [vmem:[%s6757_s6 + $0x228] sm:$0xff] }
  0x81   : > { %v3549_v4 = vpack.c.bf16 %v852_v58, %v850_v57  ;;  %v3047_v54 = vld [vmem:[%s6757_s6 + $0x238] sm:$0xff]  ;;  %v3693_v58 = vpack.c.bf16 %v3106_v52, %v3104_v51  ;;  %v3124_v51 = vld [vmem:[%s6756_s5 + $0x4a0] sm:$0xff]  ;;  %v3126_v52 = vld [vmem:[%s6756_s5 + $0x4b0] sm:$0xff] }
  0x82   : > { %v3631_v61 = vpack.c.bf16 %v3047_v54, %v3045_v53  ;;  %v3065_v53 = vld [vmem:[%s6757_s6 + $0x2c8] sm:$0xff]  ;;  %v3067_v54 = vld [vmem:[%s6757_s6 + $0x2d8] sm:$0xff] }
  0x83   : > { %3530 = vmatpush1.bf16.msra.mxu0 %v3529_v1  ;;  %3594 = vmatpush1.bf16.msra.mxu1 %v3593_v2  ;;  %v3029_v1 = vld [vmem:[%s6756_s5 + $0x3a8] sm:$0xff]  ;;  %v3031_v2 = vld [vmem:[%s6756_s5 + $0x3b8] sm:$0xff] }
  0x84   : > { %3532 = vmatprep.subr.bf16.mxu0 %v3531_v7  ;;  %3596 = vmatprep.subr.bf16.mxu1 %v3595_v8  ;;  %v854_v7 = vld [vmem:[%s6757_s6 + $0x1a0] sm:$0xff]  ;;  %v856_v8 = vld [vmem:[%s6757_s6 + $0x1b0] sm:$0xff]  ;;  %v3615_v10 = vpack.c.bf16 %v3031_v2, %v3029_v1  ;;  %v3049_v1 = vld [vmem:[%s6757_s6 + $0x248] sm:$0xff] }
  0x85   : > { %v3553_v17 = vpack.c.bf16 %v856_v8, %v854_v7  ;;  %v3051_v2 = vld [vmem:[%s6757_s6 + $0x258] sm:$0xff]  ;;  %v3697_v8 = vpack.c.bf16 %v3110_v0, %v3108_v63  ;;  %v3128_v63 = vld [vmem:[%s6756_s5 + $0x4c0] sm:$0xff]  ;;  %v3130_v0 = vld [vmem:[%s6756_s5 + $0x4d0] sm:$0xff] }
  0x86   : > { %v3635_v11 = vpack.c.bf16 %v3051_v2, %v3049_v1  ;;  %v3069_v1 = vld [vmem:[%s6757_s6 + $0x2e8] sm:$0xff]  ;;  %v3071_v2 = vld [vmem:[%s6757_s6 + $0x2f8] sm:$0xff] }
  0x87   : > { %3534 = vmatpush1.bf16.msra.mxu0 %v3533_v15  ;;  %3598 = vmatpush1.bf16.msra.mxu1 %v3597_v16  ;;  %v3033_v15 = vld [vmem:[%s6756_s5 + $0x3c8] sm:$0xff]  ;;  %v3035_v16 = vld [vmem:[%s6756_s5 + $0x3d8] sm:$0xff] }
  0x88   : > { %3536 = vmatprep.subr.bf16.mxu0 %v3535_v20  ;;  %3600 = vmatprep.subr.bf16.mxu1 %v3599_v21  ;;  %v858_v20 = vld [vmem:[%s6757_s6 + $0x1c0] sm:$0xff]  ;;  %v860_v21 = vld [vmem:[%s6757_s6 + $0x1d0] sm:$0xff]  ;;  %v3619_v22 = vpack.c.bf16 %v3035_v16, %v3033_v15  ;;  %v3055_v15 = vld [vmem:[%s6757_s6 + $0x278] sm:$0xff] }
  0x89   : > { %v3557_v29 = vpack.c.bf16 %v860_v21, %v858_v20  ;;  %v3117_v16 = vld [vmem:[%s6756_s5 + $0x468] sm:$0xff]  ;;  %v3052_v21 = vld [vmem:[%s6757_s6 + $0x260] sm:$0xff] }
  0x8b   : > { %3538 = vmatpush1.bf16.msra.mxu0 %v3537_v27  ;;  %3602 = vmatpush1.bf16.msra.mxu1 %v3601_v28  ;;  %v3037_v27 = vld [vmem:[%s6756_s5 + $0x3e8] sm:$0xff]  ;;  %v3039_v28 = vld [vmem:[%s6756_s5 + $0x3f8] sm:$0xff] }
  0x8c   : > { %3540 = vmatprep.subr.bf16.mxu0 %v3539_v32  ;;  %3604 = vmatprep.subr.bf16.mxu1 %v3603_v33  ;;  %v862_v32 = vld [vmem:[%s6757_s6 + $0x1e0] sm:$0xff]  ;;  %v864_v33 = vld [vmem:[%s6757_s6 + $0x1f0] sm:$0xff]  ;;  %v3623_v36 = vpack.c.bf16 %v3039_v28, %v3037_v27  ;;  %v3121_v27 = vld [vmem:[%s6756_s5 + $0x488] sm:$0xff] }
  0x8d   : > { %v3561_v45 = vpack.c.bf16 %v864_v33, %v862_v32  ;;  %v3123_v28 = vld [vmem:[%s6756_s5 + $0x498] sm:$0xff]  ;;  %v3056_v32 = vld [vmem:[%s6757_s6 + $0x280] sm:$0xff]  ;;  %v3058_v33 = vld [vmem:[%s6757_s6 + $0x290] sm:$0xff] }
  0x8f   : > { %3542 = vmatpush1.bf16.msra.mxu0 %v3541_v43  ;;  %3606 = vmatpush1.bf16.msra.mxu1 %v3605_v44  ;;  %v3105_v43 = vld [vmem:[%s6756_s5 + $0x408] sm:$0xff]  ;;  %v3107_v44 = vld [vmem:[%s6756_s5 + $0x418] sm:$0xff] }
  0x90   : > { %3544 = vmatprep.subr.bf16.mxu0 %v3543_v47  ;;  %3608 = vmatprep.subr.bf16.mxu1 %v3607_v48  ;;  %v3040_v47 = vld [vmem:[%s6757_s6 + $0x200] sm:$0xff]  ;;  %v3042_v48 = vld [vmem:[%s6757_s6 + $0x210] sm:$0xff]  ;;  %v3691_v50 = vpack.c.bf16 %v3107_v44, %v3105_v43  ;;  %v3125_v43 = vld [vmem:[%s6756_s5 + $0x4a8] sm:$0xff] }
  0x91   : > { %v3629_v57 = vpack.c.bf16 %v3042_v48, %v3040_v47  ;;  %v3127_v44 = vld [vmem:[%s6756_s5 + $0x4b8] sm:$0xff]  ;;  %v3060_v47 = vld [vmem:[%s6757_s6 + $0x2a0] sm:$0xff]  ;;  %v3062_v48 = vld [vmem:[%s6757_s6 + $0x2b0] sm:$0xff] }
  0x93   : > { %3546 = vmatpush1.bf16.msra.mxu0 %v3545_v55  ;;  %3610 = vmatpush1.bf16.msra.mxu1 %v3609_v56  ;;  %v3109_v55 = vld [vmem:[%s6756_s5 + $0x428] sm:$0xff]  ;;  %v3111_v56 = vld [vmem:[%s6756_s5 + $0x438] sm:$0xff] }
  0x94   : > { %3548 = vmatprep.subr.bf16.mxu0 %v3547_v59  ;;  %3612 = vmatprep.subr.bf16.mxu1 %v3611_v60  ;;  %v3044_v59 = vld [vmem:[%s6757_s6 + $0x220] sm:$0xff]  ;;  %v3046_v60 = vld [vmem:[%s6757_s6 + $0x230] sm:$0xff]  ;;  %v3695_v62 = vpack.c.bf16 %v3111_v56, %v3109_v55  ;;  %v3129_v55 = vld [vmem:[%s6756_s5 + $0x4c8] sm:$0xff] }
  0x95   : > { %v3633_v7 = vpack.c.bf16 %v3046_v60, %v3044_v59  ;;  %v3131_v56 = vld [vmem:[%s6756_s5 + $0x4d8] sm:$0xff]  ;;  %v3064_v59 = vld [vmem:[%s6757_s6 + $0x2c0] sm:$0xff]  ;;  %v3066_v60 = vld [vmem:[%s6757_s6 + $0x2d0] sm:$0xff] }
  0x97   : > { %3550 = vmatpush1.bf16.msra.mxu0 %v3549_v4  ;;  %3614 = vmatpush1.bf16.msra.mxu1 %v3613_v5  ;;  %v3113_v4 = vld [vmem:[%s6756_s5 + $0x448] sm:$0xff]  ;;  %v3115_v5 = vld [vmem:[%s6756_s5 + $0x458] sm:$0xff] }
  0x98   : > { %3552 = vmatprep.subr.bf16.mxu0 %v3551_v9  ;;  %3616 = vmatprep.subr.bf16.mxu1 %v3615_v10  ;;  %v3048_v9 = vld [vmem:[%s6757_s6 + $0x240] sm:$0xff]  ;;  %v3050_v10 = vld [vmem:[%s6757_s6 + $0x250] sm:$0xff]  ;;  %v3699_v3 = vpack.c.bf16 %v3115_v5, %v3113_v4  ;;  %v3133_v4 = vld [vmem:[%s6756_s5 + $0x4e8] sm:$0xff] }
  0x99   : > { %v3135_v5 = vld [vmem:[%s6756_s5 + $0x4f8] sm:$0xff] }
  0x9b   : > { %3554 = vmatpush1.bf16.msra.mxu0 %v3553_v17  ;;  %3618 = vmatpush1.bf16.msra.mxu1 %v3617_v18  ;;  %v3119_v17 = vld [vmem:[%s6756_s5 + $0x478] sm:$0xff]  ;;  %v3637_v18 = vpack.c.bf16 %v3050_v10, %v3048_v9  ;;  %v3068_v9 = vld [vmem:[%s6757_s6 + $0x2e0] sm:$0xff]  ;;  %v3070_v10 = vld [vmem:[%s6757_s6 + $0x2f0] sm:$0xff] }
  0x9c   : > { %3556 = vmatprep.subr.bf16.mxu0 %v3555_v19  ;;  %3620 = vmatprep.subr.bf16.mxu1 %v3619_v22  ;;  %v3054_v19 = vld [vmem:[%s6757_s6 + $0x270] sm:$0xff]  ;;  %v3639_v22 = vpack.c.bf16 %v3055_v15, %v3053_v14  ;;  %v3703_v23 = vpack.c.bf16 %v3119_v17, %v3117_v16  ;;  %v3073_v14 = vld [vmem:[%s6757_s6 + $0x308] sm:$0xff]  ;;  %v3075_v15 = vld [vmem:[%s6757_s6 + $0x318] sm:$0xff] }
  0x9d   : > { %v3137_v16 = vld [vmem:[%s6756_s5 + $0x508] sm:$0xff]  ;;  %v3139_v17 = vld [vmem:[%s6756_s5 + $0x518] sm:$0xff] }
  0x9f   : > { %3558 = vmatpush1.bf16.msra.mxu0 %v3557_v29  ;;  %3622 = vmatpush1.bf16.msra.mxu1 %v3621_v30  ;;  %v3641_v29 = vpack.c.bf16 %v3054_v19, %v3052_v21  ;;  %v3072_v21 = vld [vmem:[%s6757_s6 + $0x300] sm:$0xff]  ;;  %v3074_v19 = vld [vmem:[%s6757_s6 + $0x310] sm:$0xff] }
  0xa0   : > { %3560 = vmatprep.subr.bf16.mxu0 %v3559_v35  ;;  %3624 = vmatprep.subr.bf16.mxu1 %v3623_v36  ;;  %v3643_v35 = vpack.c.bf16 %v3059_v26, %v3057_v25  ;;  %v3707_v36 = vpack.c.bf16 %v3123_v28, %v3121_v27  ;;  %v3077_v25 = vld [vmem:[%s6757_s6 + $0x328] sm:$0xff]  ;;  %v3079_v26 = vld [vmem:[%s6757_s6 + $0x338] sm:$0xff] }
  0xa1   : > { %v3141_v27 = vld [vmem:[%s6756_s5 + $0x528] sm:$0xff]  ;;  %v3143_v28 = vld [vmem:[%s6756_s5 + $0x538] sm:$0xff] }
  0xa3   : > { %3562 = vmatpush1.bf16.msra.mxu0 %v3561_v45  ;;  %3626 = vmatpush1.bf16.msra.mxu1 %v3625_v46  ;;  %v3645_v45 = vpack.c.bf16 %v3058_v33, %v3056_v32  ;;  %v3709_v46 = vpack.c.bf16 %v3122_v38, %v3120_v37  ;;  %v3076_v32 = vld [vmem:[%s6757_s6 + $0x320] sm:$0xff]  ;;  %v3078_v33 = vld [vmem:[%s6757_s6 + $0x330] sm:$0xff] }
  0xa4   : > { %3628 = vmatprep.subr.bf16.mxu0 %v3627_v49  ;;  %3692 = vmatprep.subr.bf16.mxu1 %v3691_v50  ;;  %v3647_v49 = vpack.c.bf16 %v3063_v42, %v3061_v39  ;;  %v3711_v50 = vpack.c.bf16 %v3127_v44, %v3125_v43  ;;  %v3140_v37 = vld [vmem:[%s6756_s5 + $0x520] sm:$0xff]  ;;  %v3142_v38 = vld [vmem:[%s6756_s5 + $0x530] sm:$0xff]  ;;  %v3081_v39 = vld [vmem:[%s6757_s6 + $0x348] sm:$0xff] }
  0xa5   : > { %v3083_v42 = vld [vmem:[%s6757_s6 + $0x358] sm:$0xff]  ;;  %v3145_v43 = vld [vmem:[%s6756_s5 + $0x548] sm:$0xff] }
  0xa6   : > { %931 = vmatmul.mubr.f32.vlgmr.msra.gmra.mrb[2].mxu0 %v4680_v41  ;;  %1069 = vmatmul.mubr.f32.vlgmr.msra.gmra.mrb[2].mxu1 %v4680_v41  ;;  %v3112_v41 = vld [vmem:[%s6756_s5 + $0x440] sm:$0xff]  ;;  %v3147_v44 = vld [vmem:[%s6756_s5 + $0x558] sm:$0xff] }
  0xa7   : > { %3630 = vmatpush1.bf16.msra.mxu0 %v3629_v57  ;;  %3694 = vmatpush1.bf16.msra.mxu1 %v3693_v58  ;;  %v3701_v20 = vpack.c.bf16 %v3114_v12, %v3112_v41  ;;  %v3649_v57 = vpack.c.bf16 %v3062_v48, %v3060_v47  ;;  %v3713_v58 = vpack.c.bf16 %v3126_v52, %v3124_v51  ;;  %v3132_v41 = vld [vmem:[%s6756_s5 + $0x4e0] sm:$0xff]  ;;  %v3134_v12 = vld [vmem:[%s6756_s5 + $0x4f0] sm:$0xff] }
  0xa8   : > { %3632 = vmatprep.subr.bf16.mxu0 %v3631_v61  ;;  %3696 = vmatprep.subr.bf16.mxu1 %v3695_v62  ;;  %v3651_v61 = vpack.c.bf16 %v3067_v54, %v3065_v53  ;;  %v3715_v62 = vpack.c.bf16 %v3131_v56, %v3129_v55  ;;  %v3080_v47 = vld [vmem:[%s6757_s6 + $0x340] sm:$0xff]  ;;  %v3082_v48 = vld [vmem:[%s6757_s6 + $0x350] sm:$0xff]  ;;  %v3085_v53 = vld [vmem:[%s6757_s6 + $0x368] sm:$0xff] }
  0xa9   : > { %1207 = vmatprep.mubr.f32.mxu0 %v4660_v31  ;;  %1346 = vmatprep.mubr.f32.mxu1 %v4660_v31  ;;  %v3116_v31 = vld [vmem:[%s6756_s5 + $0x460] sm:$0xff]  ;;  %v3146_v52 = vld [vmem:[%s6756_s5 + $0x550] sm:$0xff]  ;;  %v3087_v54 = vld [vmem:[%s6757_s6 + $0x378] sm:$0xff] }
  0xaa   : > { %v3705_v30 = vpack.c.bf16 %v3118_v24, %v3116_v31  ;;  %v3136_v31 = vld [vmem:[%s6756_s5 + $0x500] sm:$0xff]  ;;  %v3138_v24 = vld [vmem:[%s6756_s5 + $0x510] sm:$0xff]  ;;  %v3149_v55 = vld [vmem:[%s6756_s5 + $0x568] sm:$0xff] }
  0xab   : > { %3634 = vmatpush1.bf16.msra.mxu0 %v3633_v7  ;;  %3698 = vmatpush1.bf16.msra.mxu1 %v3697_v8  ;;  %v3653_v7 = vpack.c.bf16 %v3066_v60, %v3064_v59  ;;  %v3717_v8 = vpack.c.bf16 %v3130_v0, %v3128_v63  ;;  %v3144_v51 = vld [vmem:[%s6756_s5 + $0x540] sm:$0xff]  ;;  %v3151_v56 = vld [vmem:[%s6756_s5 + $0x578] sm:$0xff]  ;;  %v3086_v60 = vld [vmem:[%s6757_s6 + $0x370] sm:$0xff] }
  0xac   : > { %3636 = vmatprep.subr.bf16.mxu0 %v3635_v11  ;;  %3700 = vmatprep.subr.bf16.mxu1 %v3699_v3  ;;  %v3655_v11 = vpack.c.bf16 %v3071_v2, %v3069_v1  ;;  %v3719_v3 = vpack.c.bf16 %v3135_v5, %v3133_v4  ;;  %v3084_v59 = vld [vmem:[%s6757_s6 + $0x360] sm:$0xff]  ;;  %v3150_v0 = vld [vmem:[%s6756_s5 + $0x570] sm:$0xff]  ;;  %v3089_v1 = vld [vmem:[%s6757_s6 + $0x388] sm:$0xff] }
  0xad   : > { %v3148_v63 = vld [vmem:[%s6756_s5 + $0x560] sm:$0xff]  ;;  %v3091_v2 = vld [vmem:[%s6757_s6 + $0x398] sm:$0xff]  ;;  %v3153_v4 = vld [vmem:[%s6756_s5 + $0x588] sm:$0xff] }
  0xae   : > { %v3155_v5 = vld [vmem:[%s6756_s5 + $0x598] sm:$0xff] }
  0xaf   : > { %3638 = vmatpush1.bf16.msra.mxu0 %v3637_v18  ;;  %3702 = vmatpush1.bf16.msra.mxu1 %v3701_v20  ;;  %v3657_v18 = vpack.c.bf16 %v3070_v10, %v3068_v9  ;;  %v3721_v20 = vpack.c.bf16 %v3134_v12, %v3132_v41  ;;  %v3088_v9 = vld [vmem:[%s6757_s6 + $0x380] sm:$0xff]  ;;  %v3090_v10 = vld [vmem:[%s6757_s6 + $0x390] sm:$0xff] }
  0xb0   : > { %3640 = vmatprep.subr.bf16.mxu0 %v3639_v22  ;;  %3704 = vmatprep.subr.bf16.mxu1 %v3703_v23  ;;  %v3659_v22 = vpack.c.bf16 %v3075_v15, %v3073_v14  ;;  %v3723_v23 = vpack.c.bf16 %v3139_v17, %v3137_v16  ;;  %v3152_v41 = vld [vmem:[%s6756_s5 + $0x580] sm:$0xff]  ;;  %v3154_v12 = vld [vmem:[%s6756_s5 + $0x590] sm:$0xff]  ;;  %v3093_v14 = vld [vmem:[%s6757_s6 + $0x3a8] sm:$0xff] }
  0xb1   : > { %v3095_v15 = vld [vmem:[%s6757_s6 + $0x3b8] sm:$0xff]  ;;  %v3157_v16 = vld [vmem:[%s6756_s5 + $0x5a8] sm:$0xff] }
  0xb2   : > { %v3159_v17 = vld [vmem:[%s6756_s5 + $0x5b8] sm:$0xff] }
  0xb3   : > { %3642 = vmatpush1.bf16.msra.mxu0 %v3641_v29  ;;  %3706 = vmatpush1.bf16.msra.mxu1 %v3705_v30  ;;  %v3661_v29 = vpack.c.bf16 %v3074_v19, %v3072_v21  ;;  %v3725_v30 = vpack.c.bf16 %v3138_v24, %v3136_v31  ;;  %v3092_v21 = vld [vmem:[%s6757_s6 + $0x3a0] sm:$0xff]  ;;  %v3094_v19 = vld [vmem:[%s6757_s6 + $0x3b0] sm:$0xff] }
  0xb4   : > { %3644 = vmatprep.subr.bf16.mxu0 %v3643_v35  ;;  %3708 = vmatprep.subr.bf16.mxu1 %v3707_v36  ;;  %v3663_v35 = vpack.c.bf16 %v3079_v26, %v3077_v25  ;;  %v3727_v36 = vpack.c.bf16 %v3143_v28, %v3141_v27  ;;  %v3156_v31 = vld [vmem:[%s6756_s5 + $0x5a0] sm:$0xff]  ;;  %v3158_v24 = vld [vmem:[%s6756_s5 + $0x5b0] sm:$0xff]  ;;  %v3097_v25 = vld [vmem:[%s6757_s6 + $0x3c8] sm:$0xff] }
  0xb5   : > { %v3099_v26 = vld [vmem:[%s6757_s6 + $0x3d8] sm:$0xff]  ;;  %v3161_v27 = vld [vmem:[%s6756_s5 + $0x5c8] sm:$0xff] }
  0xb6   : > { %v3163_v28 = vld [vmem:[%s6756_s5 + $0x5d8] sm:$0xff] }
  0xb7   : > { %3646 = vmatpush1.bf16.msra.mxu0 %v3645_v45  ;;  %3710 = vmatpush1.bf16.msra.mxu1 %v3709_v46  ;;  %v3665_v45 = vpack.c.bf16 %v3078_v33, %v3076_v32  ;;  %v3729_v46 = vpack.c.bf16 %v3142_v38, %v3140_v37  ;;  %v3096_v32 = vld [vmem:[%s6757_s6 + $0x3c0] sm:$0xff]  ;;  %v3098_v33 = vld [vmem:[%s6757_s6 + $0x3d0] sm:$0xff] }
  0xb8   : > { %3648 = vmatprep.subr.bf16.mxu0 %v3647_v49  ;;  %3712 = vmatprep.subr.bf16.mxu1 %v3711_v50  ;;  %v3667_v49 = vpack.c.bf16 %v3083_v42, %v3081_v39  ;;  %v3731_v50 = vpack.c.bf16 %v3147_v44, %v3145_v43  ;;  %v3160_v37 = vld [vmem:[%s6756_s5 + $0x5c0] sm:$0xff]  ;;  %v3162_v38 = vld [vmem:[%s6756_s5 + $0x5d0] sm:$0xff]  ;;  %v3101_v39 = vld [vmem:[%s6757_s6 + $0x3e8] sm:$0xff] }
  0xb9   : > { %v3103_v42 = vld [vmem:[%s6757_s6 + $0x3f8] sm:$0xff]  ;;  %v3165_v43 = vld [vmem:[%s6756_s5 + $0x5e8] sm:$0xff] }
  0xba   : > { %v3167_v44 = vld [vmem:[%s6756_s5 + $0x5f8] sm:$0xff] }
  0xbb   : > { %3650 = vmatpush1.bf16.msra.mxu0 %v3649_v57  ;;  %3714 = vmatpush1.bf16.msra.mxu1 %v3713_v58  ;;  %v3669_v57 = vpack.c.bf16 %v3082_v48, %v3080_v47  ;;  %v3733_v58 = vpack.c.bf16 %v3146_v52, %v3144_v51  ;;  %v3100_v47 = vld [vmem:[%s6757_s6 + $0x3e0] sm:$0xff]  ;;  %v3102_v48 = vld [vmem:[%s6757_s6 + $0x3f0] sm:$0xff] }
  0xbc   : > { %3652 = vmatprep.subr.bf16.mxu0 %v3651_v61  ;;  %3716 = vmatprep.subr.bf16.mxu1 %v3715_v62  ;;  %v3671_v61 = vpack.c.bf16 %v3087_v54, %v3085_v53  ;;  %v3735_v62 = vpack.c.bf16 %v3151_v56, %v3149_v55  ;;  %v3164_v51 = vld [vmem:[%s6756_s5 + $0x5e0] sm:$0xff]  ;;  %v3166_v52 = vld [vmem:[%s6756_s5 + $0x5f0] sm:$0xff]  ;;  %v3169_v53 = vld [vmem:[%s6757_s6 + $0x408] sm:$0xff] }
  0xbd   : > { %v3171_v54 = vld [vmem:[%s6757_s6 + $0x418] sm:$0xff]  ;;  %v3233_v55 = vld [vmem:[%s6756_s5 + $0x608] sm:$0xff] }
  0xbe   : > { %v3235_v56 = vld [vmem:[%s6756_s5 + $0x618] sm:$0xff] }
  0xbf   : > { %3654 = vmatpush1.bf16.msra.mxu0 %v3653_v7  ;;  %3718 = vmatpush1.bf16.msra.mxu1 %v3717_v8  ;;  %v3673_v7 = vpack.c.bf16 %v3086_v60, %v3084_v59  ;;  %v3737_v8 = vpack.c.bf16 %v3150_v0, %v3148_v63  ;;  %v3168_v59 = vld [vmem:[%s6757_s6 + $0x400] sm:$0xff]  ;;  %v3170_v60 = vld [vmem:[%s6757_s6 + $0x410] sm:$0xff] }
  0xc0   : > { %3656 = vmatprep.subr.bf16.mxu0 %v3655_v11  ;;  %3720 = vmatprep.subr.bf16.mxu1 %v3719_v3  ;;  %v3675_v11 = vpack.c.bf16 %v3091_v2, %v3089_v1  ;;  %v3739_v3 = vpack.c.bf16 %v3155_v5, %v3153_v4  ;;  %v3232_v63 = vld [vmem:[%s6756_s5 + $0x600] sm:$0xff]  ;;  %v3234_v0 = vld [vmem:[%s6756_s5 + $0x610] sm:$0xff]  ;;  %v3173_v1 = vld [vmem:[%s6757_s6 + $0x428] sm:$0xff] }
  0xc1   : > { %v3175_v2 = vld [vmem:[%s6757_s6 + $0x438] sm:$0xff]  ;;  %v3237_v4 = vld [vmem:[%s6756_s5 + $0x628] sm:$0xff] }
  0xc2   : > { %v3239_v5 = vld [vmem:[%s6756_s5 + $0x638] sm:$0xff] }
  0xc3   : > { %3658 = vmatpush1.bf16.msra.mxu0 %v3657_v18  ;;  %3722 = vmatpush1.bf16.msra.mxu1 %v3721_v20  ;;  %v3677_v18 = vpack.c.bf16 %v3090_v10, %v3088_v9  ;;  %v3741_v20 = vpack.c.bf16 %v3154_v12, %v3152_v41  ;;  %v3172_v9 = vld [vmem:[%s6757_s6 + $0x420] sm:$0xff]  ;;  %v3174_v10 = vld [vmem:[%s6757_s6 + $0x430] sm:$0xff] }
  0xc4   : > { %3660 = vmatprep.subr.bf16.mxu0 %v3659_v22  ;;  %3724 = vmatprep.subr.bf16.mxu1 %v3723_v23  ;;  %v3679_v22 = vpack.c.bf16 %v3095_v15, %v3093_v14  ;;  %v3743_v23 = vpack.c.bf16 %v3159_v17, %v3157_v16  ;;  %v3236_v41 = vld [vmem:[%s6756_s5 + $0x620] sm:$0xff]  ;;  %v3238_v12 = vld [vmem:[%s6756_s5 + $0x630] sm:$0xff]  ;;  %v3177_v14 = vld [vmem:[%s6757_s6 + $0x448] sm:$0xff] }
  0xc5   : > { %v3179_v15 = vld [vmem:[%s6757_s6 + $0x458] sm:$0xff]  ;;  %v3241_v16 = vld [vmem:[%s6756_s5 + $0x648] sm:$0xff] }
  0xc6   : > { %v3243_v17 = vld [vmem:[%s6756_s5 + $0x658] sm:$0xff] }
  0xc7   : > { %3662 = vmatpush1.bf16.msra.mxu0 %v3661_v29  ;;  %3726 = vmatpush1.bf16.msra.mxu1 %v3725_v30  ;;  %v3681_v29 = vpack.c.bf16 %v3094_v19, %v3092_v21  ;;  %v3745_v30 = vpack.c.bf16 %v3158_v24, %v3156_v31  ;;  %v3825_v21 = vpack.c.bf16 %v3238_v12, %v3236_v41  ;;  %v3176_v19 = vld [vmem:[%s6757_s6 + $0x440] sm:$0xff] }
  0xc8   : > { %3664 = vmatprep.subr.bf16.mxu0 %v3663_v35  ;;  %3728 = vmatprep.subr.bf16.mxu1 %v3727_v36  ;;  %v3683_v35 = vpack.c.bf16 %v3099_v26, %v3097_v25  ;;  %v3747_v36 = vpack.c.bf16 %v3163_v28, %v3161_v27  ;;  %v3827_v31 = vpack.c.bf16 %v3243_v17, %v3241_v16  ;;  %v3240_v24 = vld [vmem:[%s6756_s5 + $0x640] sm:$0xff]  ;;  %v3242_v25 = vld [vmem:[%s6756_s5 + $0x650] sm:$0xff]  ;;  %v3181_v26 = vld [vmem:[%s6757_s6 + $0x468] sm:$0xff] }
  0xc9   : > { %v3183_v27 = vld [vmem:[%s6757_s6 + $0x478] sm:$0xff]  ;;  %v3245_v28 = vld [vmem:[%s6756_s5 + $0x668] sm:$0xff] }
  0xca   : > { %v3197_v16 = vld [vmem:[%s6757_s6 + $0x4e8] sm:$0xff]  ;;  %v3199_v17 = vld [vmem:[%s6757_s6 + $0x4f8] sm:$0xff] }
  0xcb   : > { %3666 = vmatpush1.bf16.msra.mxu0 %v3665_v45  ;;  %3730 = vmatpush1.bf16.msra.mxu1 %v3729_v46  ;;  %v3685_v45 = vpack.c.bf16 %v3098_v33, %v3096_v32  ;;  %v3749_v46 = vpack.c.bf16 %v3162_v38, %v3160_v37  ;;  %v3829_v33 = vpack.c.bf16 %v3242_v25, %v3240_v24 }
  0xcc   : > { %3668 = vmatprep.subr.bf16.mxu0 %v3667_v49  ;;  %3732 = vmatprep.subr.bf16.mxu1 %v3731_v50  ;;  %v3687_v49 = vpack.c.bf16 %v3103_v42, %v3101_v39  ;;  %v3751_v50 = vpack.c.bf16 %v3167_v44, %v3165_v43  ;;  %v3767_v37 = vpack.c.bf16 %v3183_v27, %v3181_v26  ;;  %v3244_v39 = vld [vmem:[%s6756_s5 + $0x660] sm:$0xff]  ;;  %v3246_v42 = vld [vmem:[%s6756_s5 + $0x670] sm:$0xff]  ;;  %v3185_v43 = vld [vmem:[%s6757_s6 + $0x488] sm:$0xff] }
  0xcd   : > { %v3187_v44 = vld [vmem:[%s6757_s6 + $0x498] sm:$0xff]  ;;  %v3783_v24 = vpack.c.bf16 %v3199_v17, %v3197_v16  ;;  %v3260_v26 = vld [vmem:[%s6756_s5 + $0x6e0] sm:$0xff]  ;;  %v3262_v27 = vld [vmem:[%s6756_s5 + $0x6f0] sm:$0xff] }
  0xce   : > { %v3276_v16 = vld [vmem:[%s6756_s5 + $0x760] sm:$0xff]  ;;  %v3278_v17 = vld [vmem:[%s6756_s5 + $0x770] sm:$0xff] }
  0xcf   : > { %3670 = vmatpush1.bf16.msra.mxu0 %v3669_v57  ;;  %3734 = vmatpush1.bf16.msra.mxu1 %v3733_v58  ;;  %v3689_v57 = vpack.c.bf16 %v3102_v48, %v3100_v47  ;;  %v3753_v58 = vpack.c.bf16 %v3166_v52, %v3164_v51  ;;  %v3833_v48 = vpack.c.bf16 %v3246_v42, %v3244_v39 }
  0xd0   : > { %3672 = vmatprep.subr.bf16.mxu0 %v3671_v61  ;;  %3736 = vmatprep.subr.bf16.mxu1 %v3735_v62  ;;  %v3755_v61 = vpack.c.bf16 %v3171_v54, %v3169_v53  ;;  %v3819_v62 = vpack.c.bf16 %v3235_v56, %v3233_v55  ;;  %v3771_v51 = vpack.c.bf16 %v3187_v44, %v3185_v43  ;;  %v3248_v53 = vld [vmem:[%s6756_s5 + $0x680] sm:$0xff]  ;;  %v3250_v54 = vld [vmem:[%s6756_s5 + $0x690] sm:$0xff]  ;;  %v3189_v55 = vld [vmem:[%s6757_s6 + $0x4a8] sm:$0xff] }
  0xd1   : > { %v3191_v56 = vld [vmem:[%s6757_s6 + $0x4b8] sm:$0xff]  ;;  %v3264_v43 = vld [vmem:[%s6756_s5 + $0x700] sm:$0xff]  ;;  %v3266_v44 = vld [vmem:[%s6756_s5 + $0x710] sm:$0xff] }
  0xd3   : > { %3674 = vmatpush1.bf16.msra.mxu0 %v3673_v7  ;;  %3738 = vmatpush1.bf16.msra.mxu1 %v3737_v8  ;;  %v3757_v7 = vpack.c.bf16 %v3170_v60, %v3168_v59  ;;  %v3821_v8 = vpack.c.bf16 %v3234_v0, %v3232_v63  ;;  %v3837_v60 = vpack.c.bf16 %v3250_v54, %v3248_v53 }
  0xd4   : > { %3676 = vmatprep.subr.bf16.mxu0 %v3675_v11  ;;  %3740 = vmatprep.subr.bf16.mxu1 %v3739_v3  ;;  %v3759_v11 = vpack.c.bf16 %v3175_v2, %v3173_v1  ;;  %v3823_v3 = vpack.c.bf16 %v3239_v5, %v3237_v4  ;;  %v3775_v63 = vpack.c.bf16 %v3191_v56, %v3189_v55  ;;  %v3252_v1 = vld [vmem:[%s6756_s5 + $0x6a0] sm:$0xff]  ;;  %v3254_v2 = vld [vmem:[%s6756_s5 + $0x6b0] sm:$0xff]  ;;  %v3193_v4 = vld [vmem:[%s6757_s6 + $0x4c8] sm:$0xff] }
  0xd5   : > { %v3195_v5 = vld [vmem:[%s6757_s6 + $0x4d8] sm:$0xff]  ;;  %v3268_v55 = vld [vmem:[%s6756_s5 + $0x720] sm:$0xff]  ;;  %v3270_v56 = vld [vmem:[%s6756_s5 + $0x730] sm:$0xff] }
  0xd6   : > { %v3779_v41 = vpack.c.bf16 %v3195_v5, %v3193_v4  ;;  %v3272_v4 = vld [vmem:[%s6756_s5 + $0x740] sm:$0xff]  ;;  %v3274_v5 = vld [vmem:[%s6756_s5 + $0x750] sm:$0xff] }
  0xd7   : > { %3678 = vmatpush1.bf16.msra.mxu0 %v3677_v18  ;;  %3742 = vmatpush1.bf16.msra.mxu1 %v3741_v20  ;;  %v5477_v18 = vld [vmem:[#allocation3] sm:$0xff]  ;;  %v3761_v20 = vpack.c.bf16 %v3174_v10, %v3172_v9  ;;  %v3841_v10 = vpack.c.bf16 %v3254_v2, %v3252_v1 }
  0xd8   : > { %3680 = vmatprep.subr.bf16.mxu0 %v3679_v22  ;;  %3744 = vmatprep.subr.bf16.mxu1 %v3743_v23  ;;  %v3178_v22 = vld [vmem:[%s6757_s6 + $0x450] sm:$0xff]  ;;  %v3763_v23 = vpack.c.bf16 %v3179_v15, %v3177_v14  ;;  %v3256_v14 = vld [vmem:[%s6756_s5 + $0x6c0] sm:$0xff] }
  0xd9   : > { %v3765_v32 = vpack.c.bf16 %v3178_v22, %v3176_v19  ;;  %v3258_v15 = vld [vmem:[%s6756_s5 + $0x6d0] sm:$0xff] }
  0xda   : > { %v3845_v22 = vpack.c.bf16 %v3258_v15, %v3256_v14 }
  0xdb   : > { %3682 = vmatpush1.bf16.msra.mxu0 %v3681_v29  ;;  %3746 = vmatpush1.bf16.msra.mxu1 %v3745_v30  ;;  %v3247_v29 = vld [vmem:[%s6756_s5 + $0x678] sm:$0xff]  ;;  %v5505_v30 = vld [vmem:[#allocation3 + $0x8] sm:$0xff] }
  0xdc   : > { %3684 = vmatprep.subr.bf16.mxu0 %v3683_v35  ;;  %3748 = vmatprep.subr.bf16.mxu1 %v3747_v36  ;;  %v3180_v35 = vld [vmem:[%s6757_s6 + $0x460] sm:$0xff]  ;;  %v3182_v36 = vld [vmem:[%s6757_s6 + $0x470] sm:$0xff]  ;;  %v3831_v38 = vpack.c.bf16 %v3247_v29, %v3245_v28  ;;  %v3201_v28 = vld [vmem:[%s6757_s6 + $0x508] sm:$0xff] }
  0xdd   : > { %v3769_v47 = vpack.c.bf16 %v3182_v36, %v3180_v35  ;;  %v3203_v29 = vld [vmem:[%s6757_s6 + $0x518] sm:$0xff]  ;;  %v3849_v36 = vpack.c.bf16 %v3262_v27, %v3260_v26 }
  0xde   : > { %v3787_v39 = vpack.c.bf16 %v3203_v29, %v3201_v28  ;;  %v3280_v28 = vld [vmem:[%s6756_s5 + $0x780] sm:$0xff]  ;;  %v3282_v29 = vld [vmem:[%s6756_s5 + $0x790] sm:$0xff] }
  0xdf   : > { %3686 = vmatpush1.bf16.msra.mxu0 %v3685_v45  ;;  %3750 = vmatpush1.bf16.msra.mxu1 %v3749_v46  ;;  %v3249_v45 = vld [vmem:[%s6756_s5 + $0x688] sm:$0xff]  ;;  %v3251_v46 = vld [vmem:[%s6756_s5 + $0x698] sm:$0xff] }
  0xe0   : > { %3688 = vmatprep.subr.bf16.mxu0 %v3687_v49  ;;  %3752 = vmatprep.subr.bf16.mxu1 %v3751_v50  ;;  %v3184_v49 = vld [vmem:[%s6757_s6 + $0x480] sm:$0xff]  ;;  %v3186_v50 = vld [vmem:[%s6757_s6 + $0x490] sm:$0xff]  ;;  %v3835_v52 = vpack.c.bf16 %v3251_v46, %v3249_v45  ;;  %v3205_v45 = vld [vmem:[%s6757_s6 + $0x528] sm:$0xff] }
  0xe1   : > { %v3773_v59 = vpack.c.bf16 %v3186_v50, %v3184_v49  ;;  %v3207_v46 = vld [vmem:[%s6757_s6 + $0x538] sm:$0xff]  ;;  %v3853_v50 = vpack.c.bf16 %v3266_v44, %v3264_v43 }
  0xe2   : > { %v3791_v53 = vpack.c.bf16 %v3207_v46, %v3205_v45  ;;  %v3284_v45 = vld [vmem:[%s6756_s5 + $0x7a0] sm:$0xff]  ;;  %v3286_v46 = vld [vmem:[%s6756_s5 + $0x7b0] sm:$0xff] }
  0xe3   : > { %3690 = vmatpush1.bf16.msra.mxu0 %v3689_v57  ;;  %3754 = vmatpush1.bf16.msra.mxu1 %v3753_v58  ;;  %v3253_v57 = vld [vmem:[%s6756_s5 + $0x6a8] sm:$0xff]  ;;  %v3255_v58 = vld [vmem:[%s6756_s5 + $0x6b8] sm:$0xff] }
  0xe4   : > { %3756 = vmatprep.subr.bf16.mxu0 %v3755_v61  ;;  %3820 = vmatprep.subr.bf16.mxu1 %v3819_v62  ;;  %v3188_v61 = vld [vmem:[%s6757_s6 + $0x4a0] sm:$0xff]  ;;  %v3190_v62 = vld [vmem:[%s6757_s6 + $0x4b0] sm:$0xff]  ;;  %v3839_v0 = vpack.c.bf16 %v3255_v58, %v3253_v57  ;;  %v3209_v57 = vld [vmem:[%s6757_s6 + $0x548] sm:$0xff] }
  0xe5   : > { %v3777_v9 = vpack.c.bf16 %v3190_v62, %v3188_v61  ;;  %v3211_v58 = vld [vmem:[%s6757_s6 + $0x558] sm:$0xff]  ;;  %v3857_v62 = vpack.c.bf16 %v3270_v56, %v3268_v55 }
  0xe6   : > { %1208 = vmatmul.mubr.f32.vlgmr.msra.gmra.mrb[4].mxu0 %v5477_v18  ;;  %1347 = vmatmul.mubr.f32.vlgmr.msra.gmra.mrb[4].mxu1 %v5477_v18  ;;  %v3795_v1 = vpack.c.bf16 %v3211_v58, %v3209_v57  ;;  %v3288_v57 = vld [vmem:[%s6756_s5 + $0x7c0] sm:$0xff]  ;;  %v3290_v58 = vld [vmem:[%s6756_s5 + $0x7d0] sm:$0xff] }
  0xe7   : > { %3758 = vmatpush1.bf16.msra.mxu0 %v3757_v7  ;;  %3822 = vmatpush1.bf16.msra.mxu1 %v3821_v8  ;;  %v3257_v7 = vld [vmem:[%s6756_s5 + $0x6c8] sm:$0xff]  ;;  %v3259_v8 = vld [vmem:[%s6756_s5 + $0x6d8] sm:$0xff] }
  0xe8   : > { %3760 = vmatprep.subr.bf16.mxu0 %v3759_v11  ;;  %3824 = vmatprep.subr.bf16.mxu1 %v3823_v3  ;;  %v3192_v11 = vld [vmem:[%s6757_s6 + $0x4c0] sm:$0xff]  ;;  %v3194_v3 = vld [vmem:[%s6757_s6 + $0x4d0] sm:$0xff]  ;;  %v3843_v12 = vpack.c.bf16 %v3259_v8, %v3257_v7  ;;  %v3213_v7 = vld [vmem:[%s6757_s6 + $0x568] sm:$0xff] }
  0xe9   : > { %1485 = vmatprep.mubr.f32.mxu0 %v5505_v30  ;;  %1624 = vmatprep.mubr.f32.mxu1 %v5505_v30  ;;  %v3781_v19 = vpack.c.bf16 %v3194_v3, %v3192_v11  ;;  %v3215_v8 = vld [vmem:[%s6757_s6 + $0x578] sm:$0xff]  ;;  %v3861_v3 = vpack.c.bf16 %v3274_v5, %v3272_v4  ;;  %v3230_v5 = vld [vmem:[%s6757_s6 + $0x5f0] sm:$0xff] }
  0xea   : > { %v3799_v14 = vpack.c.bf16 %v3215_v8, %v3213_v7  ;;  %v3292_v7 = vld [vmem:[%s6756_s5 + $0x7e0] sm:$0xff]  ;;  %v3294_v8 = vld [vmem:[%s6756_s5 + $0x7f0] sm:$0xff] }
  0xeb   : > { %3762 = vmatpush1.bf16.msra.mxu0 %v3761_v20  ;;  %3826 = vmatpush1.bf16.msra.mxu1 %v3825_v21  ;;  %v3261_v20 = vld [vmem:[%s6756_s5 + $0x6e8] sm:$0xff]  ;;  %v3263_v21 = vld [vmem:[%s6756_s5 + $0x6f8] sm:$0xff] }
  0xec   : > { %3764 = vmatprep.subr.bf16.mxu0 %v3763_v23  ;;  %3828 = vmatprep.subr.bf16.mxu1 %v3827_v31  ;;  %v3196_v23 = vld [vmem:[%s6757_s6 + $0x4e0] sm:$0xff]  ;;  %v3198_v31 = vld [vmem:[%s6757_s6 + $0x4f0] sm:$0xff]  ;;  %v3847_v25 = vpack.c.bf16 %v3263_v21, %v3261_v20  ;;  %v3217_v20 = vld [vmem:[%s6757_s6 + $0x588] sm:$0xff] }
  0xed   : > { %v3785_v35 = vpack.c.bf16 %v3198_v31, %v3196_v23  ;;  %v3219_v21 = vld [vmem:[%s6757_s6 + $0x598] sm:$0xff]  ;;  %v3865_v31 = vpack.c.bf16 %v3278_v17, %v3276_v16 }
  0xee   : > { %v3803_v26 = vpack.c.bf16 %v3219_v21, %v3217_v20  ;;  %v3303_v16 = vld [vmem:[%s6757_s6 + $0x638] sm:$0xff]  ;;  %v3300_v21 = vld [vmem:[%s6757_s6 + $0x620] sm:$0xff] }
  0xef   : > { %3766 = vmatpush1.bf16.msra.mxu0 %v3765_v32  ;;  %3830 = vmatpush1.bf16.msra.mxu1 %v3829_v33  ;;  %v3265_v32 = vld [vmem:[%s6756_s5 + $0x708] sm:$0xff]  ;;  %v3267_v33 = vld [vmem:[%s6756_s5 + $0x718] sm:$0xff] }
  0xf0   : > { %3768 = vmatprep.subr.bf16.mxu0 %v3767_v37  ;;  %3832 = vmatprep.subr.bf16.mxu1 %v3831_v38  ;;  %v3200_v37 = vld [vmem:[%s6757_s6 + $0x500] sm:$0xff]  ;;  %v3202_v38 = vld [vmem:[%s6757_s6 + $0x510] sm:$0xff]  ;;  %v3851_v42 = vpack.c.bf16 %v3267_v33, %v3265_v32  ;;  %v3221_v32 = vld [vmem:[%s6757_s6 + $0x5a8] sm:$0xff] }
  0xf1   : > { %v3789_v49 = vpack.c.bf16 %v3202_v38, %v3200_v37  ;;  %v3223_v33 = vld [vmem:[%s6757_s6 + $0x5b8] sm:$0xff]  ;;  %v3869_v38 = vpack.c.bf16 %v3282_v29, %v3280_v28 }
  0xf2   : > { %v3807_v43 = vpack.c.bf16 %v3223_v33, %v3221_v32  ;;  %v3311_v28 = vld [vmem:[%s6757_s6 + $0x678] sm:$0xff]  ;;  %v3308_v32 = vld [vmem:[%s6757_s6 + $0x660] sm:$0xff]  ;;  %v3310_v33 = vld [vmem:[%s6757_s6 + $0x670] sm:$0xff] }
  0xf3   : > { %3770 = vmatpush1.bf16.msra.mxu0 %v3769_v47  ;;  %3834 = vmatpush1.bf16.msra.mxu1 %v3833_v48  ;;  %v3269_v47 = vld [vmem:[%s6756_s5 + $0x728] sm:$0xff]  ;;  %v3271_v48 = vld [vmem:[%s6756_s5 + $0x738] sm:$0xff] }
  0xf4   : > { %3772 = vmatprep.subr.bf16.mxu0 %v3771_v51  ;;  %3836 = vmatprep.subr.bf16.mxu1 %v3835_v52  ;;  %v3204_v51 = vld [vmem:[%s6757_s6 + $0x520] sm:$0xff]  ;;  %v3206_v52 = vld [vmem:[%s6757_s6 + $0x530] sm:$0xff]  ;;  %v3855_v54 = vpack.c.bf16 %v3271_v48, %v3269_v47  ;;  %v3225_v47 = vld [vmem:[%s6757_s6 + $0x5c8] sm:$0xff] }
  0xf5   : > { %v3793_v61 = vpack.c.bf16 %v3206_v52, %v3204_v51  ;;  %v3227_v48 = vld [vmem:[%s6757_s6 + $0x5d8] sm:$0xff]  ;;  %v3873_v52 = vpack.c.bf16 %v3286_v46, %v3284_v45  ;;  %v554_v46 = vld [vmem:[%s6755_s4] sm:$0x3] }
  0xf6   : > { %v3811_v55 = vpack.c.bf16 %v3227_v48, %v3225_v47  ;;  %v3316_v48 = vld [vmem:[%s6757_s6 + $0x6a0] sm:$0xff] }
  0xf7   : > { %3774 = vmatpush1.bf16.msra.mxu0 %v3773_v59  ;;  %3838 = vmatpush1.bf16.msra.mxu1 %v3837_v60  ;;  %v3273_v59 = vld [vmem:[%s6756_s5 + $0x748] sm:$0xff]  ;;  %v3275_v60 = vld [vmem:[%s6756_s5 + $0x758] sm:$0xff] }
  0xf8   : > { %3776 = vmatprep.subr.bf16.mxu0 %v3775_v63  ;;  %3840 = vmatprep.subr.bf16.mxu1 %v3839_v0  ;;  %v3208_v63 = vld [vmem:[%s6757_s6 + $0x540] sm:$0xff]  ;;  %v3210_v0 = vld [vmem:[%s6757_s6 + $0x550] sm:$0xff]  ;;  %v3859_v2 = vpack.c.bf16 %v3275_v60, %v3273_v59  ;;  %v3229_v59 = vld [vmem:[%s6757_s6 + $0x5e8] sm:$0xff] }
  0xf9   : > { %v3797_v11 = vpack.c.bf16 %v3210_v0, %v3208_v63  ;;  %v3231_v60 = vld [vmem:[%s6757_s6 + $0x5f8] sm:$0xff]  ;;  %v3877_v0 = vpack.c.bf16 %v3290_v58, %v3288_v57  ;;  %v3322_v57 = vld [vmem:[%s6757_s6 + $0x6d0] sm:$0xff] }
  0xfb   : > { %3778 = vmatpush1.bf16.msra.mxu0 %v3777_v9  ;;  %3842 = vmatpush1.bf16.msra.mxu1 %v3841_v10  ;;  %v3277_v9 = vld [vmem:[%s6756_s5 + $0x768] sm:$0xff]  ;;  %v3279_v10 = vld [vmem:[%s6756_s5 + $0x778] sm:$0xff] }
  0xfc   : > { %3780 = vmatprep.subr.bf16.mxu0 %v3779_v41  ;;  %3844 = vmatprep.subr.bf16.mxu1 %v3843_v12  ;;  %v3212_v41 = vld [vmem:[%s6757_s6 + $0x560] sm:$0xff]  ;;  %v3214_v12 = vld [vmem:[%s6757_s6 + $0x570] sm:$0xff]  ;;  %v3863_v15 = vpack.c.bf16 %v3279_v10, %v3277_v9  ;;  %v3297_v9 = vld [vmem:[%s6757_s6 + $0x608] sm:$0xff] }
  0xfd   : > { %v3801_v23 = vpack.c.bf16 %v3214_v12, %v3212_v41  ;;  %v3299_v10 = vld [vmem:[%s6757_s6 + $0x618] sm:$0xff]  ;;  %v3296_v12 = vld [vmem:[%s6757_s6 + $0x600] sm:$0xff] }
  0xfe   : > { %v3883_v41 = vpack.c.bf16 %v3299_v10, %v3297_v9  ;;  %v3329_v10 = vld [vmem:[%s6757_s6 + $0x708] sm:$0xff] }
  0xff   : > { %3782 = vmatpush1.bf16.msra.mxu0 %v3781_v19  ;;  %3846 = vmatpush1.bf16.msra.mxu1 %v3845_v22  ;;  %v3281_v19 = vld [vmem:[%s6756_s5 + $0x788] sm:$0xff]  ;;  %v3283_v22 = vld [vmem:[%s6756_s5 + $0x798] sm:$0xff] }
 0x100   : > { %3784 = vmatprep.subr.bf16.mxu0 %v3783_v24  ;;  %3848 = vmatprep.subr.bf16.mxu1 %v3847_v25  ;;  %v3216_v24 = vld [vmem:[%s6757_s6 + $0x580] sm:$0xff]  ;;  %v3218_v25 = vld [vmem:[%s6757_s6 + $0x590] sm:$0xff]  ;;  %v3867_v27 = vpack.c.bf16 %v3283_v22, %v3281_v19  ;;  %v3305_v22 = vld [vmem:[%s6757_s6 + $0x648] sm:$0xff] }
 0x101   : > { %v3805_v37 = vpack.c.bf16 %v3218_v25, %v3216_v24  ;;  %v3302_v19 = vld [vmem:[%s6757_s6 + $0x630] sm:$0xff]  ;;  %v3304_v25 = vld [vmem:[%s6757_s6 + $0x640] sm:$0xff] }
 0x103   : > { %3786 = vmatpush1.bf16.msra.mxu0 %v3785_v35  ;;  %3850 = vmatpush1.bf16.msra.mxu1 %v3849_v36  ;;  %v3285_v35 = vld [vmem:[%s6756_s5 + $0x7a8] sm:$0xff]  ;;  %v3287_v36 = vld [vmem:[%s6756_s5 + $0x7b8] sm:$0xff] }
 0x104   : > { %3788 = vmatprep.subr.bf16.mxu0 %v3787_v39  ;;  %3852 = vmatprep.subr.bf16.mxu1 %v3851_v42  ;;  %v3220_v39 = vld [vmem:[%s6757_s6 + $0x5a0] sm:$0xff]  ;;  %v3222_v42 = vld [vmem:[%s6757_s6 + $0x5b0] sm:$0xff]  ;;  %v3871_v44 = vpack.c.bf16 %v3287_v36, %v3285_v35  ;;  %v3313_v35 = vld [vmem:[%s6757_s6 + $0x688] sm:$0xff] }
 0x105   : > { %v3809_v51 = vpack.c.bf16 %v3222_v42, %v3220_v39  ;;  %v3315_v36 = vld [vmem:[%s6757_s6 + $0x698] sm:$0xff]  ;;  %v3312_v39 = vld [vmem:[%s6757_s6 + $0x680] sm:$0xff]  ;;  %v3314_v42 = vld [vmem:[%s6757_s6 + $0x690] sm:$0xff] }
 0x106   : > { %v3901_v45 = vpack.c.bf16 %v3314_v42, %v3312_v39  ;;  %v3345_v39 = vld [vmem:[%s6757_s6 + $0x788] sm:$0xff]  ;;  %v3347_v42 = vld [vmem:[%s6757_s6 + $0x798] sm:$0xff] }
 0x107   : > { %3790 = vmatpush1.bf16.msra.mxu0 %v3789_v49  ;;  %3854 = vmatpush1.bf16.msra.mxu1 %v3853_v50  ;;  %v3289_v49 = vld [vmem:[%s6756_s5 + $0x7c8] sm:$0xff]  ;;  %v3291_v50 = vld [vmem:[%s6756_s5 + $0x7d8] sm:$0xff] }
 0x108   : > { %3792 = vmatprep.subr.bf16.mxu0 %v3791_v53  ;;  %3856 = vmatprep.subr.bf16.mxu1 %v3855_v54  ;;  %v3224_v53 = vld [vmem:[%s6757_s6 + $0x5c0] sm:$0xff]  ;;  %v3226_v54 = vld [vmem:[%s6757_s6 + $0x5d0] sm:$0xff]  ;;  %v3875_v56 = vpack.c.bf16 %v3291_v50, %v3289_v49  ;;  %v3321_v50 = vld [vmem:[%s6757_s6 + $0x6c8] sm:$0xff] }
 0x109   : > { %v3813_v63 = vpack.c.bf16 %v3226_v54, %v3224_v53  ;;  %v3318_v49 = vld [vmem:[%s6757_s6 + $0x6b0] sm:$0xff]  ;;  %v563_v53 = vrot.slane %v554_v46, %v4461_v34 }
 0x10a   : > { %v3905_v54 = vpack.c.bf16 %v3318_v49, %v3316_v48  ;;  %v3346_v48 = vld [vmem:[%s6757_s6 + $0x790] sm:$0xff]  ;;  %v3349_v49 = vld [vmem:[%s6757_s6 + $0x7a8] sm:$0xff] }
 0x10b   : > { %3794 = vmatpush1.bf16.msra.mxu0 %v3793_v61  ;;  %3858 = vmatpush1.bf16.msra.mxu1 %v3857_v62  ;;  %v3293_v61 = vld [vmem:[%s6756_s5 + $0x7e8] sm:$0xff]  ;;  %v3295_v62 = vld [vmem:[%s6756_s5 + $0x7f8] sm:$0xff] }
 0x10c   : > { %3796 = vmatprep.subr.bf16.mxu0 %v3795_v1  ;;  %3860 = vmatprep.subr.bf16.mxu1 %v3859_v2  ;;  %v3228_v1 = vld [vmem:[%s6757_s6 + $0x5e0] sm:$0xff]  ;;  %v3815_v2 = vpack.c.bf16 %v3231_v60, %v3229_v59  ;;  %v3879_v4 = vpack.c.bf16 %v3295_v62, %v3293_v61  ;;  %v3325_v59 = vld [vmem:[%s6757_s6 + $0x6e8] sm:$0xff]  ;;  %v3327_v60 = vld [vmem:[%s6757_s6 + $0x6f8] sm:$0xff] }
 0x10f   : > { %3798 = vmatpush1.bf16.msra.mxu0 %v3797_v11  ;;  %3862 = vmatpush1.bf16.msra.mxu1 %v3861_v3  ;;  %v3817_v11 = vpack.c.bf16 %v3230_v5, %v3228_v1  ;;  %v3881_v3 = vpack.c.bf16 %v3294_v8, %v3292_v7  ;;  %v3911_v5 = vpack.c.bf16 %v3327_v60, %v3325_v59  ;;  %v3324_v7 = vld [vmem:[%s6757_s6 + $0x6e0] sm:$0xff]  ;;  %v3326_v8 = vld [vmem:[%s6757_s6 + $0x6f0] sm:$0xff]  ;;  %v3353_v60 = vld [vmem:[%s6757_s6 + $0x7c8] sm:$0xff] }
 0x110   : > { %3800 = vmatprep.subr.bf16.mxu0 %v3799_v14  ;;  %3864 = vmatprep.subr.bf16.mxu1 %v3863_v15  ;;  %v3298_v14 = vld [vmem:[%s6757_s6 + $0x610] sm:$0xff]  ;;  %v3301_v15 = vld [vmem:[%s6757_s6 + $0x628] sm:$0xff] }
 0x111   : > { %v3885_v17 = vpack.c.bf16 %v3298_v14, %v3296_v12  ;;  %v3887_v20 = vpack.c.bf16 %v3303_v16, %v3301_v15  ;;  %v3328_v12 = vld [vmem:[%s6757_s6 + $0x700] sm:$0xff]  ;;  %v3330_v14 = vld [vmem:[%s6757_s6 + $0x710] sm:$0xff]  ;;  %v3333_v15 = vld [vmem:[%s6757_s6 + $0x728] sm:$0xff] }
 0x112   : > { %v3335_v16 = vld [vmem:[%s6757_s6 + $0x738] sm:$0xff] }
 0x113   : > { %3802 = vmatpush1.bf16.msra.mxu0 %v3801_v23  ;;  %3866 = vmatpush1.bf16.msra.mxu1 %v3865_v31  ;;  %v3307_v23 = vld [vmem:[%s6757_s6 + $0x658] sm:$0xff]  ;;  %v3889_v31 = vpack.c.bf16 %v3302_v19, %v3300_v21  ;;  %v3332_v21 = vld [vmem:[%s6757_s6 + $0x720] sm:$0xff]  ;;  %v3334_v19 = vld [vmem:[%s6757_s6 + $0x730] sm:$0xff] }
 0x114   : > { %3804 = vmatprep.subr.bf16.mxu0 %v3803_v26  ;;  %3868 = vmatprep.subr.bf16.mxu1 %v3867_v27  ;;  %v3891_v24 = vpack.c.bf16 %v3307_v23, %v3305_v22  ;;  %v3306_v26 = vld [vmem:[%s6757_s6 + $0x650] sm:$0xff]  ;;  %v3309_v27 = vld [vmem:[%s6757_s6 + $0x668] sm:$0xff]  ;;  %v3339_v23 = vld [vmem:[%s6757_s6 + $0x758] sm:$0xff] }
 0x115   : > { %v3895_v29 = vpack.c.bf16 %v3311_v28, %v3309_v27  ;;  %v3337_v22 = vld [vmem:[%s6757_s6 + $0x748] sm:$0xff]  ;;  %v3338_v27 = vld [vmem:[%s6757_s6 + $0x750] sm:$0xff] }
 0x117   : > { %3806 = vmatpush1.bf16.msra.mxu0 %v3805_v37  ;;  %3870 = vmatpush1.bf16.msra.mxu1 %v3869_v38  ;;  %v3897_v37 = vpack.c.bf16 %v3310_v33, %v3308_v32  ;;  %v3899_v38 = vpack.c.bf16 %v3315_v36, %v3313_v35  ;;  %v3343_v32 = vld [vmem:[%s6757_s6 + $0x778] sm:$0xff] }
 0x118   : > { %3808 = vmatprep.subr.bf16.mxu0 %v3807_v43  ;;  %3872 = vmatprep.subr.bf16.mxu1 %v3871_v44  ;;  %v3317_v43 = vld [vmem:[%s6757_s6 + $0x6a8] sm:$0xff]  ;;  %v3319_v44 = vld [vmem:[%s6757_s6 + $0x6b8] sm:$0xff] }
 0x119   : > { %v3903_v47 = vpack.c.bf16 %v3319_v44, %v3317_v43 }
 0x11b   : > { %3810 = vmatpush1.bf16.msra.mxu0 %v3809_v51  ;;  %3874 = vmatpush1.bf16.msra.mxu1 %v3873_v52  ;;  %v3323_v51 = vld [vmem:[%s6757_s6 + $0x6d8] sm:$0xff]  ;;  %v559_v52 = vrot.slane %v554_v46, %v4479_v40  ;;  %v3931_v46 = vpack.c.bf16 %v3347_v42, %v3345_v39 }
 0x11c   : > { %3812 = vmatprep.subr.bf16.mxu0 %v3811_v55  ;;  %3876 = vmatprep.subr.bf16.mxu1 %v3875_v56  ;;  %v3907_v55 = vpack.c.bf16 %v3323_v51, %v3321_v50  ;;  %v3320_v56 = vld [vmem:[%s6757_s6 + $0x6c0] sm:$0xff]  ;;  %v3351_v50 = vld [vmem:[%s6757_s6 + $0x7b8] sm:$0xff] }
 0x11f   : > { %3814 = vmatpush1.bf16.msra.mxu0 %v3813_v63  ;;  %3878 = vmatpush1.bf16.msra.mxu1 %v3877_v0 }
 0x120   : > { %3816 = vmatprep.subr.bf16.mxu0 %v3815_v2  ;;  %3880 = vmatprep.subr.bf16.mxu1 %v3879_v4  ;;  %v3909_v2 = vpack.c.bf16 %v3322_v57, %v3320_v56  ;;  %v3935_v56 = vpack.c.bf16 %v3351_v50, %v3349_v49  ;;  %v3348_v57 = vld [vmem:[%s6757_s6 + $0x7a0] sm:$0xff] }
 0x123   : > { %3818 = vmatpush1.bf16.msra.mxu0 %v3817_v11  ;;  %3882 = vmatpush1.bf16.msra.mxu1 %v3881_v3  ;;  %v3331_v11 = vld [vmem:[%s6757_s6 + $0x718] sm:$0xff]  ;;  %v3913_v3 = vpack.c.bf16 %v3326_v8, %v3324_v7 }
 0x124   : > { %3884 = vmatprep.subr.bf16.mxu0 %v3883_v41  ;;  %v3915_v41 = vpack.c.bf16 %v3331_v11, %v3329_v10  ;;  %v3352_v10 = vld [vmem:[%s6757_s6 + $0x7c0] sm:$0xff]  ;;  %v3354_v11 = vld [vmem:[%s6757_s6 + $0x7d0] sm:$0xff] }
 0x126   : > { %1486 = vmatmul.mubr.f32.vlgmr.msra.gmra.mrb[6].mxu0 %v5477_v18  ;;  %1625 = vmatmul.mubr.f32.vlgmr.msra.gmra.mrb[6].mxu1 %v5477_v18 }
 0x127   : > { %3886 = vmatpush1.bf16.msra.mxu0 %v3885_v17  ;;  %1763 = vmatprep.mubr.f32.mxu0 %v5505_v30  ;;  %v3893_v30 = vpack.c.bf16 %v3306_v26, %v3304_v25  ;;  %v3917_v17 = vpack.c.bf16 %v3330_v14, %v3328_v12  ;;  %v3923_v25 = vpack.c.bf16 %v3339_v23, %v3337_v22  ;;  %v3336_v26 = vld [vmem:[%s6757_s6 + $0x740] sm:$0xff]  ;;  %v3357_v12 = vld [vmem:[%s6757_s6 + $0x7e8] sm:$0xff]  ;;  %v3359_v14 = vld [vmem:[%s6757_s6 + $0x7f8] sm:$0xff] }
 0x128   : > { %3888 = vmatprep.subr.bf16.mxu0 %v3887_v20  ;;  %v3919_v20 = vpack.c.bf16 %v3335_v16, %v3333_v15  ;;  %v3925_v35 = vpack.c.bf16 %v3338_v27, %v3336_v26  ;;  %v3941_v16 = vpack.c.bf16 %v3354_v11, %v3352_v10  ;;  %v6085_v11 = vld [vmem:[%s6758_s7 + $0x4] sm:$0x3] }
 0x12b   : > { %3890 = vmatpush1.bf16.msra.mxu0 %v3889_v31  ;;  %v3921_v31 = vpack.c.bf16 %v3334_v19, %v3332_v21 }
 0x12c   : > { %3892 = vmatprep.subr.bf16.mxu0 %v3891_v24 }
 0x12f   : > { %3894 = vmatpush1.bf16.msra.mxu0 %v3893_v30 }
 0x130   : > { %3896 = vmatprep.subr.bf16.mxu0 %v3895_v29  ;;  %v3341_v29 = vld [vmem:[%s6757_s6 + $0x768] sm:$0xff] }
 0x131   : > { %v3927_v36 = vpack.c.bf16 %v3343_v32, %v3341_v29 }
 0x133   : > { %3898 = vmatpush1.bf16.msra.mxu0 %v3897_v37  ;;  %v3340_v37 = vld [vmem:[%s6757_s6 + $0x760] sm:$0xff] }
 0x134   : > { %3900 = vmatprep.subr.bf16.mxu0 %v3899_v38  ;;  %v3342_v38 = vld [vmem:[%s6757_s6 + $0x770] sm:$0xff] }
 0x137   : > { %3902 = vmatpush1.bf16.msra.mxu0 %v3901_v45  ;;  %v3929_v45 = vpack.c.bf16 %v3342_v38, %v3340_v37  ;;  %v6040_v37 = vld [vmem:[#allocation3] ss:$8 sm:$0x3] }
 0x138   : > { %3904 = vmatprep.subr.bf16.mxu0 %v3903_v47  ;;  %v3344_v47 = vld [vmem:[%s6757_s6 + $0x780] sm:$0xff] }
 0x139   : > { %v632_v58 = vpop.f32.mrb[0].mxu0  ;;  %v795_v61 = vpop.f32.mrb[0].mxu1 }
 0x13a   : > { %v5907_v62 = vadd.f32 %v632_v58, %v559_v52  ;;  %v634_v63 = vpop.f32.mrb[1].mxu0  ;;  %800 = vst [vmem:[#allocation5] sm:$0xff] %v795_v61  ;;  %v797_v0 = vpop.f32.mrb[1].mxu1  ;;  %v3350_v58 = vld [vmem:[%s6757_s6 + $0x7b0] sm:$0xff]  ;;  %v3355_v61 = vld [vmem:[%s6757_s6 + $0x7d8] sm:$0xff] }
 0x13b   : > { %v5909_v1 = vadd.f32 %v634_v63, %v563_v53  ;;  %3906 = vmatpush1.bf16.msra.mxu0 %v3905_v54  ;;  %801 = vst [vmem:[#allocation5 + $0x8] sm:$0xff] %v797_v0  ;;  %v3933_v54 = vpack.c.bf16 %v3346_v48, %v3344_v47  ;;  %v3937_v7 = vpack.c.bf16 %v3350_v58, %v3348_v57 }
 0x13c   : > { %v639_v4 = vmul.f32 1.442695, %v5907_v62  ;;  %3908 = vmatprep.subr.bf16.mxu0 %v3907_v55  ;;  %vm637_vm4 = vcmp.gt.f32.partialorder %v5907_v62, 20.0 }
 0x13d   : > { %v641_v9 = vmul.f32 1.442695, %v5909_v1  ;;  %vm638_vm6 = vcmp.gt.f32.partialorder %v5909_v1, 20.0 }
 0x13e   : > { %3965 = vpow2.f32 %v639_v4 }
 0x13f   : > { %3967 = vpow2.f32 %v641_v9  ;;  %3910 = vmatpush1.bf16.msra.mxu0 %v3909_v2  ;;  %v3939_v9 = vpack.c.bf16 %v3355_v61, %v3353_v60 }
 0x140   : > { %3912 = vmatprep.subr.bf16.mxu0 %v3911_v5 }
 0x142   : > { %v1780_v47 = vld [vmem:[#allocation5] ss:$8 sm:$0x3] }
 0x143   : > { %3914 = vmatpush1.bf16.msra.mxu0 %v3913_v3 }
 0x144   : > { %3916 = vmatprep.subr.bf16.mxu0 %v3915_v41 }
 0x147   : > { %3918 = vmatpush1.bf16.msra.mxu0 %v3917_v17  ;;  %v3943_v17 = vpack.c.bf16 %v3359_v14, %v3357_v12 }
 0x148   : > { %v3966_v24 = vpop.eup %3965  ;;  %3920 = vmatprep.subr.bf16.mxu0 %v3919_v20  ;;  %v3358_v20 = vld [vmem:[%s6757_s6 + $0x7f0] sm:$0xff] }
 0x149   : > { %v3968_v28 = vpop.eup %3967  ;;  %v643_v30 = vadd.f32 1.0, %v3966_v24  ;;  %v646_v43 = vmul.f32 -0.5, %v3966_v24  ;;  %v649_v52 = vand.u32 2147483647, %v3966_v24 }
 0x14a   : > { %v652_v33 = vadd.f32 1.0, %v3968_v28  ;;  %v655_v44 = vmul.f32 -0.5, %v3968_v28  ;;  %v658_v55 = vand.u32 2147483647, %v3968_v28 }
 0x14b   : > { %3969 = vlog2.f32 %v643_v30  ;;  %3922 = vmatpush1.bf16.msra.mxu0 %v3921_v31  ;;  %v647_v51 = vadd.f32 1.0, %v646_v43  ;;  %vm650_vm3 = vcmp.lt.f32.partialorder %v649_v52, 0.0004427343 }
 0x14c   : > { %3971 = vlog2.f32 %v652_v33  ;;  %3924 = vmatprep.subr.bf16.mxu0 %v3923_v25  ;;  %v656_v53 = vadd.f32 1.0, %v655_v44  ;;  %vm659_vm5 = vcmp.lt.f32.partialorder %v658_v55, 0.0004427343  ;;  %v6036_v33 = vld [vmem:[%s6758_s7 + $0x2] sm:$0x3] }
 0x14d   : > { %v648_v2 = vmul.f32 %v3966_v24, %v647_v51  ;;  %v6055_v51 = vld [vmem:[#allocation3 + $0x1] ss:$8 sm:$0x3] }
 0x14e   : > { %v657_v5 = vmul.f32 %v3968_v28, %v656_v53 }
 0x14f   : > { %3926 = vmatpush1.bf16.msra.mxu0 %v3925_v35 }
 0x150   : > { %3928 = vmatprep.subr.bf16.mxu0 %v3927_v36 }
 0x153   : > { %3930 = vmatpush1.bf16.msra.mxu0 %v3929_v45 }
 0x154   : > { %3932 = vmatprep.subr.bf16.mxu0 %v3931_v46 }
 0x155   : > { %v3970_v59 = vpop.eup %3969 }
 0x156   : > { %v3972_v63 = vpop.eup %3971  ;;  %v645_v0 = vmul.f32 0.6931472, %v3970_v59  ;;  %v1921_v59 = vld [vmem:[#allocation5 + $0x1] ss:$8 sm:$0x3] }
 0x157   : > { %v654_v4 = vmul.f32 0.6931472, %v3972_v63  ;;  %3934 = vmatpush1.bf16.msra.mxu0 %v3933_v54 }
 0x158   : > { %v651_v8 = vsel %vm650_vm3, %v648_v2, %v645_v0  ;;  %3936 = vmatprep.subr.bf16.mxu0 %v3935_v56  ;;  %v6071_v0 = vld [vmem:[#allocation3 + $0x2] ss:$8 sm:$0x3] }
 0x159   : > { %v661_v3 = vsel %vm637_vm4, %v5907_v62, %v651_v8  ;;  %v660_v41 = vsel %vm659_vm5, %v657_v5, %v654_v4  ;;  %v3356_v62 = vld [vmem:[%s6757_s6 + $0x7e0] sm:$0xff] }
 0x15a   : > { %663 = vst [vmem:[#allocation4] sm:$0xff] %v661_v3  ;;  %v662_v15 = vsel %vm638_vm6, %v5909_v1, %v660_v41  ;;  %v3945_v21 = vpack.c.bf16 %v3358_v20, %v3356_v62 }
 0x15b   : > { %664 = vst [vmem:[#allocation4 + $0x8] sm:$0xff] %v662_v15  ;;  %3938 = vmatpush1.bf16.msra.mxu0 %v3937_v7  ;;  %v2063_v15 = vld [vmem:[#allocation5 + $0x2] ss:$8 sm:$0x3] }
 0x15c   : > { %3940 = vmatprep.subr.bf16.mxu0 %v3939_v9 }
 0x15f   : > { %3942 = vmatpush1.bf16.msra.mxu0 %v3941_v16 }
 0x160   : > { %3944 = vmatprep.subr.bf16.mxu0 %v3943_v17 }
 0x162   : > { %v6025_v27 = vld [vmem:[#allocation4] ss:$8 sm:$0x3]  ;;  %v6029_v29 = vld [vmem:[#allocation4 + $0x1] ss:$8 sm:$0x3] }
 0x163   : > { %3946 = vmatpush1.bf16.msra.mxu0 %v3945_v21  ;;  %v6038_v36 = vld [vmem:[#allocation4 + $0x2] ss:$8 sm:$0x3]  ;;  %v1795_v38 = vmul.f32 %v6025_v27, %v6036_v33  ;;  %v6048_v43 = vmul.f32 %v6025_v27, %v6040_v37  ;;  %v6050_v48 = vld [vmem:[#allocation4 + $0x3] ss:$8 sm:$0x3]  ;;  %v1937_v50 = vmul.f32 %v6029_v29, %v6036_v33  ;;  %v6063_v54 = vmul.f32 %v6029_v29, %v6055_v51 }
 0x164   : > { %v6066_v60 = vld [vmem:[#allocation4 + $0x4] ss:$8 sm:$0x3]  ;;  %v2079_v63 = vmul.f32 %v6038_v36, %v6036_v33  ;;  %v6079_v8 = vmul.f32 %v6038_v36, %v6071_v0  ;;  %v6088_v16 = vld [vmem:[#allocation4 + $0x5] ss:$8 sm:$0x3]  ;;  %v1796_v20 = vmul.f32 %v6025_v27, %v6085_v11  ;;  %v2221_v21 = vmul.f32 %v6050_v48, %v6036_v33 }
 0x165   : > { %v1800_v44 = vmul.f32 1.442695, %v1795_v38  ;;  %v1811_v49 = vmul.f32 %v6048_v43, %v1780_v47  ;;  %v1942_v56 = vmul.f32 1.442695, %v1937_v50  ;;  %v1953_v61 = vmul.f32 %v6063_v54, %v1921_v59 }
 0x166   : > { %1764 = vmatmul.mubr.f32.vlgmr.msra.gmra.mrb[8].mxu0 %v5477_v18  ;;  %v6023_v18 = vld [vmem:[%s6758_s7] sm:$0x3]  ;;  %v2084_v3 = vmul.f32 1.442695, %v2079_v63  ;;  %v2095_v17 = vmul.f32 %v6079_v8, %v2063_v15  ;;  %v4048_v38 = vmov 1966171168   ;;  %v2363_v50 = vmul.f32 %v6066_v60, %v6036_v33 }
 0x167   : > { %v1794_v28 = vmul.f32 %v6025_v27, %v6023_v18  ;;  %v1936_v32 = vmul.f32 %v6029_v29, %v6023_v18  ;;  %v2078_v42 = vmul.f32 %v6038_v36, %v6023_v18  ;;  %v2220_v53 = vmul.f32 %v6050_v48, %v6023_v18 }
 0x168   : > { %v2362_v7 = vmul.f32 %v6066_v60, %v6023_v18  ;;  %v2080_v15 = vmul.f32 %v6038_v36, %v6085_v11 }
 0x169   : > { %v1798_v30 = vmul.f32 1.442695, %v1794_v28  ;;  %v1940_v35 = vmul.f32 1.442695, %v1936_v32  ;;  %v2082_v46 = vmul.f32 1.442695, %v2078_v42 }
 0x16a   : > { %v2224_v58 = vmul.f32 1.442695, %v2220_v53  ;;  %v2366_v14 = vmul.f32 1.442695, %v2362_v7 }
 0x16b   : > { %3973 = vpow2.f32 %v1798_v30  ;;  %v2226_v30 = vmul.f32 1.442695, %v2221_v21  ;;  %v2343_v53 = vld [vmem:[#allocation3 + $0x4] ss:$8 sm:$0x3] }
 0x16c   : > { %3975 = vpow2.f32 %v1940_v35  ;;  %v2347_v21 = vld [vmem:[#allocation5 + $0x4] ss:$8 sm:$0x3] }
 0x16d   : > { %3977 = vpow2.f32 %v1800_v44  ;;  %v2205_v44 = vld [vmem:[#allocation5 + $0x3] ss:$8 sm:$0x3] }
 0x16e   : > { %3979 = vpow2.f32 %v2082_v46  ;;  %v6109_v46 = vld [vmem:[#allocation4 + $0x6] ss:$8 sm:$0x3] }
 0x16f   : > { %3981 = vpow2.f32 %v1942_v56  ;;  %v2646_v59 = vmul.f32 %v6109_v46, %v6023_v18 }
 0x170   : > { %3983 = vpow2.f32 %v2224_v58  ;;  %v6121_v58 = vld [vmem:[%s6758_s7 + $0x6] sm:$0x3] }
 0x171   : > { %3985 = vpow2.f32 %v2084_v3  ;;  %v1939_v3 = vmul.f32 %v6029_v29, %v6121_v58 }
 0x172   : > { %3987 = vpow2.f32 %v2366_v14 }
 0x175   : > { %v3974_v39 = vpop.eup %3973 }
 0x176   : > { %v1806_v45 = vmul.f32 0.0, %v3974_v39  ;;  %v3976_v55 = vpop.eup %3975  ;;  %v1900_v39 = vunpack.c.l.s4 %v4048_v38 }
 0x177   : > { %v3978_v5 = vpop.eup %3977 }
 0x178   : > { %v6057_v52 = vadd.f32 %v1811_v49, %v1806_v45  ;;  %v3980_v10 = vpop.eup %3979  ;;  %v1807_v12 = vmul.f32 0.0, %v3978_v5  ;;  %v1938_v45 = vmul.f32 %v6029_v29, %v6085_v11  ;;  %v6131_v5 = vmul.f32 %v6066_v60, %v2343_v53 }
 0x179   : > { %v932_v1 = vpop.f32.mrb[2].mxu0  ;;  %v1070_v19 = vpop.f32.mrb[2].mxu1  ;;  %v2081_v29 = vmul.f32 %v6038_v36, %v6121_v58  ;;  %v1946_v36 = vmul.f32 1.442695, %v1939_v3 }
 0x17a   : > { %937 = vst [vmem:[#allocation6] sm:$0xff] %v932_v1  ;;  %1076 = vst [vmem:[#allocation5 + $0x10] sm:$0xff] %v1070_v19  ;;  %v934_v22 = vpop.f32.mrb[3].mxu0  ;;  %v1072_v23 = vpop.f32.mrb[3].mxu1  ;;  %v1948_v57 = vmul.f32 %v3976_v55, %v6057_v52  ;;  %v1944_v63 = vmul.f32 1.442695, %v1938_v45 }
 0x17b   : > { %938 = vst [vmem:[#allocation6 + $0x8] sm:$0xff] %v934_v22  ;;  %1077 = vst [vmem:[#allocation5 + $0x18] sm:$0xff] %v1072_v23  ;;  %v2201_v1 = vld [vmem:[#allocation3 + $0x3] ss:$8 sm:$0x3]  ;;  %v3982_v22 = vpop.eup %3981  ;;  %v2504_v23 = vmul.f32 %v6088_v16, %v6023_v18 }
 0x17c   : > { %v6073_v4 = vadd.f32 %v1953_v61, %v1948_v57  ;;  %v3984_v28 = vpop.eup %3983  ;;  %v1901_v57 = vunpack.c.0.s8 %v1900_v39 }
 0x17d   : > { %v2508_v42 = vmul.f32 1.442695, %v2504_v23  ;;  %v3986_v56 = vpop.eup %3985  ;;  %v2379_v23 = vmul.f32 %v6131_v5, %v2347_v21 }
 0x17e   : > { %v2090_v41 = vmul.f32 %v3980_v10, %v6073_v4  ;;  %v2368_v10 = vmul.f32 1.442695, %v2363_v50  ;;  %v6139_v14 = vsub.s32 %v1901_v57, %v4391_v6  ;;  %v2086_v57 = vmul.f32 1.442695, %v2080_v15 }
 0x180   : > { %v6097_v19 = vadd.f32 %v2095_v17, %v2090_v41  ;;  %6776 = vst [vmem:[#allocation8_spill] sm:$0xff] %v6139_v14  ;;  %v2650_v17 = vmul.f32 1.442695, %v2646_v59  ;;  %v2088_v59 = vmul.f32 1.442695, %v2081_v29 }
 0x182   : > { %v1782_v2 = vld [vmem:[#allocation5 + $0x10] ss:$8 sm:$0x3]  ;;  %v2232_v32 = vmul.f32 %v3984_v28, %v6097_v19  ;;  %v2065_v61 = vld [vmem:[#allocation5 + $0x12] ss:$8 sm:$0x3] }
 0x183   : > { %v1812_v9 = vmul.f32 %v6048_v43, %v1782_v2  ;;  %v6128_v2 = vld [vmem:[%s6759_s8] sm:$0x3]  ;;  %v2485_v28 = vld [vmem:[#allocation3 + $0x5] ss:$8 sm:$0x3] }
 0x184   : > { %v2781_v14 = vld [vmem:[#allocation6 + $0x7] ss:$8 sm:$0x3] }
 0x185   : > { %v6091_v62 = vadd.f32 %v1812_v9, %v1807_v12  ;;  %v3988_v9 = vpop.eup %3987  ;;  %v2096_v12 = vmul.f32 %v6079_v8, %v2065_v61  ;;  %v6175_v61 = vmul.f32 %v6088_v16, %v2485_v28 }
 0x1b9   : > { %v1209_v31 = vpop.f32.mrb[4].mxu0  ;;  %v1348_v24 = vpop.f32.mrb[4].mxu1 }
 0x1ba   : > { %1215 = vst [vmem:[#allocation6 + $0x10] sm:$0xff] %v1209_v31  ;;  %1354 = vst [vmem:[#allocation5 + $0x20] sm:$0xff] %v1348_v24  ;;  %v1211_v25 = vpop.f32.mrb[5].mxu0  ;;  %v1350_v26 = vpop.f32.mrb[5].mxu1  ;;  %v6102_v24 = vmul.f32 %v6050_v48, %v2201_v1 }
 0x1bb   : > { %1216 = vst [vmem:[#allocation6 + $0x18] sm:$0xff] %v1211_v25  ;;  %1355 = vst [vmem:[#allocation5 + $0x28] sm:$0xff] %v1350_v26  ;;  %v1923_v31 = vld [vmem:[#allocation5 + $0x11] ss:$8 sm:$0x3]  ;;  %v1949_v25 = vmul.f32 %v3982_v22, %v6091_v62 }
 0x1bc   : > { %v1802_v26 = vmul.f32 1.442695, %v1796_v20  ;;  %v1954_v35 = vmul.f32 %v6063_v54, %v1923_v31  ;;  %v2237_v47 = vmul.f32 %v6102_v24, %v2205_v44  ;;  %v6145_v20 = vmul.f32 %v6071_v0, %v6128_v2  ;;  %v6149_v22 = vld [vmem:[#allocation4 + $0x7] ss:$8 sm:$0x3] }
 0x1bd   : > { %v6160_v0 = vmul.f32 %v2343_v53, %v6128_v2  ;;  %v2788_v45 = vmul.f32 %v6149_v22, %v6023_v18  ;;  %v2364_v18 = vmul.f32 %v6066_v60, %v6085_v11 }
 0x1be   : > { %v6112_v49 = vadd.f32 %v1954_v35, %v1949_v25  ;;  %3989 = vpow2.f32 %v1802_v26  ;;  %v6116_v55 = vadd.f32 %v2237_v47, %v2232_v32  ;;  %v2505_v25 = vmul.f32 %v6088_v16, %v6036_v33  ;;  %v2207_v47 = vld [vmem:[#allocation5 + $0x13] ss:$8 sm:$0x3] }
 0x1bf   : > { %3991 = vpow2.f32 %v2226_v30  ;;  %v6157_v26 = vmul.f32 %v2201_v1, %v6128_v2  ;;  %6777 = vst [vmem:[#allocation9_spill] sm:$0xff] %v6160_v0  ;;  %v2222_v32 = vmul.f32 %v6050_v48, %v6085_v11  ;;  %v6165_v35 = vmul.f32 %v2485_v28, %v6128_v2 }
 0x1c0   : > { %3993 = vpow2.f32 %v2508_v42  ;;  %v2091_v7 = vmul.f32 %v3986_v56, %v6112_v49  ;;  %v2374_v41 = vmul.f32 %v3988_v9, %v6116_v55  ;;  %v2223_v1 = vmul.f32 %v6050_v48, %v6121_v58 }
 0x1c1   : > { %3995 = vpow2.f32 %v1944_v63  ;;  %6778 = vst [vmem:[#allocation10_spill] sm:$0xff] %v6165_v35  ;;  %v2228_v3 = vmul.f32 1.442695, %v2222_v32  ;;  %v2792_v29 = vmul.f32 1.442695, %v2788_v45 }
 0x1c2   : > { %v6152_v31 = vadd.f32 %v2096_v12, %v2091_v7  ;;  %v1784_v6 = vld [vmem:[#allocation5 + $0x20] ss:$8 sm:$0x3]  ;;  %3997 = vpow2.f32 %v2368_v10  ;;  %v6167_v38 = vadd.f32 %v2379_v23, %v2374_v41  ;;  %v2510_v7 = vmul.f32 1.442695, %v2505_v25 }
 0x1c3   : > { %3999 = vpow2.f32 %v2650_v17  ;;  %v1813_v50 = vmul.f32 %v6048_v43, %v1784_v6  ;;  %v1797_v10 = vmul.f32 %v6025_v27, %v6121_v58  ;;  %v2365_v41 = vmul.f32 %v6066_v60, %v6121_v58  ;;  %v2489_v12 = vld [vmem:[#allocation5 + $0x5] ss:$8 sm:$0x3]  ;;  %v2627_v25 = vld [vmem:[#allocation3 + $0x6] ss:$8 sm:$0x3] }
 0x1c4   : > { %v2238_v17 = vmul.f32 %v6102_v24, %v2207_v47  ;;  %4001 = vpow2.f32 %v1946_v36  ;;  %v2230_v21 = vmul.f32 1.442695, %v2223_v1  ;;  %v2506_v6 = vmul.f32 %v6088_v16, %v6085_v11  ;;  %v1925_v1 = vld [vmem:[#allocation5 + $0x21] ss:$8 sm:$0x3] }
 0x1c5   : > { %4003 = vpow2.f32 %v2086_v57  ;;  %v2521_v27 = vmul.f32 %v6175_v61, %v2489_v12  ;;  %v2370_v60 = vmul.f32 1.442695, %v2364_v18  ;;  %v1804_v32 = vmul.f32 1.442695, %v1797_v10 }
 0x1c6   : > { %4005 = vpow2.f32 %v2510_v7  ;;  %v2507_v47 = vmul.f32 %v6088_v16, %v6121_v58  ;;  %v2512_v57 = vmul.f32 1.442695, %v2506_v6  ;;  %v2649_v18 = vmul.f32 %v6109_v46, %v6121_v58  ;;  %v2631_v10 = vld [vmem:[#allocation5 + $0x6] ss:$8 sm:$0x3] }
 0x1c7   : > { %4007 = vpow2.f32 %v2088_v59  ;;  %v6206_v59 = vmul.f32 %v6109_v46, %v2627_v25  ;;  %v1955_v16 = vmul.f32 %v6063_v54, %v1925_v1  ;;  %v1787_v6 = vld [vmem:[#allocation6] ss:$8 sm:$0x3] }
 0x1c8   : > { %v3990_v30 = vpop.eup %3989  ;;  %4009 = vpow2.f32 %v2792_v29 }
 0x1c9   : > { %v3992_v44 = vpop.eup %3991  ;;  %v1808_v9 = vmul.f32 0.0, %v3990_v30  ;;  %v2647_v30 = vmul.f32 %v6109_v46, %v6036_v33  ;;  %4011 = vpow2.f32 %v2228_v3  ;;  %v2769_v3 = vld [vmem:[#allocation3 + $0x7] ss:$8 sm:$0x3] }
 0x1ca   : > { %v2233_v63 = vmul.f32 %v3992_v44, %v6152_v31  ;;  %v3994_v48 = vpop.eup %3993  ;;  %4013 = vpow2.f32 %v1804_v32  ;;  %v1929_v32 = vld [vmem:[#allocation6 + $0x1] ss:$8 sm:$0x3] }
 0x1cb   : > { %v2516_v15 = vmul.f32 %v3994_v48, %v6167_v38  ;;  %v6186_v23 = vadd.f32 %v1813_v50, %v1808_v9  ;;  %v3996_v36 = vpop.eup %3995  ;;  %v2648_v50 = vmul.f32 %v6109_v46, %v6085_v11  ;;  %v2652_v7 = vmul.f32 1.442695, %v2647_v30 }
 0x1cc   : > { %v6191_v28 = vadd.f32 %v2238_v17, %v2233_v63  ;;  %v3998_v45 = vpop.eup %3997  ;;  %4015 = vpow2.f32 %v2230_v21  ;;  %v2789_v9 = vmul.f32 %v6149_v22, %v6036_v33  ;;  %v2790_v46 = vmul.f32 %v6149_v22, %v6085_v11  ;;  %v2773_v11 = vld [vmem:[#allocation5 + $0x7] ss:$8 sm:$0x3] }
 0x1cd   : > { %v6198_v44 = vadd.f32 %v2521_v27, %v2516_v15  ;;  %v4000_v48 = vpop.eup %3999  ;;  %4017 = vpow2.f32 %v2370_v60  ;;  %v2514_v15 = vmul.f32 1.442695, %v2507_v47  ;;  %v2654_v17 = vmul.f32 1.442695, %v2648_v50 }
 0x1ce   : > { %v2375_v63 = vmul.f32 %v3998_v45, %v6191_v28  ;;  %v2663_v21 = vmul.f32 %v6206_v59, %v2631_v10  ;;  %v6223_v33 = vpop.eup %4001  ;;  %v2791_v60 = vmul.f32 %v6149_v22, %v6121_v58  ;;  %v6228_v30 = vmul.f32 %v6149_v22, %v2769_v3  ;;  %v2067_v45 = vld [vmem:[#allocation5 + $0x22] ss:$8 sm:$0x3] }
 0x1cf   : > { %v6233_v50 = vmul.f32 %v2769_v3, %v6128_v2  ;;  %v2071_v58 = vld [vmem:[#allocation6 + $0x2] ss:$8 sm:$0x3]  ;;  %v2097_v3 = vmul.f32 %v6079_v8, %v2067_v45 }
 0x1d0   : > { %v2805_v10 = vmul.f32 %v6228_v30, %v2773_v11 }
 0x1d1   : > { %6780 = vst [vmem:[#allocation12_spill] sm:$0xff] %v6233_v50 }
 0x1f9   : > { %v1487_v39 = vpop.f32.mrb[6].mxu0  ;;  %v1626_v42 = vpop.f32.mrb[6].mxu1 }
 0x1fa   : > { %1493 = vst [vmem:[#allocation6 + $0x20] sm:$0xff] %v1487_v39  ;;  %1632 = vst [vmem:[#allocation5 + $0x30] sm:$0xff] %v1626_v42  ;;  %v1489_v53 = vpop.f32.mrb[7].mxu0  ;;  %v1628_v56 = vpop.f32.mrb[7].mxu1  ;;  %v2372_v39 = vmul.f32 1.442695, %v2365_v41  ;;  %v6196_v42 = vmul.f32 %v2627_v25, %v6128_v2  ;;  %v2658_v41 = vmul.f32 %v4000_v48, %v6198_v44  ;;  %v1961_v48 = vmul.f32 %v6073_v4, %v1929_v32 }
 0x1fb   : > { %1494 = vst [vmem:[#allocation6 + $0x28] sm:$0xff] %v1489_v53  ;;  %1633 = vst [vmem:[#allocation5 + $0x38] sm:$0xff] %v1628_v56  ;;  %v2349_v53 = vld [vmem:[#allocation5 + $0x14] ss:$8 sm:$0x3]  ;;  %v1950_v56 = vmul.f32 %v3996_v36, %v6186_v23  ;;  %v4004_v36 = vpop.eup %4003 }
 0x1fc   : > { %6779 = vst [vmem:[#allocation11_spill] sm:$0xff] %v6196_v42  ;;  %v2380_v12 = vmul.f32 %v6131_v5, %v2349_v53  ;;  %4019 = vpow2.f32 %v2372_v39  ;;  %v2656_v25 = vmul.f32 1.442695, %v2649_v18  ;;  %v2794_v39 = vmul.f32 1.442695, %v2789_v9  ;;  %v4006_v47 = vpop.eup %4005 }
 0x1fd   : > { %v6216_v29 = vadd.f32 %v1955_v16, %v1950_v56  ;;  %4021 = vpow2.f32 %v2652_v7  ;;  %v6230_v1 = vadd.f32 %v2663_v21, %v2658_v41  ;;  %v1819_v53 = vmul.f32 %v6057_v52, %v1787_v6  ;;  %v2491_v56 = vld [vmem:[#allocation5 + $0x15] ss:$8 sm:$0x3]  ;;  %v2213_v18 = vld [vmem:[#allocation6 + $0x3] ss:$8 sm:$0x3] }
 0x1fe   : > { %v6221_v27 = vadd.f32 %v2380_v12, %v2375_v63  ;;  %4023 = vpow2.f32 %v2512_v57  ;;  %v6237_v63 = vpop.eup %4007  ;;  %v2796_v57 = vmul.f32 1.442695, %v2790_v46  ;;  %v6241_v9 = vmul.f32 1.442695, %v2791_v60 }
 0x1ff   : > { %4025 = vpow2.f32 %v2514_v15  ;;  %v2092_v22 = vmul.f32 %v4004_v36, %v6216_v29  ;;  %v4010_v16 = vpop.eup %4009  ;;  %v2633_v52 = vld [vmem:[#allocation5 + $0x16] ss:$8 sm:$0x3]  ;;  %v2103_v12 = vmul.f32 %v6097_v19, %v2071_v58  ;;  %v2522_v4 = vmul.f32 %v6175_v61, %v2491_v56 }
 0x200   : > { %4027 = vpow2.f32 %v2654_v17  ;;  %v2517_v7 = vmul.f32 %v4006_v47, %v6221_v27  ;;  %v4012_v41 = vpop.eup %4011  ;;  %v2800_v15 = vmul.f32 %v4010_v16, %v6230_v1  ;;  %v2775_v17 = vld [vmem:[#allocation5 + $0x17] ss:$8 sm:$0x3]  ;;  %v1830_v6 = vrot.slane %v1819_v53, %v4479_v40 }
 0x201   : > { %4029 = vpow2.f32 %v2656_v25  ;;  %v4014_v21 = vpop.eup %4013  ;;  %v1834_v25 = vrot.slane %v1819_v53, %v4461_v34  ;;  %v2245_v60 = vmul.f32 %v6116_v55, %v2213_v18  ;;  %v6251_v32 = vadd.f32 %v2097_v3, %v2092_v22  ;;  %v2497_v53 = vld [vmem:[#allocation6 + $0x5] ss:$8 sm:$0x3] }
 0x202   : > { %4031 = vpow2.f32 %v2794_v39  ;;  %v1786_v46 = vld [vmem:[#allocation5 + $0x30] ss:$8 sm:$0x3]  ;;  %v6253_v36 = vpop.eup %4015  ;;  %v1972_v19 = vrot.slane %v1961_v48, %v4479_v40  ;;  %v2355_v39 = vld [vmem:[#allocation6 + $0x4] ss:$8 sm:$0x3]  ;;  %v2664_v11 = vmul.f32 %v6206_v59, %v2633_v52  ;;  %v6257_v45 = vadd.f32 %v2522_v4, %v2517_v7 }
 0x203   : > { %6781 = vst [vmem:[#allocation13_spill] sm:$0xff] %v6251_v32  ;;  %4033 = vpow2.f32 %v2796_v57  ;;  %v4018_v47 = vpop.eup %4017  ;;  %v1976_v58 = vrot.slane %v1961_v48, %v4461_v34  ;;  %v6261_v56 = vmul.f32 %v6167_v38, %v2355_v39  ;;  %v6264_v55 = vmul.f32 %v6228_v30, %v2775_v17  ;;  %v2209_v52 = vld [vmem:[#allocation5 + $0x23] ss:$8 sm:$0x3] }
 0x204   : > { %v1814_v22 = vmul.f32 %v6048_v43, %v1786_v46  ;;  %v2114_v18 = vrot.slane %v2103_v12, %v4479_v40  ;;  %v2118_v16 = vrot.slane %v2103_v12, %v4461_v34  ;;  %v2809_v7 = vadd.f32 %v2805_v10, %v2800_v15  ;;  %v2639_v39 = vld [vmem:[#allocation6 + $0x6] ss:$8 sm:$0x3] }
 0x205   : > { %v1809_v3 = vmul.f32 0.0, %v4014_v21  ;;  %v6272_v48 = vsel %vm1867_vm7, %v1830_v6, 0.0  ;;  %v6275_v38 = vsel %vm1867_vm7, %v1834_v25, 0.0  ;;  %v2256_v17 = vrot.slane %v2245_v60, %v4479_v40  ;;  %v1927_v21 = vld [vmem:[#allocation5 + $0x31] ss:$8 sm:$0x3] }
 0x206   : > { %v6267_v57 = vpop.eup %4019  ;;  %v2234_v43 = vmul.f32 %v4012_v41, %v6251_v32  ;;  %v6282_v13 = vsel %vm1867_vm7, %v1972_v19, 0.0  ;;  %v2260_v10 = vrot.slane %v2245_v60, %v4461_v34  ;;  %v2529_v12 = vmul.f32 %v6198_v44, %v2497_v53 }
 0x207   : > { %v4022_v4 = vpop.eup %4021  ;;  %v6290_v25 = vsel %vm1867_vm7, %v1976_v58, 0.0  ;;  %v2398_v41 = vrot.slane %v6261_v56, %v4479_v40  ;;  %v2239_v50 = vmul.f32 %v6102_v24, %v2209_v52  ;;  %v6295_v19 = vadd.f32 %v1814_v22, %v1809_v3  ;;  %v1931_v52 = vld [vmem:[#allocation6 + $0x11] ss:$8 sm:$0x3] }
 0x208   : > { %v6279_v46 = vpop.eup %4023  ;;  %v2659_v15 = vmul.f32 %v4022_v4, %v6257_v45  ;;  %v6300_v44 = vsel %vm1867_vm7, %v2114_v18, 0.0  ;;  %v6303_v60 = vsel %vm1867_vm7, %v2118_v16, 0.0  ;;  %v2671_v53 = vmul.f32 %v6230_v1, %v2639_v39  ;;  %v1789_v4 = vld [vmem:[#allocation6 + $0x10] ss:$8 sm:$0x3] }
 0x209   : > { %v6287_v6 = vpop.eup %4025  ;;  %6782 = vst [vmem:[#allocation14_spill] sm:$0xff] %v6295_v19  ;;  %v2813_v58 = vmul.f32 %v2809_v7, %v2781_v14  ;;  %v6309_v32 = vsel %vm1867_vm7, %v2256_v17, 0.0  ;;  %v6311_v22 = vadd.f32 %v2239_v50, %v2234_v43  ;;  %v1956_v3 = vmul.f32 %v6063_v54, %v1927_v21  ;;  %v2069_v17 = vld [vmem:[#allocation5 + $0x32] ss:$8 sm:$0x3] }
 0x20a   : > { %v6297_v42 = vpop.eup %4027  ;;  %v1951_v18 = vmul.f32 %v6223_v33, %v6295_v19  ;;  %v6317_v16 = vsel %vm1867_vm7, %v2260_v10, 0.0  ;;  %v2402_v14 = vrot.slane %v6261_v56, %v4461_v34  ;;  %v2540_v1 = vrot.slane %v2529_v12, %v4479_v40  ;;  %v2073_v43 = vld [vmem:[#allocation6 + $0x12] ss:$8 sm:$0x3] }
 0x20b   : > { %v6306_v35 = vpop.eup %4029  ;;  %6784 = vst [vmem:[#allocation16_spill] sm:$0xff] %v6311_v22  ;;  %v2668_v7 = vadd.f32 %v2664_v11, %v2659_v15  ;;  %v6323_v39 = vsel %vm1867_vm7, %v2398_v41, 0.0  ;;  %v2544_v50 = vrot.slane %v2529_v12, %v4461_v34  ;;  %v1820_v54 = vmul.f32 %v6091_v62, %v1789_v4  ;;  %v2351_v15 = vld [vmem:[#allocation5 + $0x24] ss:$8 sm:$0x3] }
 0x20c   : > { %6783 = vst [vmem:[#allocation15_spill] sm:$0xff] %v6306_v35  ;;  %v4032_v0 = vpop.eup %4031  ;;  %v6327_v33 = vadd.f32 %v1956_v3, %v1951_v18  ;;  %v2682_v10 = vrot.slane %v2671_v53, %v4479_v40  ;;  %v2686_v56 = vrot.slane %v2671_v53, %v4461_v34  ;;  %v2824_v19 = vrot.slane %v2813_v58, %v4479_v40  ;;  %v2215_v35 = vld [vmem:[#allocation6 + $0x13] ss:$8 sm:$0x3] }
 0x20d   : > { %v6329_v21 = vpop.eup %4033  ;;  %v1962_v11 = vmul.f32 %v6112_v49, %v1931_v52  ;;  %v2828_v41 = vrot.slane %v2813_v58, %v4461_v34  ;;  %v2376_v12 = vmul.f32 %v4018_v47, %v6311_v22  ;;  %v2098_v62 = vmul.f32 %v6079_v8, %v2069_v17 }
 0x20e   : > { %6785 = vst [vmem:[#allocation17_spill] sm:$0xff] %v6327_v33  ;;  %v2093_v4 = vmul.f32 %v6237_v63, %v6327_v33  ;;  %v6341_v3 = vsel %vm1867_vm7, %v2402_v14, 0.0  ;;  %v6344_v53 = vsel %vm1867_vm7, %v2540_v1, 0.0  ;;  %v2104_v18 = vmul.f32 %v6152_v31, %v2073_v43  ;;  %v2357_v31 = vld [vmem:[#allocation6 + $0x14] ss:$8 sm:$0x3] }
 0x20f   : > { %v2801_v49 = vmul.f32 %v4032_v0, %v2668_v7  ;;  %v1838_v52 = vrot.slane %v1820_v54, %v4479_v40  ;;  %v1842_v58 = vrot.slane %v1820_v54, %v4461_v34  ;;  %v2381_v47 = vmul.f32 %v6131_v5, %v2351_v15  ;;  %v2499_v43 = vld [vmem:[#allocation6 + $0x15] ss:$8 sm:$0x3] }
 0x210   : > { %v6350_v22 = vadd.f32 %v2098_v62, %v2093_v4  ;;  %v6353_v8 = vsel %vm1867_vm7, %v2544_v50, 0.0  ;;  %v6356_v63 = vsel %vm1867_vm7, %v2682_v10, 0.0  ;;  %v1980_v14 = vrot.slane %v1962_v11, %v4479_v40  ;;  %v2783_v4 = vld [vmem:[#allocation6 + $0x17] ss:$8 sm:$0x3] }
 0x211   : > { %v2246_v1 = vmul.f32 %v6191_v28, %v2215_v35  ;;  %v6361_v0 = vsel %vm1867_vm7, %v2686_v56, 0.0  ;;  %v6364_v17 = vsel %vm1867_vm7, %v2824_v19, 0.0  ;;  %v6367_v54 = vsel %vm1867_vm7, %v2828_v41, 0.0  ;;  %v2641_v35 = vld [vmem:[#allocation6 + $0x16] ss:$8 sm:$0x3] }
 0x212   : > { %v6369_v50 = vadd.f32 %v2381_v47, %v2376_v12  ;;  %4035 = vpow2.f32 %v6241_v9  ;;  %v1984_v10 = vrot.slane %v1962_v11, %v4461_v34  ;;  %v2122_v15 = vrot.slane %v2104_v18, %v4479_v40  ;;  %v2211_v56 = vld [vmem:[#allocation5 + $0x33] ss:$8 sm:$0x3] }
 0x213   : > { %v2810_v28 = vadd.f32 %v6264_v55, %v2801_v49  ;;  %v1869_v62 = vsel %vm1867_vm7, %v1838_v52, 0.0  ;;  %v1876_v19 = vsel %vm1867_vm7, %v1842_v58, 0.0  ;;  %v2388_v41 = vmul.f32 %v6221_v27, %v2357_v31  ;;  %v2493_v55 = vld [vmem:[#allocation5 + $0x25] ss:$8 sm:$0x3] }
 0x214   : > { %v2235_v12 = vmul.f32 %v6253_v36, %v6350_v22  ;;  %v2010_v9 = vsel %vm1867_vm7, %v1980_v14, 0.0  ;;  %v2126_v11 = vrot.slane %v2104_v18, %v4461_v34  ;;  %v2264_v47 = vrot.slane %v2246_v1, %v4479_v40 }
 0x215   : > { %v2530_v33 = vmul.f32 %v6257_v45, %v2499_v43  ;;  %v2268_v49 = vrot.slane %v2246_v1, %v4461_v34  ;;  %v2672_v52 = vmul.f32 %v2668_v7, %v2641_v35  ;;  %v2518_v58 = vmul.f32 %v6279_v46, %v6369_v50 }
 0x216   : > { %v2240_v27 = vmul.f32 %v6102_v24, %v2211_v56  ;;  %v6389_v31 = vadd.f32 %v1869_v62, %v6272_v48  ;;  %v6392_v36 = vadd.f32 %v1876_v19, %v6275_v38  ;;  %v2017_v18 = vsel %vm1867_vm7, %v1984_v10, 0.0 }
 0x217   : > { %v2814_v14 = vmul.f32 %v2810_v28, %v2783_v4  ;;  %v6396_v45 = vadd.f32 %v2010_v9, %v6282_v13  ;;  %v2406_v1 = vrot.slane %v2388_v41, %v4479_v40  ;;  %v2523_v7 = vmul.f32 %v6175_v61, %v2493_v55 }
 0x218   : > { %v6400_v43 = vadd.f32 %v2240_v27, %v2235_v12  ;;  %v2152_v24 = vsel %vm1867_vm7, %v2122_v15, 0.0  ;;  %v2159_v48 = vsel %vm1867_vm7, %v2126_v11, 0.0  ;;  %v2410_v46 = vrot.slane %v2388_v41, %v4461_v34  ;;  %v2353_v41 = vld [vmem:[#allocation5 + $0x34] ss:$8 sm:$0x3] }
 0x219   : > { %v2548_v38 = vrot.slane %v2530_v33, %v4479_v40  ;;  %v2294_v10 = vsel %vm1867_vm7, %v2264_v47, 0.0  ;;  %v2552_v35 = vrot.slane %v2530_v33, %v4461_v34  ;;  %v2690_v13 = vrot.slane %v2672_v52, %v4479_v40 }
 0x21a   : > { %v6409_v28 = vadd.f32 %v2523_v7, %v2518_v58  ;;  %v6412_v56 = vadd.f32 %v2017_v18, %v6290_v25  ;;  %v2301_v62 = vsel %vm1867_vm7, %v2268_v49, 0.0  ;;  %v2694_v15 = vrot.slane %v2672_v52, %v4461_v34  ;;  %v2635_v49 = vld [vmem:[#allocation5 + $0x26] ss:$8 sm:$0x3] }
 0x21b   : > { %v2832_v19 = vrot.slane %v2814_v14, %v4479_v40  ;;  %v6418_v4 = vadd.f32 %v2152_v24, %v6300_v44  ;;  %v2436_v12 = vsel %vm1867_vm7, %v2406_v1, 0.0  ;;  %v2836_v33 = vrot.slane %v2814_v14, %v4461_v34  ;;  %v2777_v1 = vld [vmem:[#allocation5 + $0x27] ss:$8 sm:$0x3] }
 0x21c   : > { %v2377_v9 = vmul.f32 %v6267_v57, %v6400_v43  ;;  %v6424_v11 = vpop.eup %4035  ;;  %v6427_v25 = vadd.f32 %v2159_v48, %v6303_v60  ;;  %v6430_v47 = vadd.f32 %v2294_v10, %v6309_v32  ;;  %v2443_v55 = vsel %vm1867_vm7, %v2410_v46, 0.0  ;;  %v1791_v48 = vld [vmem:[#allocation6 + $0x20] ss:$8 sm:$0x3] }
 0x21d   : > { %v2578_v44 = vsel %vm1867_vm7, %v2548_v38, 0.0  ;;  %v2585_v52 = vsel %vm1867_vm7, %v2552_v35, 0.0  ;;  %v2720_v58 = vsel %vm1867_vm7, %v2690_v13, 0.0  ;;  %v2660_v57 = vmul.f32 %v6297_v42, %v6409_v28  ;;  %v1933_v35 = vld [vmem:[#allocation6 + $0x21] ss:$8 sm:$0x3] }
 0x21e   : > { %v2382_v27 = vmul.f32 %v6131_v5, %v2353_v41  ;;  %v6440_v60 = vadd.f32 %v2301_v62, %v6317_v16  ;;  %v6443_v32 = vadd.f32 %v2436_v12, %v6323_v39  ;;  %v2727_v18 = vsel %vm1867_vm7, %v2694_v15, 0.0  ;;  %v2495_v62 = vld [vmem:[#allocation5 + $0x35] ss:$8 sm:$0x3] }
 0x21f   : > { %v2862_v14 = vsel %vm1867_vm7, %v2832_v19, 0.0  ;;  %v6448_v7 = vadd.f32 %v2443_v55, %v6341_v3  ;;  %v2869_v24 = vsel %vm1867_vm7, %v2836_v33, 0.0  ;;  %v2665_v42 = vmul.f32 %v6206_v59, %v2635_v49  ;;  %v2075_v15 = vld [vmem:[#allocation6 + $0x22] ss:$8 sm:$0x3]  ;;  %v6786_v33 = vld [vmem:[#allocation9_spill] sm:$0xff] }
 0x220   : > { %v6452_v5 = vadd.f32 %v2382_v27, %v2377_v9  ;;  %v6455_v16 = vadd.f32 %v2578_v44, %v6344_v53  ;;  %v6458_v39 = vadd.f32 %v2585_v52, %v6353_v8  ;;  %v6461_v46 = vadd.f32 %v2720_v58, %v6356_v63  ;;  %v6787_v58 = vld [vmem:[#allocation13_spill] sm:$0xff]  ;;  %v2359_v27 = vld [vmem:[#allocation6 + $0x24] ss:$8 sm:$0x3] }
 0x221   : > { %v6465_v3 = vmul.f32 %v6040_v37, %v6128_v2  ;;  %v6468_v38 = vadd.f32 %v2727_v18, %v6361_v0  ;;  %v6471_v10 = vadd.f32 %v2862_v14, %v6364_v17  ;;  %v2669_v13 = vadd.f32 %v2665_v42, %v2660_v57  ;;  %v6788_v14 = vld [vmem:[#allocation16_spill] sm:$0xff]  ;;  %v2637_v19 = vld [vmem:[#allocation5 + $0x36] ss:$8 sm:$0x3] }
 0x222   : > { %v6475_v53 = vmul.f32 %v6055_v51, %v6128_v2  ;;  %v6478_v8 = vadd.f32 %v2869_v24, %v6367_v54  ;;  %v2807_v63 = vmul.f32 %v6228_v30, %v2777_v1  ;;  %v1821_v37 = vmul.f32 %v6186_v23, %v1791_v48  ;;  %v2217_v23 = vld [vmem:[#allocation6 + $0x23] ss:$8 sm:$0x3]  ;;  %v2501_v1 = vld [vmem:[#allocation6 + $0x25] ss:$8 sm:$0x3] }
 0x223   : > { %v2519_v2 = vmul.f32 %v6287_v6, %v6452_v5  ;;  %v1963_v54 = vmul.f32 %v6216_v29, %v1933_v35  ;;  %v1887_v41 = vrot.slane %v6465_v3, %v4479_v40  ;;  %v1891_v12 = vrot.slane %v6465_v3, %v4461_v34  ;;  %v6789_v24 = vld [vmem:[#allocation10_spill] sm:$0xff]  ;;  %v6791_v42 = vld [vmem:[#allocation12_spill] sm:$0xff] }
 0x224   : > { %v2802_v55 = vmul.f32 %v6329_v21, %v2669_v13  ;;  %v2524_v44 = vmul.f32 %v6175_v61, %v2495_v62  ;;  %v2028_v49 = vrot.slane %v6475_v53, %v4479_v40  ;;  %v2032_v29 = vrot.slane %v6475_v53, %v4461_v34  ;;  %v2643_v62 = vld [vmem:[#allocation6 + $0x26] ss:$8 sm:$0x3] }
 0x225   : > { %v1846_v6 = vrot.slane %v1821_v37, %v4479_v40  ;;  %v1850_v52 = vrot.slane %v1821_v37, %v4461_v34  ;;  %v2105_v57 = vmul.f32 %v6787_v58, %v2075_v15  ;;  %v2247_v21 = vmul.f32 %v6788_v14, %v2217_v23  ;;  %v6790_v15 = vld [vmem:[#allocation11_spill] sm:$0xff] }
 0x226   : > { %v6511_v61 = vadd.f32 %v2524_v44, %v2519_v2  ;;  %v1988_v35 = vrot.slane %v1963_v54, %v4479_v40  ;;  %v1992_v37 = vrot.slane %v1963_v54, %v4461_v34  ;;  %v2389_v2 = vmul.f32 %v6369_v50, %v2359_v27  ;;  %v2785_v44 = vld [vmem:[#allocation6 + $0x27] ss:$8 sm:$0x3] }
 0x227   : > { %v2811_v14 = vadd.f32 %v2807_v63, %v2802_v55  ;;  %v1871_v9 = vsel %vm1867_vm7, %v1846_v6, 0.0  ;;  %v1878_v54 = vsel %vm1867_vm7, %v1850_v52, 0.0  ;;  %v2130_v51 = vrot.slane %v2105_v57, %v4479_v40  ;;  %v6792_v55 = vld [vmem:[#allocation15_spill] sm:$0xff] }
 0x228   : > { %v2531_v58 = vmul.f32 %v6409_v28, %v2501_v1  ;;  %v2134_v23 = vrot.slane %v2105_v57, %v4461_v34  ;;  %v2272_v50 = vrot.slane %v2247_v21, %v4479_v40  ;;  %v2673_v63 = vmul.f32 %v2669_v13, %v2643_v62 }
 0x229   : > { %v2661_v27 = vmul.f32 %v6792_v55, %v6511_v61  ;;  %v2012_v18 = vsel %vm1867_vm7, %v1988_v35, 0.0  ;;  %v2019_v48 = vsel %vm1867_vm7, %v1992_v37, 0.0  ;;  %v2276_v6 = vrot.slane %v2247_v21, %v4461_v34 }
 0x22a   : > { %v2815_v52 = vmul.f32 %v2811_v14, %v2785_v44  ;;  %v6540_v0 = vadd.f32 %v1871_v9, %v6389_v31  ;;  %v6543_v28 = vadd.f32 %v1878_v54, %v6392_v36  ;;  %v2414_v57 = vrot.slane %v2389_v2, %v4479_v40 }
 0x22b   : > { %v2666_v13 = vmul.f32 %v6206_v59, %v2637_v19  ;;  %v2154_v35 = vsel %vm1867_vm7, %v2130_v51, 0.0  ;;  %v2418_v37 = vrot.slane %v2389_v2, %v4461_v34  ;;  %v2556_v21 = vrot.slane %v2531_v58, %v4479_v40 }
 0x22c   : > { %v2560_v62 = vrot.slane %v2531_v58, %v4461_v34  ;;  %v2161_v31 = vsel %vm1867_vm7, %v2134_v23, 0.0  ;;  %v2698_v36 = vrot.slane %v2673_v63, %v4479_v40  ;;  %v2702_v9 = vrot.slane %v2673_v63, %v4461_v34 }
 0x22d   : > { %v6554_v44 = vadd.f32 %v2666_v13, %v2661_v27  ;;  %v2013_v59 = vadd.f32 %v2012_v18, %v6396_v45  ;;  %v2840_v19 = vrot.slane %v2815_v52, %v4479_v40  ;;  %v2844_v51 = vrot.slane %v2815_v52, %v4461_v34 }
 0x22e   : > { %v2020_v2 = vadd.f32 %v2019_v48, %v6412_v56  ;;  %v2155_v58 = vadd.f32 %v2154_v35, %v6418_v4  ;;  %v2303_v23 = vsel %vm1867_vm7, %v2276_v6, 0.0  ;;  %v2438_v14 = vsel %vm1867_vm7, %v2414_v57, 0.0 }
 0x22f   : > { %v2162_v54 = vadd.f32 %v2161_v31, %v6427_v25  ;;  %v2445_v63 = vsel %vm1867_vm7, %v2418_v37, 0.0  ;;  %v2580_v45 = vsel %vm1867_vm7, %v2556_v21, 0.0  ;;  %v2587_v18 = vsel %vm1867_vm7, %v2560_v62, 0.0  ;;  %v6793_v37 = vld [vmem:[#allocation14_spill] sm:$0xff] }
 0x230   : > { %v2722_v27 = vsel %vm1867_vm7, %v2698_v36, 0.0  ;;  %v2729_v56 = vsel %vm1867_vm7, %v2702_v9, 0.0  ;;  %v2803_v4 = vmul.f32 %v6424_v11, %v6554_v44  ;;  %v2304_v48 = vadd.f32 %v2303_v23, %v6440_v60 }
 0x231   : > { %v6575_v25 = vadd.f32 %v2438_v14, %v6443_v32  ;;  %v2864_v6 = vsel %vm1867_vm7, %v2840_v19, 0.0  ;;  %v6579_v52 = vsel %vm1867_vm7, %v2844_v51, 0.0  ;;  %v6582_v57 = vadd.f32 %v2445_v63, %v6448_v7  ;;  %v6794_v7 = vld [vmem:[#allocation17_spill] sm:$0xff] }
 0x232   : > { %v6588_v13 = vadd.f32 %v2587_v18, %v6458_v39  ;;  %v6592_v32 = vadd.f32 %v2722_v27, %v6461_v46  ;;  %v6595_v35 = vadd.f32 %v2729_v56, %v6468_v38  ;;  %v6600_v36 = vadd.f32 %v2864_v6, %v6471_v10 }
 0x239   : > { %v1765_v17 = vpop.f32.mrb[8].mxu0 }
 0x23a   : > { %1771 = vst [vmem:[#allocation6 + $0x30] sm:$0xff] %v1765_v17  ;;  %v1767_v1 = vpop.f32.mrb[9].mxu0  ;;  %v2296_v17 = vsel %vm1867_vm7, %v2272_v50, 0.0  ;;  %v2779_v50 = vld [vmem:[#allocation5 + $0x37] ss:$8 sm:$0x3] }
 0x23b   : > { %1772 = vst [vmem:[#allocation6 + $0x38] sm:$0xff] %v1767_v1  ;;  %v2297_v55 = vadd.f32 %v2296_v17, %v6430_v47  ;;  %v6585_v47 = vadd.f32 %v2580_v45, %v6455_v16  ;;  %v2808_v11 = vmul.f32 %v6228_v30, %v2779_v50 }
 0x23d   : > { %v6604_v9 = vadd.f32 %v2808_v11, %v2803_v4 }
 0x242   : > { %v1793_v60 = vld [vmem:[#allocation6 + $0x30] ss:$8 sm:$0x3]  ;;  %v1935_v1 = vld [vmem:[#allocation6 + $0x31] ss:$8 sm:$0x3] }
 0x243   : > { %v1822_v21 = vmul.f32 %v6793_v37, %v1793_v60  ;;  %v1964_v62 = vmul.f32 %v6794_v7, %v1935_v1  ;;  %v2077_v31 = vld [vmem:[#allocation6 + $0x32] ss:$8 sm:$0x3]  ;;  %v2219_v16 = vld [vmem:[#allocation6 + $0x33] ss:$8 sm:$0x3] }
 0x244   : > { %v2106_v39 = vmul.f32 %v6350_v22, %v2077_v31  ;;  %v2248_v30 = vmul.f32 %v6400_v43, %v2219_v16  ;;  %v2361_v4 = vld [vmem:[#allocation6 + $0x34] ss:$8 sm:$0x3]  ;;  %v2503_v6 = vld [vmem:[#allocation6 + $0x35] ss:$8 sm:$0x3] }
 0x245   : > { %v1854_v46 = vrot.slane %v1822_v21, %v4479_v40  ;;  %v1858_v38 = vrot.slane %v1822_v21, %v4461_v34  ;;  %v1996_v17 = vrot.slane %v1964_v62, %v4479_v40  ;;  %v2000_v19 = vrot.slane %v1964_v62, %v4461_v34 }
 0x246   : > { %v2138_v51 = vrot.slane %v2106_v39, %v4479_v40  ;;  %v2142_v23 = vrot.slane %v2106_v39, %v4461_v34  ;;  %v2280_v10 = vrot.slane %v2248_v30, %v4479_v40  ;;  %v2284_v22 = vrot.slane %v2248_v30, %v4461_v34 }
 0x247   : > { %v1873_v43 = vsel %vm1867_vm7, %v1854_v46, 0.0  ;;  %v1880_v14 = vsel %vm1867_vm7, %v1858_v38, 0.0  ;;  %v2014_v63 = vsel %vm1867_vm7, %v1996_v17, 0.0  ;;  %v2021_v45 = vsel %vm1867_vm7, %v2000_v19, 0.0 }
 0x248   : > { %v1874_v18 = vadd.f32 %v1873_v43, %v6540_v0  ;;  %v1881_v50 = vadd.f32 %v1880_v14, %v6543_v28  ;;  %v2015_v27 = vadd.f32 %v2014_v63, %v2013_v59  ;;  %v2022_v56 = vadd.f32 %v2021_v45, %v2020_v2 }
 0x249   : > { %v2156_v11 = vsel %vm1867_vm7, %v2138_v51, 0.0  ;;  %v2163_v60 = vsel %vm1867_vm7, %v2142_v23, 0.0  ;;  %v2298_v1 = vsel %vm1867_vm7, %v2280_v10, 0.0  ;;  %v2305_v37 = vsel %vm1867_vm7, %v2284_v22, 0.0 }
 0x24a   : > { %v1894_v21 = vadd.f32 %v1887_v41, %v1874_v18  ;;  %v1895_v0 = vadd.f32 %v1891_v12, %v1881_v50  ;;  %v2035_v28 = vadd.f32 %v2028_v49, %v2015_v27  ;;  %v2036_v59 = vadd.f32 %v2032_v29, %v2022_v56  ;;  %v2645_v51 = vld [vmem:[#allocation6 + $0x36] ss:$8 sm:$0x3]  ;;  %v2787_v23 = vld [vmem:[#allocation6 + $0x37] ss:$8 sm:$0x3] }
 0x24b   : > { %v2157_v2 = vadd.f32 %v2156_v11, %v2155_v58  ;;  %v2164_v7 = vadd.f32 %v2163_v60, %v2162_v54  ;;  %v2299_v62 = vadd.f32 %v2298_v1, %v2297_v55  ;;  %v2306_v31 = vadd.f32 %v2305_v37, %v2304_v48  ;;  %v6799_v48 = vld [vmem:[#allocation8_spill] sm:$0xff] }
 0x24c   : > { %v1898_v16 = vcombine.low %v1894_v21, %v1895_v0  ;;  %v2039_v39 = vcombine.low %v2035_v28, %v2036_v59  ;;  %v2390_v41 = vmul.f32 %v6452_v5, %v2361_v4  ;;  %v2532_v3 = vmul.f32 %v6511_v61, %v2503_v6 }
 0x24d   : > { %v6795_v12 = vrot.slane %v6145_v20, %v4479_v40  ;;  %v6796_v49 = vrot.slane %v6145_v20, %v4461_v34  ;;  %v6797_v29 = vrot.slane %v6157_v26, %v4479_v40  ;;  %v6798_v54 = vrot.slane %v6157_v26, %v4461_v34 }
 0x24e   : > { %v1905_v5 = vrot.slane %v1898_v16, %v6799_v48  ;;  %v2046_v61 = vrot.slane %v2039_v39, %v6799_v48  ;;  %v2422_v46 = vrot.slane %v2390_v41, %v4479_v40  ;;  %v2426_v38 = vrot.slane %v2390_v41, %v4461_v34 }
 0x24f   : > { %v2177_v30 = vadd.f32 %v6795_v12, %v2157_v2  ;;  %v2178_v53 = vadd.f32 %v6796_v49, %v2164_v7  ;;  %v2319_v58 = vadd.f32 %v6797_v29, %v2299_v62  ;;  %v2320_v55 = vadd.f32 %v6798_v54, %v2306_v31 }
 0x250   : > { %v2564_v26 = vrot.slane %v2532_v3, %v4479_v40  ;;  %v2568_v19 = vrot.slane %v2532_v3, %v4461_v34  ;;  %v1912_v10 = vrot.slane %v1905_v5, %v6799_v48  ;;  %v2053_v22 = vrot.slane %v2046_v61, %v6799_v48 }
 0x251   : > { %v2181_v20 = vcombine.low %v2177_v30, %v2178_v53  ;;  %v2323_v17 = vcombine.low %v2319_v58, %v2320_v55  ;;  %v2440_v43 = vsel %vm1867_vm7, %v2422_v46, 0.0  ;;  %v2447_v14 = vsel %vm1867_vm7, %v2426_v38, 0.0 }
 0x252   : > { %v2441_v18 = vadd.f32 %v2440_v43, %v6575_v25  ;;  %v2448_v50 = vadd.f32 %v2447_v14, %v6582_v57  ;;  %1914 = vst.msk [vmem:[%s6659_s25] ss:$8 sm:$0x3] %vm4135_vm0, %v1912_v10  ;;  %3360 = vst.msk [vmem:[%s6659_s25 + $0x1] ss:$8 sm:$0x3] %vm4135_vm0, %v2053_v22  ;;  %v2674_v6 = vmul.f32 %v6554_v44, %v2645_v51 }
 0x253   : > { %v2188_v63 = vrot.slane %v2181_v20, %v6799_v48  ;;  %v2330_v45 = vrot.slane %v2323_v17, %v6799_v48  ;;  %v2582_v56 = vsel %vm1867_vm7, %v2564_v26, 0.0  ;;  %v2589_v4 = vsel %vm1867_vm7, %v2568_v19, 0.0 }
 0x254   : > { %v2816_v11 = vmul.f32 %v6604_v9, %v2787_v23  ;;  %v6801_v60 = vrot.slane %v6786_v33, %v4479_v40  ;;  %v6802_v37 = vrot.slane %v6786_v33, %v4461_v34  ;;  %v2583_v0 = vadd.f32 %v2582_v56, %v6585_v47 }
 0x255   : > { %v2195_v25 = vrot.slane %v2188_v63, %v6799_v48  ;;  %v2337_v57 = vrot.slane %v2330_v45, %v6799_v48  ;;  %v2590_v28 = vadd.f32 %v2589_v4, %v6588_v13  ;;  %v2706_v44 = vrot.slane %v2674_v6, %v4479_v40 }
 0x256   : > { %v2461_v1 = vadd.f32 %v6801_v60, %v2441_v18  ;;  %v2462_v21 = vadd.f32 %v6802_v37, %v2448_v50  ;;  %v2710_v9 = vrot.slane %v2674_v6, %v4461_v34  ;;  %v2872_v59 = vadd.f32 %v6579_v52, %v6478_v8 }
 0x257   : > { %3361 = vst.msk [vmem:[%s6659_s25 + $0x2] ss:$8 sm:$0x3] %vm4135_vm0, %v2195_v25  ;;  %3362 = vst.msk [vmem:[%s6659_s25 + $0x3] ss:$8 sm:$0x3] %vm4135_vm0, %v2337_v57  ;;  %v2848_v33 = vrot.slane %v2816_v11, %v4479_v40  ;;  %v2852_v47 = vrot.slane %v2816_v11, %v4461_v34  ;;  %v6803_v13 = vrot.slane %v6789_v24, %v4479_v40 }
 0x258   : > { %v2465_v2 = vcombine.low %v2461_v1, %v2462_v21  ;;  %v6804_v62 = vrot.slane %v6789_v24, %v4461_v34  ;;  %v2724_v8 = vsel %vm1867_vm7, %v2706_v44, 0.0  ;;  %v2731_v52 = vsel %vm1867_vm7, %v2710_v9, 0.0 }
 0x259   : > { %v2603_v7 = vadd.f32 %v6803_v13, %v2583_v0  ;;  %v2725_v39 = vadd.f32 %v2724_v8, %v6592_v32  ;;  %v2732_v41 = vadd.f32 %v2731_v52, %v6595_v35  ;;  %v2866_v3 = vsel %vm1867_vm7, %v2848_v33, 0.0 }
 0x25a   : > { %v2604_v31 = vadd.f32 %v6804_v62, %v2590_v28  ;;  %v2472_v16 = vrot.slane %v2465_v2, %v6799_v48  ;;  %v2867_v30 = vadd.f32 %v2866_v3, %v6600_v36  ;;  %v2873_v24 = vsel %vm1867_vm7, %v2852_v47, 0.0 }
 0x25b   : > { %v6805_v53 = vrot.slane %v6790_v15, %v4479_v40  ;;  %v6806_v32 = vrot.slane %v6790_v15, %v4461_v34  ;;  %v2874_v58 = vadd.f32 %v2873_v24, %v2872_v59  ;;  %v6807_v36 = vrot.slane %v6791_v42, %v4479_v40 }
 0x25c   : > { %v2607_v12 = vcombine.low %v2603_v7, %v2604_v31  ;;  %v2479_v49 = vrot.slane %v2472_v16, %v6799_v48  ;;  %v6808_v61 = vrot.slane %v6791_v42, %v4461_v34 }
 0x25d   : > { %v2745_v29 = vadd.f32 %v6805_v53, %v2725_v39  ;;  %v2746_v35 = vadd.f32 %v6806_v32, %v2732_v41  ;;  %v2887_v55 = vadd.f32 %v6807_v36, %v2867_v30 }
 0x25e   : > { %v2614_v54 = vrot.slane %v2607_v12, %v6799_v48  ;;  %3363 = vst.msk [vmem:[%s6659_s25 + $0x4] ss:$8 sm:$0x3] %vm4135_vm0, %v2479_v49  ;;  %v2888_v46 = vadd.f32 %v6808_v61, %v2874_v58 }
 0x25f   : > { %v2749_v5 = vcombine.low %v2745_v29, %v2746_v35 }
 0x260   : > { %v2621_v38 = vrot.slane %v2614_v54, %v6799_v48  ;;  %v2891_v20 = vcombine.low %v2887_v55, %v2888_v46 }
 0x261   : > { %v2756_v15 = vrot.slane %v2749_v5, %v6799_v48 }
 0x262   : > { %3364 = vst.msk [vmem:[%s6659_s25 + $0x5] ss:$8 sm:$0x3] %vm4135_vm0, %v2621_v38  ;;  %v2898_v40 = vrot.slane %v2891_v20, %v6799_v48 }
 0x263   : > { %v2763_v17 = vrot.slane %v2756_v15, %v6799_v48 }
 0x264   : > { %v2905_v26 = vrot.slane %v2898_v40, %v6799_v48 }
 0x265   : > { %3365 = vst.msk [vmem:[%s6659_s25 + $0x6] ss:$8 sm:$0x3] %vm4135_vm0, %v2763_v17 }
 0x266   : > { %3366 = vst.msk [vmem:[%s6659_s25 + $0x7] ss:$8 sm:$0x3] %vm4135_vm0, %v2905_v26 }
 0x267 PF: > { %s19_s30 = sadd.s32 1, %s4045_s30  }
 0x268   : > { %p16_p4 = scmp.ge.s32.totalorder %s19_s30, 4  }
 0x26a   :  { %18 = sbr.rel (!%p16_p4) target bundleno = 1 (0x1), region = 182 }

</bundles_post_ra>
